<compile_context>
chip_gen: v7x
topology: tpu7x:2x2x1
jax: 0.10.0
libtpu: 0.0.40
codegen_flags: <defaults>
</compile_context>

<pallas_src>
import jax
import jax.numpy as jnp
from jax.experimental import pallas as pl
from jax.experimental.pallas import tpu as pltpu

LANES = 128


def mlp_kernel(x_ref, w1_ref, b1_ref, w2_ref, b2_ref, w3_ref, b3_ref, out_ref):
    # Cast activations to bf16 in-kernel (cheap VPU packs hidden under the matmul).
    x = x_ref[...].astype(jnp.bfloat16)
    # fc1 + ReLU   (dropout1 is identity in eval mode). bf16 matmul, f32 accumulate.
    h1 = jnp.dot(x, w1_ref[...], preferred_element_type=jnp.float32)
    h1 = jnp.maximum(h1 + b1_ref[...], 0.0)
    # fc2 + ReLU   (dropout2 is identity in eval mode)
    h2 = jnp.dot(h1.astype(jnp.bfloat16), w2_ref[...],
                 preferred_element_type=jnp.float32)
    h2 = jnp.maximum(h2 + b2_ref[...], 0.0)
    # fc3 (logits; output dim pre-padded to a multiple of 128 lanes -> lane-dense vst)
    out = jnp.dot(h2.astype(jnp.bfloat16), w3_ref[...],
                  preferred_element_type=jnp.float32)
    out_ref[...] = (out + b3_ref[...]).astype(out_ref.dtype)


def prepare_params(w1, b1, w2, b2, w3, b3):
    """One-time (load-time) parameter prep — NOT on the per-call forward path.

    Weights are stored as [in_features, out_features] so the kernel computes
    x @ W + b (identical math to PyTorch's x @ W.T + b with W: [out, in]).
    Weights -> bf16 for the MXU; biases stay f32 (added in f32 in-kernel);
    fc3 W/b are zero-padded to a multiple of 128 output lanes.
    """
    h2_f, n_cls = w3.shape
    n_out = max(LANES, ((n_cls + LANES - 1) // LANES) * LANES)
    w3_p = jnp.zeros((h2_f, n_out), jnp.bfloat16).at[:, :n_cls].set(
        w3.astype(jnp.bfloat16))
    b3_p = jnp.zeros((1, n_out), jnp.float32).at[:, :n_cls].set(
        b3.astype(jnp.float32).reshape(1, -1))
    return (w1.astype(jnp.bfloat16), b1.astype(jnp.float32).reshape(1, -1),
            w2.astype(jnp.bfloat16), b2.astype(jnp.float32).reshape(1, -1),
            w3_p, b3_p)


def _num_tensorcores():
    """2 TensorCores per chip on v7x (and v4/v5p megacore); 1 on v5e/v6e."""
    try:
        kind = jax.devices()[0].device_kind.lower()
    except Exception:
        return 1
    if ("v7" in kind) or ("v4" in kind) or ("v5p" in kind):
        return 2
    return 1


def _pick_block_b(B, max_block_b=2048):
    """Whole batch (grid=1) on single-TC chips; split across TCs on dual-TC chips.

    max_block_b keeps per-tile VMEM residency (x/out tiles + [block_b,512] f32
    intermediates) well inside v7x's 64 MiB VMEM if callers push B up.
    """
    n_tc = _num_tensorcores()
    if n_tc > 1 and B >= 16:
        bb = -(-B // n_tc)              # ceil(B / n_tc)
        bb = ((bb + 7) // 8) * 8        # sublane-aligned when < B
    else:
        bb = B
    if bb > max_block_b:
        bb = max_block_b                # multiple of 8
    return bb


def mlp_images_forward(x, params, num_classes, *, block_b=None,
                       out_dtype=jnp.float32):
    """x: [B, input_size] float32; params from prepare_params/init_params.

    Returns logits [B, num_classes] in out_dtype (f32 by default, matching PyTorch).
    """
    w1, b1, w2, b2, w3, b3 = params
    B, in_f = x.shape
    h1_f = w1.shape[1]
    h2_f = w2.shape[1]
    n_out = w3.shape[1]

    if block_b is None:
        block_b = _pick_block_b(B)
    n_blocks = pl.cdiv(B, block_b)

    # Constant-index weight/bias blocks never change across grid steps -> single
    # buffer (saves the pointless second weight buffer + DMA bookkeeping).
    def _const(shape):
        return pl.BlockSpec(shape, lambda i: (0, 0), pipeline_mode=pl.Buffered(1))

    flops = 2 * B * (in_f * h1_f + h1_f * h2_f + h2_f * n_out)
    bytes_accessed = (
        B * in_f * x.dtype.itemsize                          # activations in
        + 2 * (in_f * h1_f + h1_f * h2_f + h2_f * n_out)     # bf16 weights
        + 4 * (h1_f + h2_f + n_out)                          # f32 biases
        + B * n_out * jnp.dtype(out_dtype).itemsize)         # logits out
    cost = pl.CostEstimate(flops=flops, transcendentals=0,
                           bytes_accessed=bytes_accessed)

    out = pl.pallas_call(
        mlp_kernel,
        out_shape=jax.ShapeDtypeStruct((B, n_out), out_dtype),
        grid_spec=pltpu.PrefetchScalarGridSpec(
            num_scalar_prefetch=0,
            grid=(n_blocks,),
            in_specs=[
                # Batch tile of activations (f32; cast to bf16 inside the kernel).
                # No explicit batch padding: a ragged last block reads undefined
                # rows, which only affect OOB output rows (masked on store).
                pl.BlockSpec((block_b, in_f), lambda i: (i, 0)),
                _const((in_f, h1_f)),
                _const((1, h1_f)),
                _const((h1_f, h2_f)),
                _const((1, h2_f)),
                _const((h2_f, n_out)),
                _const((1, n_out)),
            ],
            out_specs=pl.BlockSpec((block_b, n_out), lambda i: (i, 0)),
        ),
        compiler_params=pltpu.CompilerParams(
            dimension_semantics=("parallel",),
            vmem_limit_bytes=32 * 1024 * 1024,
        ),
        cost_estimate=cost,
    )(x, w1, b1, w2, b2, w3, b3)

    # Only the column slice remains in the wrapper (logits back to num_classes).
    return out[:, :num_classes]


def init_params(key, input_size, num_classes):
    """Deterministic init mimicking PyTorch nn.Linear (uniform +/- 1/sqrt(fan_in)),
    already converted to the kernel's storage format (bf16, fc3 padded)."""
    dims = [(input_size, 512), (512, 256), (256, num_classes)]
    raw = []
    for i, (fan_in, fan_out) in enumerate(dims):
        kw, kb = jax.random.split(jax.random.fold_in(key, i))
        bound = 1.0 / (fan_in ** 0.5)
        w = jax.random.uniform(kw, (fan_in, fan_out), jnp.float32, -bound, bound)
        b = jax.random.uniform(kb, (1, fan_out), jnp.float32, -bound, bound)
        raw += [w, b]
    return prepare_params(*raw)


if __name__ == "__main__":
    key = jax.random.PRNGKey(0)

    # SelectKBest(k=128) => input_size = 128; small synthetic num_classes.
    input_size = 128
    num_classes = 10
    batch = 512   # grid=1 on v5e/v6e (single TC); 2 parallel steps on v7x (2 TCs)

    kx, kp = jax.random.split(key)
    x = jax.random.normal(kx, (batch, input_size), dtype=jnp.float32)
    params = init_params(kp, input_size, num_classes)

    out = mlp_images_forward(x, params, num_classes)
    out = jax.block_until_ready(out)
    assert out.shape == (batch, num_classes)
    assert out.dtype == jnp.float32

    # Reference check in plain JAX, mirroring the kernel's quantization points
    # (bf16 x / weights / inter-layer activations; f32 accumulation + bias add).
    w1, b1, w2, b2, w3, b3 = params
    f32 = lambda a: a.astype(jnp.float32)
    xq = f32(x.astype(jnp.bfloat16))
    h1 = jnp.maximum(xq @ f32(w1) + b1, 0.0)
    h2 = jnp.maximum(f32(h1.astype(jnp.bfloat16)) @ f32(w2) + b2, 0.0)
    ref = (f32(h2.astype(jnp.bfloat16)) @ f32(w3) + b3)[:, :num_classes]
    assert jnp.allclose(out, ref, atol=2e-2, rtol=2e-2), (
        float(jnp.max(jnp.abs(out - ref))))

    print("KERNEL_OK")
</pallas_src>

<mosaic_0001>
module attributes {stable_mosaic.version = 11 : i64} {
  func.func @mlp_kernel(%arg0: i32, %arg1: memref<512x128xf32, #tpu.memory_space<vmem>>, %arg2: memref<128x512xbf16, #tpu.memory_space<vmem>>, %arg3: memref<1x512xf32, #tpu.memory_space<vmem>>, %arg4: memref<512x256xbf16, #tpu.memory_space<vmem>>, %arg5: memref<1x256xf32, #tpu.memory_space<vmem>>, %arg6: memref<256x128xbf16, #tpu.memory_space<vmem>>, %arg7: memref<1x128xf32, #tpu.memory_space<vmem>>, %arg8: memref<512x128xf32, #tpu.memory_space<vmem>>) attributes {dimension_semantics = [#tpu.dimension_semantics<parallel>], iteration_bounds = array<i64: 1>, scalar_prefetch = 0 : i64, scratch_operands = 0 : i64, tpu.core_type = #tpu.core_type<tc>, window_params = [{transform_indices = @transform_0, window_bounds = array<i64: 512, 128>}, {pipeline_mode = #tpu.pipeline_mode<synchronous>, transform_indices = @transform_1, window_bounds = array<i64: 128, 512>}, {pipeline_mode = #tpu.pipeline_mode<synchronous>, transform_indices = @transform_2, window_bounds = array<i64: 1, 512>}, {pipeline_mode = #tpu.pipeline_mode<synchronous>, transform_indices = @transform_3, window_bounds = array<i64: 512, 256>}, {pipeline_mode = #tpu.pipeline_mode<synchronous>, transform_indices = @transform_4, window_bounds = array<i64: 1, 256>}, {pipeline_mode = #tpu.pipeline_mode<synchronous>, transform_indices = @transform_5, window_bounds = array<i64: 256, 128>}, {pipeline_mode = #tpu.pipeline_mode<synchronous>, transform_indices = @transform_6, window_bounds = array<i64: 1, 128>}, {transform_indices = @transform_7, window_bounds = array<i64: 512, 128>}]} {
    %c0 = arith.constant 0 : index
    %c0_0 = arith.constant 0 : index
    %0 = vector.load %arg1[%c0, %c0_0] : memref<512x128xf32, #tpu.memory_space<vmem>>, vector<512x128xf32>
    %1 = arith.truncf %0 : vector<512x128xf32> to vector<512x128xbf16>
    %c0_1 = arith.constant 0 : index
    %c0_2 = arith.constant 0 : index
    %2 = vector.load %arg2[%c0_1, %c0_2] : memref<128x512xbf16, #tpu.memory_space<vmem>>, vector<128x512xbf16>
    %cst = arith.constant dense<0.000000e+00> : vector<512x512xf32>
    %3 = tpu.matmul %1, %2, %cst {dimension_numbers = #tpu.dot_dimension_numbers<[1], [0], [0], [1], [0, 0, 1, 1], [], []>} : vector<512x128xbf16>, vector<128x512xbf16>, vector<512x512xf32> -> vector<512x512xf32>
    %c0_3 = arith.constant 0 : index
    %c0_4 = arith.constant 0 : index
    %4 = vector.load %arg3[%c0_3, %c0_4] : memref<1x512xf32, #tpu.memory_space<vmem>>, vector<1x512xf32>
    %5 = vector.broadcast %4 : vector<1x512xf32> to vector<512x512xf32>
    %6 = arith.addf %3, %5 : vector<512x512xf32>
    %cst_5 = arith.constant 0.000000e+00 : f32
    %7 = vector.broadcast %cst_5 : f32 to vector<512x512xf32>
    %8 = arith.maximumf %6, %7 : vector<512x512xf32>
    %9 = arith.truncf %8 : vector<512x512xf32> to vector<512x512xbf16>
    %c0_6 = arith.constant 0 : index
    %c0_7 = arith.constant 0 : index
    %10 = vector.load %arg4[%c0_6, %c0_7] : memref<512x256xbf16, #tpu.memory_space<vmem>>, vector<512x256xbf16>
    %cst_8 = arith.constant dense<0.000000e+00> : vector<512x256xf32>
    %11 = tpu.matmul %9, %10, %cst_8 {dimension_numbers = #tpu.dot_dimension_numbers<[1], [0], [0], [1], [0, 0, 1, 1], [], []>} : vector<512x512xbf16>, vector<512x256xbf16>, vector<512x256xf32> -> vector<512x256xf32>
    %c0_9 = arith.constant 0 : index
    %c0_10 = arith.constant 0 : index
    %12 = vector.load %arg5[%c0_9, %c0_10] : memref<1x256xf32, #tpu.memory_space<vmem>>, vector<1x256xf32>
    %13 = vector.broadcast %12 : vector<1x256xf32> to vector<512x256xf32>
    %14 = arith.addf %11, %13 : vector<512x256xf32>
    %cst_11 = arith.constant 0.000000e+00 : f32
    %15 = vector.broadcast %cst_11 : f32 to vector<512x256xf32>
    %16 = arith.maximumf %14, %15 : vector<512x256xf32>
    %17 = arith.truncf %16 : vector<512x256xf32> to vector<512x256xbf16>
    %c0_12 = arith.constant 0 : index
    %c0_13 = arith.constant 0 : index
    %18 = vector.load %arg6[%c0_12, %c0_13] : memref<256x128xbf16, #tpu.memory_space<vmem>>, vector<256x128xbf16>
    %cst_14 = arith.constant dense<0.000000e+00> : vector<512x128xf32>
    %19 = tpu.matmul %17, %18, %cst_14 {dimension_numbers = #tpu.dot_dimension_numbers<[1], [0], [0], [1], [0, 0, 1, 1], [], []>} : vector<512x256xbf16>, vector<256x128xbf16>, vector<512x128xf32> -> vector<512x128xf32>
    %c0_15 = arith.constant 0 : index
    %c0_16 = arith.constant 0 : index
    %20 = vector.load %arg7[%c0_15, %c0_16] : memref<1x128xf32, #tpu.memory_space<vmem>>, vector<1x128xf32>
    %21 = vector.broadcast %20 : vector<1x128xf32> to vector<512x128xf32>
    %22 = arith.addf %19, %21 : vector<512x128xf32>
    %c0_17 = arith.constant 0 : index
    %c0_18 = arith.constant 0 : index
    %23 = vector.load %arg8[%c0_17, %c0_18] : memref<512x128xf32, #tpu.memory_space<vmem>>, vector<512x128xf32>
    tpu.vector_store %arg8[%c0_17, %c0_18], %22 {strides = array<i32>} : memref<512x128xf32, #tpu.memory_space<vmem>>, vector<512x128xf32>,
    return
  }
  func.func @transform_0(%arg0: i32) -> (i32, i32) {
    %c0_i32 = arith.constant 0 : i32
    %c0_i32_0 = arith.constant 0 : i32
    return %arg0, %c0_i32 : i32, i32
  }
  func.func @transform_1(%arg0: i32) -> (i32, i32) {
    %c0_i32 = arith.constant 0 : i32
    %c0_i32_0 = arith.constant 0 : i32
    %c0_i32_1 = arith.constant 0 : i32
    return %c0_i32, %c0_i32_0 : i32, i32
  }
  func.func @transform_2(%arg0: i32) -> (i32, i32) {
    %c0_i32 = arith.constant 0 : i32
    %c0_i32_0 = arith.constant 0 : i32
    %c0_i32_1 = arith.constant 0 : i32
    return %c0_i32, %c0_i32_0 : i32, i32
  }
  func.func @transform_3(%arg0: i32) -> (i32, i32) {
    %c0_i32 = arith.constant 0 : i32
    %c0_i32_0 = arith.constant 0 : i32
    %c0_i32_1 = arith.constant 0 : i32
    return %c0_i32, %c0_i32_0 : i32, i32
  }
  func.func @transform_4(%arg0: i32) -> (i32, i32) {
    %c0_i32 = arith.constant 0 : i32
    %c0_i32_0 = arith.constant 0 : i32
    %c0_i32_1 = arith.constant 0 : i32
    return %c0_i32, %c0_i32_0 : i32, i32
  }
  func.func @transform_5(%arg0: i32) -> (i32, i32) {
    %c0_i32 = arith.constant 0 : i32
    %c0_i32_0 = arith.constant 0 : i32
    %c0_i32_1 = arith.constant 0 : i32
    return %c0_i32, %c0_i32_0 : i32, i32
  }
  func.func @transform_6(%arg0: i32) -> (i32, i32) {
    %c0_i32 = arith.constant 0 : i32
    %c0_i32_0 = arith.constant 0 : i32
    %c0_i32_1 = arith.constant 0 : i32
    return %c0_i32, %c0_i32_0 : i32, i32
  }
  func.func @transform_7(%arg0: i32) -> (i32, i32) {
    %c0_i32 = arith.constant 0 : i32
    %c0_i32_0 = arith.constant 0 : i32
    return %arg0, %c0_i32 : i32, i32
  }
}

</mosaic_0001>

<bundles_post_ra>
// kernel: tpu_custom_call.1
= control target key start
LH: loop header
LB: loop body
LE: loop exit
PB: predicated region body
PF: predicated region fallthrough
CT: control target
= control target key end

     0   :  { %12 = vsyncpa [#allocation3], 0  ;;  %s5072_s0 = inlined_call_operand.hbm [shape: f32[512,128], index: 0, kind: input, shape index: {}]   ;;  %s5073_s1 = inlined_call_operand.hbm [shape: bf16[128,512], index: 1, kind: input, shape index: {}]   ;;  %s5074_s2 = inlined_call_operand.vmem [shape: f32[1,512], index: 2, kind: input, shape index: {}]   ;;  %s5075_s3 = inlined_call_operand.hbm [shape: bf16[512,256], index: 3, kind: input, shape index: {}]   ;;  %s5076_s4 = inlined_call_operand.vmem [shape: f32[1,256], index: 4, kind: input, shape index: {}]   ;;  %s5077_s5 = inlined_call_operand.hbm [shape: bf16[256,128], index: 5, kind: input, shape index: {}]   ;;  %s5078_s6 = inlined_call_operand.vmem [shape: f32[1,128], index: 6, kind: input, shape index: {}]   ;;  %s5079_s7 = inlined_call_operand.hbm [shape: f32[512,128], index: 7, kind: output, shape index: {}]  }
   0x1   :  { %13 = vsyncpa [#allocation6], 0 }
   0x2   :  { %14 = vsyncpa [#allocation9], 0 }
   0x3   :  { %15 = vsyncpa [#allocation4], 0  ;;  %s3960_s24 = smov [#allocation5]   ;;  %s3842_s28 = scalar_lea.hbm %s5073_s1, 4096 }
   0x4   :  { %s33_s25 = sshll.u32 %s3960_s24, 4  ;;  %p3843_p0 = scmp.ne.s32.totalorder %s5073_s1, %s3842_s28  ;;  %s34_s25 = int_to_ptr.vmem [resolvable:$true] %s33_s25 }
   0x5   :  { %p3846_p1 = scmp.lt.u32.totalorder %s3842_s28, %s5073_s1 }
   0x7   :  { %p3848_p2 = pnand %p3846_p1, %p3843_p0 }
   0x9   :  { %3851 = shalt.err (!%p3848_p2)
}
   0xa   :  { %s3852_s10 = scalar_lea.vmem %s34_s25, 4096  ;;  %p3857_p4 = scmp.lt.s32.totalorder %s34_s25, %s34_s25 }
   0xb   :  { %p3853_p3 = scmp.ne.s32.totalorder %s34_s25, %s3852_s10  ;;  %p3858_p5 = scmp.lt.s32.totalorder %s3852_s10, %s3852_s10 }
   0xd   :  { %p3859_p6 = por %p3858_p5, %p3857_p4 }
   0xf   :  { %p3860_p7 = pnand %p3859_p6, %p3853_p3 }
  0x11   :  { %3863 = shalt.err (!%p3860_p7)
}
  0x12   :  { %s3961_s11 = smov 256   ;;  %s3962_s12 = smov 16  }
  0x13   :  { %39 = dma.hbm_to_vmem [thread:$0]  %s5073_s1, 4096, %s34_s25, [#allocation6], %s3961_s11, %s3961_s11, %s3962_s12  }
  0x14   :  { %s3963_s15 = smov [#allocation2]   ;;  %s3864_s19 = scalar_lea.hbm %s5072_s0, 8192 }
  0x15   :  { %s21_s16 = sshll.u32 %s3963_s15, 4  ;;  %p3865_p8 = scmp.ne.s32.totalorder %s5072_s0, %s3864_s19  ;;  %s22_s16 = int_to_ptr.vmem [resolvable:$true] %s21_s16 }
  0x16   :  { %p3868_p9 = scmp.lt.u32.totalorder %s3864_s19, %s5072_s0 }
  0x18   :  { %p3870_p10 = pnand %p3868_p9, %p3865_p8 }
  0x1a   :  { %3873 = shalt.err (!%p3870_p10)
}
  0x1b   :  { %s3874_s24 = scalar_lea.vmem %s22_s16, 8192  ;;  %p3879_p12 = scmp.lt.s32.totalorder %s22_s16, %s22_s16 }
  0x1c   :  { %p3875_p11 = scmp.ne.s32.totalorder %s22_s16, %s3874_s24  ;;  %p3880_p13 = scmp.lt.s32.totalorder %s3874_s24, %s3874_s24 }
  0x1e   :  { %p3881_p0 = por %p3880_p13, %p3879_p12 }
  0x20   :  { %p3882_p1 = pnand %p3881_p0, %p3875_p11 }
  0x22   :  { %3885 = shalt.err (!%p3882_p1)
}
  0x23   :  { %s3964_s1 = smov 128   ;;  %s3965_s25 = smov 8  }
  0x24   :  { %27 = dma.hbm_to_vmem [thread:$0]  %s5072_s0, 8192, %s22_s16, [#allocation3], %s3964_s1, %s3964_s1, %s3965_s25  }
  0x25   :  { %s3966_s28 = smov [#allocation7]   ;;  %s3967_s30 = smov [#allocation8]  }
  0x26   :  { %s47_s29 = sshll.u32 %s3966_s28, 4  ;;  %s61_s8 = sshll.u32 %s3967_s30, 4  ;;  %s48_s29 = int_to_ptr.vmem [resolvable:$true] %s47_s29  ;;  %s4039_s8 = int_to_ptr.vmem [resolvable:$true] %s61_s8 }
  0x27   :  { %s3886_s11 = scalar_lea.hbm %s5075_s3, 8192 }
  0x28   :  { %p3887_p2 = scmp.ne.s32.totalorder %s5075_s3, %s3886_s11  ;;  %p3890_p3 = scmp.lt.u32.totalorder %s3886_s11, %s5075_s3 }
  0x2a   :  { %p3892_p4 = pnand %p3890_p3, %p3887_p2 }
  0x2c   :  { %3895 = shalt.err (!%p3892_p4)
}
  0x2d   :  { %s3896_s0 = scalar_lea.vmem %s48_s29, 8192  ;;  %p3901_p6 = scmp.lt.s32.totalorder %s48_s29, %s48_s29 }
  0x2e   :  { %p3897_p5 = scmp.ne.s32.totalorder %s48_s29, %s3896_s0  ;;  %p3902_p7 = scmp.lt.s32.totalorder %s3896_s0, %s3896_s0 }
  0x30   :  { %p3903_p8 = por %p3902_p7, %p3901_p6 }
  0x32   :  { %p3904_p9 = pnand %p3903_p8, %p3897_p5 }
  0x34   :  { %3907 = shalt.err (!%p3904_p9)
}
  0x35   :  { %53 = dma.hbm_to_vmem [thread:$0]  %s5075_s3, 8192, %s48_s29, [#allocation6], %s3964_s1, %s3964_s1, %s3965_s25  }
  0x36   :  { %s3908_s20 = scalar_lea.hbm %s5077_s5, 2048 }
  0x37   :  { %p3909_p10 = scmp.ne.s32.totalorder %s5077_s5, %s3908_s20  ;;  %p3912_p11 = scmp.lt.u32.totalorder %s3908_s20, %s5077_s5 }
  0x39   :  { %p3914_p12 = pnand %p3912_p11, %p3909_p10 }
  0x3b   :  { %3917 = shalt.err (!%p3914_p12)
}
  0x3c   :  { %s3918_s26 = scalar_lea.vmem %s4039_s8, 2048  ;;  %p3923_p0 = scmp.lt.s32.totalorder %s4039_s8, %s4039_s8 }
  0x3d   :  { %p3919_p13 = scmp.ne.s32.totalorder %s4039_s8, %s3918_s26  ;;  %p3924_p1 = scmp.lt.s32.totalorder %s3918_s26, %s3918_s26 }
  0x3f   :  { %p3925_p2 = por %p3924_p1, %p3923_p0 }
  0x41   :  { %p3926_p3 = pnand %p3925_p2, %p3919_p13 }
  0x43   :  { %3929 = shalt.err (!%p3926_p3)
}
  0x44   :  { %s3968_s3 = smov 64   ;;  %s3969_s27 = smov 4  }
  0x45   :  { %67 = dma.hbm_to_vmem [thread:$0]  %s5077_s5, 2048, %s4039_s8, [#allocation9], %s3968_s3, %s3968_s3, %s3969_s27  }
  0x46   :  { %3952 = dma.done.wait [#allocation3], 8192  }
  0x47   :  { %3953 = vsyncadd [#allocation3], 4294959104 }
  0x48   :  { %3954 = dma.done.wait [#allocation6], 12288  }
  0x49   :  { %3955 = vsyncadd [#allocation6], 4294955008 }
  0x4a   :  { %3956 = dma.done.wait [#allocation9], 2048  }
  0x4b   :  { %3957 = vsyncadd [#allocation9], 4294965248  ;;  %v3970_v0 = vmov 0   ;;  %v3681_v1 = vld [vmem:[#allocation5 + $0x4] ss:$16 sps:$4 sm:$0xff]   ;;  %v84_v18 = vld [vmem:[#allocation2 + $0x8] sm:$0xff] }
  0x4c   :  { %425 = vmatprep.mubr.bf16.mxu0 %v3970_v0  ;;  %585 = vmatprep.mubr.bf16.mxu1 %v3970_v0  ;;  %v3683_v2 = vld [vmem:[#allocation5] ss:$16 sps:$4 sm:$0xff]   ;;  %v3684_v3 = vld [vmem:[#allocation5 + $0x24] ss:$16 sps:$4 sm:$0xff]   ;;  %v116_v20 = vld [vmem:[#allocation2 + $0x108] sm:$0xff] }
  0x4d   :  { %393 = vmatprep.subr.bf16.mxu0 %v3681_v1  ;;  %3397 = vmatprep.subr.bf16.mxu1 %v3681_v1  ;;  %v3686_v4 = vld [vmem:[#allocation5 + $0x20] ss:$16 sps:$4 sm:$0xff]   ;;  %v3687_v5 = vld [vmem:[#allocation5 + $0x44] ss:$16 sps:$4 sm:$0xff]   ;;  %v3722_v22 = vld [vmem:[#allocation5 + $0xc] ss:$16 sps:$4 sm:$0xff]  }
  0x4e   :  { %394 = vmatpush1.bf16.msra.mxu0 %v3683_v2  ;;  %3405 = vmatpush1.bf16.msra.mxu1 %v3683_v2  ;;  %v3689_v6 = vld [vmem:[#allocation5 + $0x40] ss:$16 sps:$4 sm:$0xff]   ;;  %v3690_v7 = vld [vmem:[#allocation5 + $0x64] ss:$16 sps:$4 sm:$0xff]   ;;  %v3720_v27 = vld [vmem:[#allocation5 + $0x8] ss:$16 sps:$4 sm:$0xff]  }
  0x4f   :  { %395 = vmatprep.subr.bf16.mxu0 %v3684_v3  ;;  %3398 = vmatprep.subr.bf16.mxu1 %v3684_v3  ;;  %v3692_v8 = vld [vmem:[#allocation5 + $0x60] ss:$16 sps:$4 sm:$0xff]   ;;  %v3693_v9 = vld [vmem:[#allocation5 + $0x84] ss:$16 sps:$4 sm:$0xff]   ;;  %v86_v29 = vld [vmem:[#allocation2 + $0x18] sm:$0xff] }
  0x50   :  { %v3695_v10 = vld [vmem:[#allocation5 + $0x80] ss:$16 sps:$4 sm:$0xff]   ;;  %v3696_v11 = vld [vmem:[#allocation5 + $0xa4] ss:$16 sps:$4 sm:$0xff]   ;;  %v118_v33 = vld [vmem:[#allocation2 + $0x118] sm:$0xff] }
  0x51   :  { %v3698_v12 = vld [vmem:[#allocation5 + $0xa0] ss:$16 sps:$4 sm:$0xff]   ;;  %v3699_v13 = vld [vmem:[#allocation5 + $0xc4] ss:$16 sps:$4 sm:$0xff]   ;;  %v3731_v34 = vld [vmem:[#allocation5 + $0x2c] ss:$16 sps:$4 sm:$0xff]  }
  0x52   :  { %396 = vmatpush1.bf16.msra.mxu0 %v3686_v4  ;;  %3406 = vmatpush1.bf16.msra.mxu1 %v3686_v4  ;;  %v3701_v14 = vld [vmem:[#allocation5 + $0xc0] ss:$16 sps:$4 sm:$0xff]   ;;  %v3702_v15 = vld [vmem:[#allocation5 + $0xe4] ss:$16 sps:$4 sm:$0xff]   ;;  %v3729_v35 = vld [vmem:[#allocation5 + $0x28] ss:$16 sps:$4 sm:$0xff]  }
  0x53   :  { %397 = vmatprep.subr.bf16.mxu0 %v3687_v5  ;;  %3399 = vmatprep.subr.bf16.mxu1 %v3687_v5  ;;  %v3704_v16 = vld [vmem:[#allocation5 + $0xe0] ss:$16 sps:$4 sm:$0xff]   ;;  %v3707_v21 = vld [vmem:[#allocation7 + $0x4] ss:$8 sps:$4 sm:$0xff]   ;;  %v3710_v26 = vld [vmem:[#allocation7 + $0x14] ss:$8 sps:$4 sm:$0xff]  }
  0x54   :  { %v83_v17 = vld [vmem:[#allocation2] sm:$0xff]  ;;  %v85_v28 = vld [vmem:[#allocation2 + $0x10] sm:$0xff]  ;;  %v88_v41 = vld [vmem:[#allocation2 + $0x28] sm:$0xff] }
  0x55   :  { %v115_v19 = vld [vmem:[#allocation2 + $0x100] sm:$0xff]  ;;  %v4075_v23 = vpack.c.bf16 %v84_v18, %v83_v17  ;;  %v3708_v30 = vld [vmem:[#allocation7 + $0x10] ss:$8 sps:$4 sm:$0xff]   ;;  %v4083_v36 = vpack.c.bf16 %v86_v29, %v85_v28  ;;  %v3716_v39 = vld [vmem:[#allocation7 + $0x34] ss:$8 sps:$4 sm:$0xff]  }
  0x56   :  { %398 = vmatpush1.bf16.msra.mxu0 %v3689_v6  ;;  %3407 = vmatpush1.bf16.msra.mxu1 %v3689_v6  ;;  %v4077_v24 = vpack.c.bf16 %v116_v20, %v115_v19  ;;  %v3705_v25 = vld [vmem:[#allocation7] ss:$8 sps:$4 sm:$0xff]   ;;  %v3713_v31 = vld [vmem:[#allocation7 + $0x24] ss:$8 sps:$4 sm:$0xff]   ;;  %v117_v32 = vld [vmem:[#allocation2 + $0x110] sm:$0xff] }
  0x57   :  { %399 = vmatprep.subr.bf16.mxu0 %v3690_v7  ;;  %3400 = vmatprep.subr.bf16.mxu1 %v3690_v7  ;;  %v4085_v37 = vpack.c.bf16 %v118_v33, %v117_v32  ;;  %v3711_v38 = vld [vmem:[#allocation7 + $0x20] ss:$8 sps:$4 sm:$0xff]   ;;  %v3740_v42 = vld [vmem:[#allocation5 + $0x4c] ss:$16 sps:$4 sm:$0xff]   ;;  %v3714_v43 = vld [vmem:[#allocation7 + $0x30] ss:$8 sps:$4 sm:$0xff]  }
  0x58   :  { %v87_v40 = vld [vmem:[#allocation2 + $0x20] sm:$0xff]  ;;  %v3738_v45 = vld [vmem:[#allocation5 + $0x48] ss:$16 sps:$4 sm:$0xff]   ;;  %v3749_v48 = vld [vmem:[#allocation5 + $0x6c] ss:$16 sps:$4 sm:$0xff]  }
  0x59   :  { %v119_v44 = vld [vmem:[#allocation2 + $0x120] sm:$0xff]  ;;  %v120_v46 = vld [vmem:[#allocation2 + $0x128] sm:$0xff]  ;;  %v4091_v49 = vpack.c.bf16 %v88_v41, %v87_v40  ;;  %v3725_v52 = vld [vmem:[#allocation7 + $0x54] ss:$8 sps:$4 sm:$0xff]  }
  0x5a   :  { %400 = vmatpush1.bf16.msra.mxu0 %v3692_v8  ;;  %3408 = vmatpush1.bf16.msra.mxu1 %v3692_v8  ;;  %v3719_v47 = vld [vmem:[#allocation7 + $0x44] ss:$8 sps:$4 sm:$0xff]   ;;  %v4093_v50 = vpack.c.bf16 %v120_v46, %v119_v44  ;;  %v3717_v51 = vld [vmem:[#allocation7 + $0x40] ss:$8 sps:$4 sm:$0xff]   ;;  %v89_v53 = vld [vmem:[#allocation2 + $0x30] sm:$0xff] }
  0x5b   :  { %401 = vmatprep.subr.bf16.mxu0 %v3693_v9  ;;  %3401 = vmatprep.subr.bf16.mxu1 %v3693_v9  ;;  %v90_v54 = vld [vmem:[#allocation2 + $0x38] sm:$0xff]  ;;  %v121_v57 = vld [vmem:[#allocation2 + $0x130] sm:$0xff]  ;;  %v3728_v60 = vld [vmem:[#allocation7 + $0x64] ss:$8 sps:$4 sm:$0xff]  }
  0x5c   :  { %v3747_v55 = vld [vmem:[#allocation5 + $0x68] ss:$16 sps:$4 sm:$0xff]   ;;  %v3758_v59 = vld [vmem:[#allocation5 + $0x8c] ss:$16 sps:$4 sm:$0xff]   ;;  %v4099_v62 = vpack.c.bf16 %v90_v54, %v89_v53  ;;  %v91_v5 = vld [vmem:[#allocation2 + $0x40] sm:$0xff] }
  0x5d   :  { %v3723_v56 = vld [vmem:[#allocation7 + $0x50] ss:$8 sps:$4 sm:$0xff]   ;;  %v3726_v1 = vld [vmem:[#allocation7 + $0x60] ss:$8 sps:$4 sm:$0xff]   ;;  %v3734_v2 = vld [vmem:[#allocation7 + $0x74] ss:$8 sps:$4 sm:$0xff]  }
  0x5e   :  { %402 = vmatpush1.bf16.msra.mxu0 %v3695_v10  ;;  %3409 = vmatpush1.bf16.msra.mxu1 %v3695_v10  ;;  %v122_v58 = vld [vmem:[#allocation2 + $0x138] sm:$0xff]  ;;  %v92_v6 = vld [vmem:[#allocation2 + $0x48] sm:$0xff]  ;;  %v123_v8 = vld [vmem:[#allocation2 + $0x140] sm:$0xff] }
  0x5f   :  { %403 = vmatprep.subr.bf16.mxu0 %v3696_v11  ;;  %3402 = vmatprep.subr.bf16.mxu1 %v3696_v11  ;;  %v3756_v61 = vld [vmem:[#allocation5 + $0x88] ss:$16 sps:$4 sm:$0xff]   ;;  %v4101_v63 = vpack.c.bf16 %v122_v58, %v121_v57  ;;  %v3767_v4 = vld [vmem:[#allocation5 + $0xac] ss:$16 sps:$4 sm:$0xff]   ;;  %v125_v17 = vld [vmem:[#allocation2 + $0x150] sm:$0xff] }
  0x60   :  { %v3765_v3 = vld [vmem:[#allocation5 + $0xa8] ss:$16 sps:$4 sm:$0xff]   ;;  %v3737_v10 = vld [vmem:[#allocation7 + $0x84] ss:$8 sps:$4 sm:$0xff]   ;;  %v129_v41 = vld [vmem:[#allocation2 + $0x170] sm:$0xff] }
  0x61   :  { %v3732_v7 = vld [vmem:[#allocation7 + $0x70] ss:$8 sps:$4 sm:$0xff]   ;;  %v124_v9 = vld [vmem:[#allocation2 + $0x148] sm:$0xff]  ;;  %v127_v29 = vld [vmem:[#allocation2 + $0x160] sm:$0xff] }
  0x62   :  { %404 = vmatpush1.bf16.msra.mxu0 %v3698_v12  ;;  %3410 = vmatpush1.bf16.msra.mxu1 %v3698_v12  ;;  %v3735_v11 = vld [vmem:[#allocation7 + $0x80] ss:$8 sps:$4 sm:$0xff]   ;;  %v4107_v12 = vpack.c.bf16 %v92_v6, %v91_v5  ;;  %v126_v18 = vld [vmem:[#allocation2 + $0x158] sm:$0xff]  ;;  %v3746_v20 = vld [vmem:[#allocation7 + $0xa4] ss:$8 sps:$4 sm:$0xff]  }
  0x63   :  { %405 = vmatprep.subr.bf16.mxu0 %v3699_v13  ;;  %3403 = vmatprep.subr.bf16.mxu1 %v3699_v13  ;;  %v4109_v13 = vpack.c.bf16 %v124_v9, %v123_v8  ;;  %v3741_v19 = vld [vmem:[#allocation7 + $0x90] ss:$8 sps:$4 sm:$0xff]   ;;  %v96_v28 = vld [vmem:[#allocation2 + $0x68] sm:$0xff] }
  0x64   :  { %v3755_v32 = vld [vmem:[#allocation7 + $0xc4] ss:$8 sps:$4 sm:$0xff]   ;;  %v98_v40 = vld [vmem:[#allocation2 + $0x78] sm:$0xff]  ;;  %v133_v58 = vld [vmem:[#allocation2 + $0x190] sm:$0xff] }
  0x65   :  { %v3764_v44 = vld [vmem:[#allocation7 + $0xe4] ss:$8 sps:$4 sm:$0xff]   ;;  %v102_v57 = vld [vmem:[#allocation2 + $0x98] sm:$0xff]  ;;  %v137_v9 = vld [vmem:[#allocation2 + $0x1b0] sm:$0xff] }
  0x66   :  { %406 = vmatpush1.bf16.msra.mxu0 %v3701_v14  ;;  %3411 = vmatpush1.bf16.msra.mxu1 %v3701_v14  ;;  %v3743_v14 = vld [vmem:[#allocation7 + $0x94] ss:$8 sps:$4 sm:$0xff]   ;;  %v132_v53 = vld [vmem:[#allocation2 + $0x188] sm:$0xff] }
  0x67   :  { %407 = vmatprep.subr.bf16.mxu0 %v3702_v15  ;;  %3404 = vmatprep.subr.bf16.mxu1 %v3702_v15  ;;  %v93_v15 = vld [vmem:[#allocation2 + $0x50] sm:$0xff]  ;;  %v106_v8 = vld [vmem:[#allocation2 + $0xb8] sm:$0xff] }
  0x6a   :  { %408 = vmatpush1.bf16.msra.mxu0 %v3704_v16  ;;  %3412 = vmatpush1.bf16.msra.mxu1 %v3704_v16  ;;  %v94_v16 = vld [vmem:[#allocation2 + $0x58] sm:$0xff] }
  0x6b   :  { %1879 = vmatprep.subr.bf16.mxu0 %v3707_v21  ;;  %746 = vmatprep.subr.bf16.mxu1 %v3722_v22  ;;  %v4115_v21 = vpack.c.bf16 %v94_v16, %v93_v15  ;;  %v4117_v22 = vpack.c.bf16 %v126_v18, %v125_v17  ;;  %v3770_v15 = vld [vmem:[#allocation7 + $0xf4] ss:$8 sps:$4 sm:$0xff]   ;;  %v107_v16 = vld [vmem:[#allocation2 + $0xc0] sm:$0xff]  ;;  %v108_v17 = vld [vmem:[#allocation2 + $0xc8] sm:$0xff] }
  0x6c   :  { %v3768_v18 = vld [vmem:[#allocation7 + $0xf0] ss:$8 sps:$4 sm:$0xff]  }
  0x6d   :  { %426 = vmatmul.mubr.bf16.vlgmr.msra.gmra.mrb[0].mxu0 %v4075_v23  ;;  %586 = vmatmul.mubr.bf16.vlgmr.msra.gmra.mrb[0].mxu1 %v4077_v24 }
  0x6e   :  { %435 = vmatprep.mubr.bf16.mxu0 %v3970_v0  ;;  %1880 = vmatpush1.bf16.msra.mxu0 %v3705_v25  ;;  %v3744_v25 = vld [vmem:[#allocation7 + $0xa0] ss:$8 sps:$4 sm:$0xff]  }
  0x6f   :  { %1881 = vmatprep.subr.bf16.mxu0 %v3710_v26  ;;  %747 = vmatpush1.bf16.msra.mxu1 %v3720_v27  ;;  %v3752_v26 = vld [vmem:[#allocation7 + $0xb4] ss:$8 sps:$4 sm:$0xff]   ;;  %v95_v27 = vld [vmem:[#allocation2 + $0x60] sm:$0xff] }
  0x70   :  { %595 = vmatprep.mubr.bf16.mxu1 %v3970_v0  ;;  %748 = vmatprep.subr.bf16.mxu1 %v3731_v34  ;;  %v4123_v33 = vpack.c.bf16 %v96_v28, %v95_v27  ;;  %v109_v27 = vld [vmem:[#allocation2 + $0xd0] sm:$0xff]  ;;  %v110_v28 = vld [vmem:[#allocation2 + $0xd8] sm:$0xff] }
  0x72   :  { %1882 = vmatpush1.bf16.msra.mxu0 %v3708_v30  ;;  %v128_v30 = vld [vmem:[#allocation2 + $0x168] sm:$0xff] }
  0x73   :  { %1883 = vmatprep.subr.bf16.mxu0 %v3713_v31  ;;  %749 = vmatpush1.bf16.msra.mxu1 %v3729_v35  ;;  %v3750_v31 = vld [vmem:[#allocation7 + $0xb0] ss:$8 sps:$4 sm:$0xff]   ;;  %v4125_v34 = vpack.c.bf16 %v128_v30, %v127_v29  ;;  %v3753_v35 = vld [vmem:[#allocation7 + $0xc0] ss:$8 sps:$4 sm:$0xff]   ;;  %v3773_v29 = vld [vmem:[#allocation7 + $0x104] ss:$8 sps:$4 sm:$0xff]  }
  0x74   :  { %750 = vmatprep.subr.bf16.mxu1 %v3740_v42  ;;  %v130_v42 = vld [vmem:[#allocation2 + $0x178] sm:$0xff]  ;;  %v141_v30 = vld [vmem:[#allocation2 + $0x1d0] sm:$0xff] }
  0x75   :  { %436 = vmatmul.mubr.bf16.gmra.mrb[4].mxu0 %v4083_v36  ;;  %596 = vmatmul.mubr.bf16.gmra.mrb[4].mxu1 %v4085_v37  ;;  %v4133_v46 = vpack.c.bf16 %v130_v42, %v129_v41  ;;  %v112_v41 = vld [vmem:[#allocation2 + $0xe8] sm:$0xff]  ;;  %v143_v42 = vld [vmem:[#allocation2 + $0x1e0] sm:$0xff] }
  0x76   :  { %445 = vmatprep.mubr.bf16.mxu0 %v3970_v0  ;;  %1884 = vmatpush1.bf16.msra.mxu0 %v3711_v38  ;;  %v3761_v38 = vld [vmem:[#allocation7 + $0xd4] ss:$8 sps:$4 sm:$0xff]  }
  0x77   :  { %1885 = vmatprep.subr.bf16.mxu0 %v3716_v39  ;;  %605 = vmatprep.mubr.bf16.mxu1 %v3970_v0  ;;  %v97_v39 = vld [vmem:[#allocation2 + $0x70] sm:$0xff] }
  0x78   :  { %751 = vmatpush1.bf16.msra.mxu1 %v3738_v45  ;;  %v4131_v45 = vpack.c.bf16 %v98_v40, %v97_v39  ;;  %v111_v40 = vld [vmem:[#allocation2 + $0xe0] sm:$0xff] }
  0x79   :  { %752 = vmatprep.subr.bf16.mxu1 %v3749_v48  ;;  %v99_v48 = vld [vmem:[#allocation2 + $0x80] sm:$0xff] }
  0x7a   :  { %1886 = vmatpush1.bf16.msra.mxu0 %v3714_v43  ;;  %v3759_v43 = vld [vmem:[#allocation7 + $0xd0] ss:$8 sps:$4 sm:$0xff]  }
  0x7b   :  { %1887 = vmatprep.subr.bf16.mxu0 %v3719_v47  ;;  %v3762_v47 = vld [vmem:[#allocation7 + $0xe0] ss:$8 sps:$4 sm:$0xff]  }
  0x7c   :  { %753 = vmatpush1.bf16.msra.mxu1 %v3747_v55 }
  0x7d   :  { %446 = vmatmul.mubr.bf16.gmra.mrb[8].mxu0 %v4091_v49  ;;  %606 = vmatmul.mubr.bf16.gmra.mrb[8].mxu1 %v4093_v50 }
  0x7e   :  { %455 = vmatprep.mubr.bf16.mxu0 %v3970_v0  ;;  %1888 = vmatpush1.bf16.msra.mxu0 %v3717_v51  ;;  %v100_v51 = vld [vmem:[#allocation2 + $0x88] sm:$0xff] }
  0x7f   :  { %1889 = vmatprep.subr.bf16.mxu0 %v3725_v52  ;;  %615 = vmatprep.mubr.bf16.mxu1 %v3970_v0  ;;  %v131_v52 = vld [vmem:[#allocation2 + $0x180] sm:$0xff]  ;;  %v4139_v54 = vpack.c.bf16 %v100_v51, %v99_v48  ;;  %v113_v48 = vld [vmem:[#allocation2 + $0xf0] sm:$0xff]  ;;  %v114_v51 = vld [vmem:[#allocation2 + $0xf8] sm:$0xff] }
  0x80   :  { %754 = vmatprep.subr.bf16.mxu1 %v3758_v59  ;;  %v4141_v55 = vpack.c.bf16 %v132_v53, %v131_v52  ;;  %v134_v59 = vld [vmem:[#allocation2 + $0x198] sm:$0xff]  ;;  %v145_v52 = vld [vmem:[#allocation2 + $0x1f0] sm:$0xff] }
  0x81   :  { %755 = vmatpush1.bf16.msra.mxu1 %v3756_v61  ;;  %v4149_v61 = vpack.c.bf16 %v134_v59, %v133_v58  ;;  %v3780_v53 = vld [vmem:[#allocation5 + $0xe8] ss:$16 sps:$4 sm:$0xff]   ;;  %v4195_v58 = vpack.c.bf16 %v114_v51, %v113_v48 }
  0x82   :  { %1890 = vmatpush1.bf16.msra.mxu0 %v3723_v56  ;;  %756 = vmatprep.subr.bf16.mxu1 %v3767_v4  ;;  %v101_v56 = vld [vmem:[#allocation2 + $0x90] sm:$0xff]  ;;  %v136_v4 = vld [vmem:[#allocation2 + $0x1a8] sm:$0xff] }
  0x83   :  { %1891 = vmatprep.subr.bf16.mxu0 %v3728_v60  ;;  %v4147_v60 = vpack.c.bf16 %v102_v57, %v101_v56  ;;  %v3782_v56 = vld [vmem:[#allocation5 + $0xec] ss:$16 sps:$4 sm:$0xff]  }
  0x84   :  { %v146_v57 = vld [vmem:[#allocation2 + $0x1f8] sm:$0xff] }
  0x85   :  { %456 = vmatmul.mubr.bf16.gmra.mrb[12].mxu0 %v4099_v62  ;;  %616 = vmatmul.mubr.bf16.gmra.mrb[12].mxu1 %v4101_v63  ;;  %v4197_v59 = vpack.c.bf16 %v146_v57, %v145_v52 }
  0x86   :  { %465 = vmatprep.mubr.bf16.mxu0 %v3970_v0  ;;  %1892 = vmatpush1.bf16.msra.mxu0 %v3726_v1  ;;  %v103_v1 = vld [vmem:[#allocation2 + $0xa0] sm:$0xff] }
  0x87   :  { %1893 = vmatprep.subr.bf16.mxu0 %v3734_v2  ;;  %625 = vmatprep.mubr.bf16.mxu1 %v3970_v0  ;;  %v104_v2 = vld [vmem:[#allocation2 + $0xa8] sm:$0xff] }
  0x88   :  { %757 = vmatpush1.bf16.msra.mxu1 %v3765_v3  ;;  %v135_v3 = vld [vmem:[#allocation2 + $0x1a0] sm:$0xff]  ;;  %v4155_v5 = vpack.c.bf16 %v104_v2, %v103_v1 }
  0x89   :  { %v4157_v6 = vpack.c.bf16 %v136_v4, %v135_v3 }
  0x8a   :  { %1894 = vmatpush1.bf16.msra.mxu0 %v3732_v7  ;;  %v105_v7 = vld [vmem:[#allocation2 + $0xb0] sm:$0xff] }
  0x8b   :  { %1895 = vmatprep.subr.bf16.mxu0 %v3737_v10  ;;  %v138_v10 = vld [vmem:[#allocation2 + $0x1b8] sm:$0xff] }
  0x8d   :  { %466 = vmatmul.mubr.bf16.gmra.mrb[16].mxu0 %v4107_v12  ;;  %626 = vmatmul.mubr.bf16.gmra.mrb[16].mxu1 %v4109_v13 }
  0x8e   :  { %475 = vmatprep.mubr.bf16.mxu0 %v3970_v0  ;;  %1896 = vmatpush1.bf16.msra.mxu0 %v3735_v11  ;;  %v4163_v11 = vpack.c.bf16 %v106_v8, %v105_v7 }
  0x8f   :  { %635 = vmatprep.mubr.bf16.mxu1 %v3970_v0  ;;  %1897 = vmatprep.subr.bf16.mxu0 %v3743_v14  ;;  %v4165_v14 = vpack.c.bf16 %v138_v10, %v137_v9 }
  0x92   :  { %1898 = vmatpush1.bf16.msra.mxu0 %v3741_v19  ;;  %v139_v19 = vld [vmem:[#allocation2 + $0x1c0] sm:$0xff] }
  0x93   :  { %1899 = vmatprep.subr.bf16.mxu0 %v3746_v20  ;;  %v140_v20 = vld [vmem:[#allocation2 + $0x1c8] sm:$0xff] }
  0x95   :  { %476 = vmatmul.mubr.bf16.gmra.mrb[20].mxu0 %v4115_v21  ;;  %636 = vmatmul.mubr.bf16.gmra.mrb[20].mxu1 %v4117_v22 }
  0x96   :  { %485 = vmatprep.mubr.bf16.mxu0 %v3970_v0  ;;  %645 = vmatprep.mubr.bf16.mxu1 %v3970_v0 }
  0x97   :  { %1900 = vmatpush1.bf16.msra.mxu0 %v3744_v25  ;;  %v4171_v25 = vpack.c.bf16 %v108_v17, %v107_v16 }
  0x98   :  { %1901 = vmatprep.subr.bf16.mxu0 %v3752_v26  ;;  %v4173_v26 = vpack.c.bf16 %v140_v20, %v139_v19 }
  0x9b   :  { %1902 = vmatpush1.bf16.msra.mxu0 %v3750_v31  ;;  %v3774_v31 = vld [vmem:[#allocation5 + $0xc8] ss:$16 sps:$4 sm:$0xff]  }
  0x9c   :  { %1903 = vmatprep.subr.bf16.mxu0 %v3755_v32  ;;  %v3776_v32 = vld [vmem:[#allocation5 + $0xcc] ss:$16 sps:$4 sm:$0xff]  }
  0x9d   :  { %486 = vmatmul.mubr.bf16.gmra.mrb[24].mxu0 %v4123_v33  ;;  %646 = vmatmul.mubr.bf16.gmra.mrb[24].mxu1 %v4125_v34 }
  0x9e   :  { %495 = vmatprep.mubr.bf16.mxu0 %v3970_v0  ;;  %655 = vmatprep.mubr.bf16.mxu1 %v3970_v0 }
  0x9f   :  { %1904 = vmatpush1.bf16.msra.mxu0 %v3753_v35  ;;  %v142_v35 = vld [vmem:[#allocation2 + $0x1d8] sm:$0xff]  ;;  %758 = vmatprep.subr.bf16.mxu1 %v3776_v32 }
  0xa0   :  { %1905 = vmatprep.subr.bf16.mxu0 %v3761_v38  ;;  %v4179_v38 = vpack.c.bf16 %v110_v28, %v109_v27  ;;  %v4181_v39 = vpack.c.bf16 %v142_v35, %v141_v30  ;;  %759 = vmatpush1.bf16.msra.mxu1 %v3774_v31 }
  0xa1   :  { %760 = vmatprep.subr.bf16.mxu1 %v3782_v56  ;;  %v3779_v56 = vld [vmem:[#allocation7 + $0x114] ss:$8 sps:$4 sm:$0xff]  }
  0xa3   :  { %1906 = vmatpush1.bf16.msra.mxu0 %v3759_v43  ;;  %v144_v43 = vld [vmem:[#allocation2 + $0x1e8] sm:$0xff] }
  0xa4   :  { %1907 = vmatprep.subr.bf16.mxu0 %v3764_v44  ;;  %v4187_v44 = vpack.c.bf16 %v112_v41, %v111_v40  ;;  %761 = vmatpush1.bf16.msra.mxu1 %v3780_v53 }
  0xa5   :  { %496 = vmatmul.mubr.bf16.gmra.mrb[28].mxu0 %v4131_v45  ;;  %656 = vmatmul.mubr.bf16.gmra.mrb[28].mxu1 %v4133_v46 }
  0xa6   :  { %505 = vmatprep.mubr.bf16.mxu0 %v3970_v0  ;;  %665 = vmatprep.mubr.bf16.mxu1 %v3970_v0 }
  0xa7   :  { %1908 = vmatpush1.bf16.msra.mxu0 %v3762_v47  ;;  %v4189_v47 = vpack.c.bf16 %v144_v43, %v143_v42  ;;  %2912 = vmatprep.subr.bf16.mxu1 %v3970_v0  ;;  %v3771_v43 = vld [vmem:[#allocation7 + $0x100] ss:$8 sps:$4 sm:$0xff]  }
  0xa8   :  { %1909 = vmatprep.subr.bf16.mxu0 %v3770_v15 }
  0xab   :  { %1910 = vmatpush1.bf16.msra.mxu0 %v3768_v18 }
  0xac   :  { %2232 = vmatprep.subr.bf16.mxu0 %v3773_v29 }
  0xad   :  { %506 = vmatmul.mubr.bf16.gmra.mrb[32].mxu0 %v4139_v54  ;;  %666 = vmatmul.mubr.bf16.gmra.mrb[32].mxu1 %v4141_v55 }
  0xae   :  { %515 = vmatprep.mubr.bf16.mxu0 %v3970_v0  ;;  %675 = vmatprep.mubr.bf16.mxu1 %v3970_v0 }
  0xb5   :  { %516 = vmatmul.mubr.bf16.gmra.mrb[36].mxu0 %v4147_v60  ;;  %676 = vmatmul.mubr.bf16.gmra.mrb[36].mxu1 %v4149_v61 }
  0xb6   :  { %525 = vmatprep.mubr.bf16.mxu0 %v3970_v0  ;;  %685 = vmatprep.mubr.bf16.mxu1 %v3970_v0 }
  0xbd   :  { %526 = vmatmul.mubr.bf16.gmra.mrb[40].mxu0 %v4155_v5  ;;  %686 = vmatmul.mubr.bf16.gmra.mrb[40].mxu1 %v4157_v6 }
  0xbe   :  { %535 = vmatprep.mubr.bf16.mxu0 %v3970_v0  ;;  %695 = vmatprep.mubr.bf16.mxu1 %v3970_v0 }
  0xc5   :  { %536 = vmatmul.mubr.bf16.gmra.mrb[44].mxu0 %v4163_v11  ;;  %696 = vmatmul.mubr.bf16.gmra.mrb[44].mxu1 %v4165_v14 }
  0xc6   :  { %545 = vmatprep.mubr.bf16.mxu0 %v3970_v0  ;;  %705 = vmatprep.mubr.bf16.mxu1 %v3970_v0 }
  0xcd   :  { %546 = vmatmul.mubr.bf16.gmra.mrb[48].mxu0 %v4171_v25  ;;  %706 = vmatmul.mubr.bf16.gmra.mrb[48].mxu1 %v4173_v26 }
  0xce   :  { %555 = vmatprep.mubr.bf16.mxu0 %v3970_v0  ;;  %715 = vmatprep.mubr.bf16.mxu1 %v3970_v0 }
  0xd5   :  { %556 = vmatmul.mubr.bf16.gmra.mrb[52].mxu0 %v4179_v38  ;;  %716 = vmatmul.mubr.bf16.gmra.mrb[52].mxu1 %v4181_v39 }
  0xd6   :  { %565 = vmatprep.mubr.bf16.mxu0 %v3970_v0  ;;  %725 = vmatprep.mubr.bf16.mxu1 %v3970_v0 }
  0xdd   :  { %566 = vmatmul.mubr.bf16.gmra.mrb[56].mxu0 %v4187_v44  ;;  %726 = vmatmul.mubr.bf16.gmra.mrb[56].mxu1 %v4189_v47 }
  0xde   :  { %575 = vmatprep.mubr.bf16.mxu0 %v3970_v0  ;;  %735 = vmatprep.mubr.bf16.mxu1 %v3970_v0 }
  0xe5   :  { %576 = vmatmul.mubr.bf16.gmra.mrb[60].mxu0 %v4195_v58  ;;  %736 = vmatmul.mubr.bf16.gmra.mrb[60].mxu1 %v4197_v59 }
  0xe6   :  { %778 = vmatprep.mubr.bf16.mxu1 %v3970_v0 }
  0xed   :  { %779 = vmatmul.mubr.bf16.vlgmr.msra.gmra.mrb[64].mxu1 %v4075_v23  ;;  %v213_v23 = vlaneseq }
  0xee   :  { %788 = vmatprep.mubr.bf16.mxu1 %v3970_v0 }
  0xf5   :  { %789 = vmatmul.mubr.bf16.gmra.mrb[68].mxu1 %v4083_v36  ;;  %v4221_v36 = vshrl.u32 %v213_v23, 7 }
  0xf6   :  { %798 = vmatprep.mubr.bf16.mxu1 %v3970_v0 }
  0xfd   :  { %799 = vmatmul.mubr.bf16.gmra.mrb[72].mxu1 %v4091_v49  ;;  %v215_v49 = vsub.s32 0, %v4221_v36 }
  0xfe   :  { %808 = vmatprep.mubr.bf16.mxu1 %v3970_v0 }
 0x105   :  { %809 = vmatmul.mubr.bf16.gmra.mrb[76].mxu1 %v4099_v62  ;;  %v211_v62 = vld [vmem:[%s5074_s2] sm:$0xf] }
 0x106   :  { %818 = vmatprep.mubr.bf16.mxu1 %v3970_v0 }
 0x10d   :  { %819 = vmatmul.mubr.bf16.gmra.mrb[80].mxu1 %v4107_v12  ;;  %v219_v12 = vsub.s32 1, %v4221_v36 }
 0x10e   :  { %828 = vmatprep.mubr.bf16.mxu1 %v3970_v0 }
 0x115   :  { %829 = vmatmul.mubr.bf16.gmra.mrb[84].mxu1 %v4115_v21  ;;  %v4232_v21 = vrot.slane %v211_v62, %v215_v49 }
 0x116   :  { %838 = vmatprep.mubr.bf16.mxu1 %v3970_v0 }
 0x11d   :  { %839 = vmatmul.mubr.bf16.gmra.mrb[88].mxu1 %v4123_v33  ;;  %v4237_v33 = vrot.slane %v211_v62, %v219_v12 }
 0x11e   :  { %848 = vmatprep.mubr.bf16.mxu1 %v3970_v0 }
 0x125   :  { %849 = vmatmul.mubr.bf16.gmra.mrb[92].mxu1 %v4131_v45 }
 0x126   :  { %858 = vmatprep.mubr.bf16.mxu1 %v3970_v0 }
 0x12d   :  { %859 = vmatmul.mubr.bf16.gmra.mrb[96].mxu1 %v4139_v54 }
 0x12e   :  { %868 = vmatprep.mubr.bf16.mxu1 %v3970_v0 }
 0x135   :  { %869 = vmatmul.mubr.bf16.gmra.mrb[100].mxu1 %v4147_v60 }
 0x136   :  { %878 = vmatprep.mubr.bf16.mxu1 %v3970_v0 }
 0x13d   :  { %879 = vmatmul.mubr.bf16.gmra.mrb[104].mxu1 %v4155_v5 }
 0x13e   :  { %888 = vmatprep.mubr.bf16.mxu1 %v3970_v0 }
 0x140   :  { %v427_v45 = vpop.f32.mrb[0].mxu0  ;;  %v587_v54 = vpop.f32.mrb[0].mxu1 }
 0x141   :  { %v428_v60 = vadd.f32 %v427_v45, %v4232_v21  ;;  %v429_v1 = vpop.f32.mrb[1].mxu0  ;;  %v588_v2 = vadd.f32 %v587_v54, %v4232_v21  ;;  %v589_v3 = vpop.f32.mrb[1].mxu1 }
 0x142   :  { %v430_v4 = vadd.f32 %v429_v1, %v4237_v33  ;;  %v431_v7 = vpop.f32.mrb[2].mxu0  ;;  %v590_v8 = vadd.f32 %v589_v3, %v4237_v33  ;;  %v591_v5 = vpop.f32.mrb[2].mxu1 }
 0x143   :  { %v432_v9 = vadd.f32 %v431_v7, %v4232_v21  ;;  %v433_v10 = vpop.f32.mrb[3].mxu0  ;;  %v1227_v15 = vmax.f32 %v588_v2, 0.0  ;;  %v592_v16 = vadd.f32 %v591_v5, %v4232_v21  ;;  %v593_v17 = vpop.f32.mrb[3].mxu1  ;;  %v1099_v27 = vmax.f32 %v428_v60, 0.0 }
 0x144   :  { %v434_v18 = vadd.f32 %v433_v10, %v4237_v33  ;;  %v1228_v19 = vmax.f32 %v590_v8, 0.0  ;;  %v594_v20 = vadd.f32 %v593_v17, %v4237_v33  ;;  %v1100_v30 = vmax.f32 %v430_v4, 0.0  ;;  %v3777_v8 = vld [vmem:[#allocation7 + $0x110] ss:$8 sps:$4 sm:$0xff]  }
 0x145   :  { %v1103_v28 = vmax.f32 %v432_v9, 0.0  ;;  %v1231_v29 = vmax.f32 %v592_v16, 0.0  ;;  %889 = vmatmul.mubr.bf16.gmra.mrb[108].mxu1 %v4163_v11  ;;  %v3785_v16 = vld [vmem:[#allocation7 + $0x124] ss:$8 sps:$4 sm:$0xff]  }
 0x146   :  { %v1104_v31 = vmax.f32 %v434_v18, 0.0  ;;  %v1232_v32 = vmax.f32 %v594_v20, 0.0  ;;  %898 = vmatprep.mubr.bf16.mxu1 %v3970_v0 }
 0x147   :  { %v1355_v35 = vpack.c.bf16 %v1103_v28, %v1099_v27  ;;  %v4250_v40 = vpack.c.bf16 %v1231_v29, %v1227_v15 }
 0x148   :  { %v1356_v41 = vpack.c.bf16 %v1104_v31, %v1100_v30  ;;  %v437_v42 = vpop.f32.mrb[4].mxu0  ;;  %v597_v48 = vpop.f32.mrb[4].mxu1  ;;  %v4252_v51 = vpack.c.bf16 %v1232_v32, %v1228_v19  ;;  %v3783_v31 = vld [vmem:[#allocation7 + $0x120] ss:$8 sps:$4 sm:$0xff]  }
 0x149   :  { %v438_v52 = vadd.f32 %v437_v42, %v4232_v21  ;;  %v439_v53 = vpop.f32.mrb[5].mxu0  ;;  %v598_v11 = vadd.f32 %v597_v48, %v4232_v21  ;;  %v599_v57 = vpop.f32.mrb[5].mxu1 }
 0x14a   :  { %v440_v23 = vadd.f32 %v439_v53, %v4237_v33  ;;  %v441_v62 = vpop.f32.mrb[6].mxu0  ;;  %1911 = vmatprep.mubr.bf16.mxu0 %v1356_v41  ;;  %v600_v45 = vadd.f32 %v599_v57, %v4237_v33  ;;  %v601_v54 = vpop.f32.mrb[6].mxu1 }
 0x14b   :  { %v442_v60 = vadd.f32 %v441_v62, %v4232_v21  ;;  %v443_v1 = vpop.f32.mrb[7].mxu0  ;;  %1912 = vmatmul.mubr.bf16.vlgmr.msra.gmra.mrb[64].mxu0 %v1355_v35  ;;  %v1235_v2 = vmax.f32 %v598_v11, 0.0  ;;  %v602_v3 = vadd.f32 %v601_v54, %v4232_v21  ;;  %v603_v4 = vpop.f32.mrb[7].mxu1  ;;  %v1107_v10 = vmax.f32 %v438_v52, 0.0 }
 0x14c   :  { %v444_v7 = vadd.f32 %v443_v1, %v4237_v33  ;;  %2233 = vmatpush1.bf16.msra.mxu0 %v3771_v43  ;;  %v1236_v5 = vmax.f32 %v600_v45, 0.0  ;;  %v604_v9 = vadd.f32 %v603_v4, %v4237_v33  ;;  %v1108_v18 = vmax.f32 %v440_v23, 0.0  ;;  %v3786_v1 = vld [vmem:[#allocation7 + $0x130] ss:$8 sps:$4 sm:$0xff]  }
 0x14d   :  { %v1111_v15 = vmax.f32 %v442_v60, 0.0  ;;  %2234 = vmatprep.subr.bf16.mxu0 %v3779_v56  ;;  %v1239_v17 = vmax.f32 %v602_v3, 0.0  ;;  %899 = vmatmul.mubr.bf16.gmra.mrb[112].mxu1 %v4171_v25  ;;  %v3788_v25 = vld [vmem:[#allocation7 + $0x134] ss:$8 sps:$4 sm:$0xff]  }
 0x14e   :  { %v1112_v19 = vmax.f32 %v444_v7, 0.0  ;;  %v1240_v20 = vmax.f32 %v604_v9, 0.0  ;;  %908 = vmatprep.mubr.bf16.mxu1 %v3970_v0 }
 0x14f   :  { %v1359_v27 = vpack.c.bf16 %v1111_v15, %v1107_v10  ;;  %v4264_v28 = vpack.c.bf16 %v1239_v17, %v1235_v2 }
 0x150   :  { %v1360_v29 = vpack.c.bf16 %v1112_v19, %v1108_v18  ;;  %v447_v30 = vpop.f32.mrb[8].mxu0  ;;  %2235 = vmatpush1.bf16.msra.mxu0 %v3777_v8  ;;  %v607_v32 = vpop.f32.mrb[8].mxu1  ;;  %v4266_v35 = vpack.c.bf16 %v1240_v20, %v1236_v5  ;;  %v3791_v8 = vld [vmem:[#allocation7 + $0x144] ss:$8 sps:$4 sm:$0xff]   ;;  %v3789_v20 = vld [vmem:[#allocation7 + $0x140] ss:$8 sps:$4 sm:$0xff]  }
 0x151   :  { %v448_v41 = vadd.f32 %v447_v30, %v4232_v21  ;;  %v449_v42 = vpop.f32.mrb[9].mxu0  ;;  %2236 = vmatprep.subr.bf16.mxu0 %v3785_v16  ;;  %v608_v43 = vadd.f32 %v607_v32, %v4232_v21  ;;  %v609_v48 = vpop.f32.mrb[9].mxu1 }
 0x152   :  { %v450_v52 = vadd.f32 %v449_v42, %v4237_v33  ;;  %v451_v53 = vpop.f32.mrb[10].mxu0  ;;  %1921 = vmatprep.mubr.bf16.mxu0 %v1360_v29  ;;  %v610_v56 = vadd.f32 %v609_v48, %v4237_v33  ;;  %v611_v11 = vpop.f32.mrb[10].mxu1 }
 0x153   :  { %v452_v57 = vadd.f32 %v451_v53, %v4232_v21  ;;  %v453_v23 = vpop.f32.mrb[11].mxu0  ;;  %1922 = vmatmul.mubr.bf16.gmra.mrb[68].mxu0 %v1359_v27  ;;  %v1243_v62 = vmax.f32 %v608_v43, 0.0  ;;  %v612_v45 = vadd.f32 %v611_v11, %v4232_v21  ;;  %v613_v54 = vpop.f32.mrb[11].mxu1  ;;  %v1115_v4 = vmax.f32 %v448_v41, 0.0 }
 0x154   :  { %v454_v60 = vadd.f32 %v453_v23, %v4237_v33  ;;  %2237 = vmatpush1.bf16.msra.mxu0 %v3783_v31  ;;  %v1244_v2 = vmax.f32 %v610_v56, 0.0  ;;  %v614_v3 = vadd.f32 %v613_v54, %v4237_v33  ;;  %v1116_v9 = vmax.f32 %v450_v52, 0.0 }
 0x155   :  { %v1119_v7 = vmax.f32 %v452_v57, 0.0  ;;  %2238 = vmatprep.subr.bf16.mxu0 %v3788_v25  ;;  %v1247_v5 = vmax.f32 %v612_v45, 0.0  ;;  %909 = vmatmul.mubr.bf16.gmra.mrb[116].mxu1 %v4179_v38  ;;  %v3794_v38 = vld [vmem:[#allocation7 + $0x154] ss:$8 sps:$4 sm:$0xff]  }
 0x156   :  { %v1120_v10 = vmax.f32 %v454_v60, 0.0  ;;  %v1248_v15 = vmax.f32 %v614_v3, 0.0  ;;  %918 = vmatprep.mubr.bf16.mxu1 %v3970_v0 }
 0x157   :  { %v1363_v16 = vpack.c.bf16 %v1119_v7, %v1115_v4  ;;  %v4278_v17 = vpack.c.bf16 %v1247_v5, %v1243_v62  ;;  %v3792_v62 = vld [vmem:[#allocation7 + $0x150] ss:$8 sps:$4 sm:$0xff]  }
 0x158   :  { %v1364_v18 = vpack.c.bf16 %v1120_v10, %v1116_v9  ;;  %v457_v19 = vpop.f32.mrb[12].mxu0  ;;  %2239 = vmatpush1.bf16.msra.mxu0 %v3786_v1  ;;  %v617_v27 = vpop.f32.mrb[12].mxu1  ;;  %v4280_v29 = vpack.c.bf16 %v1248_v15, %v1244_v2  ;;  %v3797_v2 = vld [vmem:[#allocation7 + $0x164] ss:$8 sps:$4 sm:$0xff]  }
 0x159   :  { %v458_v30 = vadd.f32 %v457_v19, %v4232_v21  ;;  %v459_v31 = vpop.f32.mrb[13].mxu0  ;;  %2240 = vmatprep.subr.bf16.mxu0 %v3791_v8  ;;  %v618_v32 = vadd.f32 %v617_v27, %v4232_v21  ;;  %v619_v41 = vpop.f32.mrb[13].mxu1 }
 0x15a   :  { %v460_v42 = vadd.f32 %v459_v31, %v4237_v33  ;;  %v461_v25 = vpop.f32.mrb[14].mxu0  ;;  %1931 = vmatprep.mubr.bf16.mxu0 %v1364_v18  ;;  %v620_v43 = vadd.f32 %v619_v41, %v4237_v33  ;;  %v621_v48 = vpop.f32.mrb[14].mxu1 }
 0x15b   :  { %v462_v52 = vadd.f32 %v461_v25, %v4232_v21  ;;  %v463_v53 = vpop.f32.mrb[15].mxu0  ;;  %1932 = vmatmul.mubr.bf16.gmra.mrb[72].mxu0 %v1363_v16  ;;  %v1251_v56 = vmax.f32 %v618_v32, 0.0  ;;  %v622_v11 = vadd.f32 %v621_v48, %v4232_v21  ;;  %v623_v57 = vpop.f32.mrb[15].mxu1  ;;  %v1123_v60 = vmax.f32 %v458_v30, 0.0  ;;  %v3795_v16 = vld [vmem:[#allocation7 + $0x160] ss:$8 sps:$4 sm:$0xff]  }
 0x15c   :  { %v464_v23 = vadd.f32 %v463_v53, %v4237_v33  ;;  %2241 = vmatpush1.bf16.msra.mxu0 %v3789_v20  ;;  %v1252_v45 = vmax.f32 %v620_v43, 0.0  ;;  %v624_v54 = vadd.f32 %v623_v57, %v4237_v33  ;;  %v1124_v4 = vmax.f32 %v460_v42, 0.0 }
 0x15d   :  { %v1127_v1 = vmax.f32 %v462_v52, 0.0  ;;  %2242 = vmatprep.subr.bf16.mxu0 %v3794_v38  ;;  %v1255_v3 = vmax.f32 %v622_v11, 0.0  ;;  %919 = vmatmul.mubr.bf16.gmra.mrb[120].mxu1 %v4187_v44  ;;  %v3800_v44 = vld [vmem:[#allocation7 + $0x174] ss:$8 sps:$4 sm:$0xff]   ;;  %v3798_v11 = vld [vmem:[#allocation7 + $0x170] ss:$8 sps:$4 sm:$0xff]  }
 0x15e   :  { %v1128_v7 = vmax.f32 %v464_v23, 0.0  ;;  %v1256_v8 = vmax.f32 %v624_v54, 0.0  ;;  %928 = vmatprep.mubr.bf16.mxu1 %v3970_v0  ;;  %v3803_v54 = vld [vmem:[#allocation7 + $0x184] ss:$8 sps:$4 sm:$0xff]  }
 0x15f   :  { %v1367_v5 = vpack.c.bf16 %v1127_v1, %v1123_v60  ;;  %v4292_v9 = vpack.c.bf16 %v1255_v3, %v1251_v56 }
 0x160   :  { %v1368_v10 = vpack.c.bf16 %v1128_v7, %v1124_v4  ;;  %v467_v15 = vpop.f32.mrb[16].mxu0  ;;  %2243 = vmatpush1.bf16.msra.mxu0 %v3792_v62  ;;  %v627_v18 = vpop.f32.mrb[16].mxu1  ;;  %v4294_v19 = vpack.c.bf16 %v1256_v8, %v1252_v45 }
 0x161   :  { %v468_v20 = vadd.f32 %v467_v15, %v4232_v21  ;;  %v469_v27 = vpop.f32.mrb[17].mxu0  ;;  %2244 = vmatprep.subr.bf16.mxu0 %v3797_v2  ;;  %v628_v30 = vadd.f32 %v627_v18, %v4232_v21  ;;  %v629_v31 = vpop.f32.mrb[17].mxu1 }
 0x162   :  { %v470_v38 = vadd.f32 %v469_v27, %v4237_v33  ;;  %v471_v32 = vpop.f32.mrb[18].mxu0  ;;  %1941 = vmatprep.mubr.bf16.mxu0 %v1368_v10  ;;  %v630_v41 = vadd.f32 %v629_v31, %v4237_v33  ;;  %v631_v42 = vpop.f32.mrb[18].mxu1  ;;  %v3801_v10 = vld [vmem:[#allocation7 + $0x180] ss:$8 sps:$4 sm:$0xff]  }
 0x163   :  { %v472_v25 = vadd.f32 %v471_v32, %v4232_v21  ;;  %v473_v43 = vpop.f32.mrb[19].mxu0  ;;  %1942 = vmatmul.mubr.bf16.gmra.mrb[76].mxu0 %v1367_v5  ;;  %v1259_v48 = vmax.f32 %v628_v30, 0.0  ;;  %v632_v52 = vadd.f32 %v631_v42, %v4232_v21  ;;  %v633_v53 = vpop.f32.mrb[19].mxu1  ;;  %v1131_v62 = vmax.f32 %v468_v20, 0.0 }
 0x164   :  { %v474_v56 = vadd.f32 %v473_v43, %v4237_v33  ;;  %2245 = vmatpush1.bf16.msra.mxu0 %v3795_v16  ;;  %v1260_v57 = vmax.f32 %v630_v41, 0.0  ;;  %v634_v23 = vadd.f32 %v633_v53, %v4237_v33  ;;  %v1132_v1 = vmax.f32 %v470_v38, 0.0  ;;  %v3804_v53 = vld [vmem:[#allocation7 + $0x190] ss:$8 sps:$4 sm:$0xff]  }
 0x165   :  { %v1135_v45 = vmax.f32 %v472_v25, 0.0  ;;  %2246 = vmatprep.subr.bf16.mxu0 %v3800_v44  ;;  %v1263_v60 = vmax.f32 %v632_v52, 0.0  ;;  %929 = vmatmul.mubr.bf16.gmra.mrb[124].mxu1 %v4195_v58  ;;  %v3806_v58 = vld [vmem:[#allocation7 + $0x194] ss:$8 sps:$4 sm:$0xff]  }
 0x166   :  { %v1136_v2 = vmax.f32 %v474_v56, 0.0  ;;  %v1264_v3 = vmax.f32 %v634_v23, 0.0  ;;  %938 = vmatprep.mubr.bf16.mxu1 %v3970_v0 }
 0x167   :  { %v1371_v4 = vpack.c.bf16 %v1135_v45, %v1131_v62  ;;  %v4306_v7 = vpack.c.bf16 %v1263_v60, %v1259_v48  ;;  %v3809_v45 = vld [vmem:[#allocation7 + $0x1a4] ss:$8 sps:$4 sm:$0xff]  }
 0x168   :  { %v1372_v8 = vpack.c.bf16 %v1136_v2, %v1132_v1  ;;  %v477_v5 = vpop.f32.mrb[20].mxu0  ;;  %2247 = vmatpush1.bf16.msra.mxu0 %v3798_v11  ;;  %v637_v15 = vpop.f32.mrb[20].mxu1  ;;  %v4308_v16 = vpack.c.bf16 %v1264_v3, %v1260_v57 }
 0x169   :  { %v478_v18 = vadd.f32 %v477_v5, %v4232_v21  ;;  %v479_v20 = vpop.f32.mrb[21].mxu0  ;;  %2248 = vmatprep.subr.bf16.mxu0 %v3803_v54  ;;  %v638_v27 = vadd.f32 %v637_v15, %v4232_v21  ;;  %v639_v44 = vpop.f32.mrb[21].mxu1  ;;  %v3807_v5 = vld [vmem:[#allocation7 + $0x1a0] ss:$8 sps:$4 sm:$0xff]  }
 0x16a   :  { %v480_v30 = vadd.f32 %v479_v20, %v4237_v33  ;;  %v481_v31 = vpop.f32.mrb[22].mxu0  ;;  %1951 = vmatprep.mubr.bf16.mxu0 %v1372_v8  ;;  %v640_v38 = vadd.f32 %v639_v44, %v4237_v33  ;;  %v641_v32 = vpop.f32.mrb[22].mxu1 }
 0x16b   :  { %v482_v41 = vadd.f32 %v481_v31, %v4232_v21  ;;  %v483_v42 = vpop.f32.mrb[23].mxu0  ;;  %1952 = vmatmul.mubr.bf16.gmra.mrb[80].mxu0 %v1371_v4  ;;  %v1267_v25 = vmax.f32 %v638_v27, 0.0  ;;  %v642_v43 = vadd.f32 %v641_v32, %v4232_v21  ;;  %v643_v48 = vpop.f32.mrb[23].mxu1  ;;  %v1139_v57 = vmax.f32 %v478_v18, 0.0 }
 0x16c   :  { %v484_v52 = vadd.f32 %v483_v42, %v4237_v33  ;;  %2249 = vmatpush1.bf16.msra.mxu0 %v3801_v10  ;;  %v1268_v56 = vmax.f32 %v640_v38, 0.0  ;;  %v644_v11 = vadd.f32 %v643_v48, %v4237_v33  ;;  %v1140_v54 = vmax.f32 %v480_v30, 0.0 }
 0x16d   :  { %v1143_v23 = vmax.f32 %v482_v41, 0.0  ;;  %2250 = vmatprep.subr.bf16.mxu0 %v3806_v58  ;;  %v1271_v62 = vmax.f32 %v642_v43, 0.0  ;;  %939 = vmatmul.mubr.bf16.gmra.mrb[128].mxu1 %v4077_v24 }
 0x16e   :  { %v1144_v60 = vmax.f32 %v484_v52, 0.0  ;;  %v1272_v1 = vmax.f32 %v644_v11, 0.0  ;;  %948 = vmatprep.mubr.bf16.mxu1 %v3970_v0 }
 0x16f   :  { %v1375_v2 = vpack.c.bf16 %v1143_v23, %v1139_v57  ;;  %v4320_v3 = vpack.c.bf16 %v1271_v62, %v1267_v25 }
 0x170   :  { %v1376_v4 = vpack.c.bf16 %v1144_v60, %v1140_v54  ;;  %v487_v8 = vpop.f32.mrb[24].mxu0  ;;  %2251 = vmatpush1.bf16.msra.mxu0 %v3804_v53  ;;  %v647_v10 = vpop.f32.mrb[24].mxu1  ;;  %v4322_v15 = vpack.c.bf16 %v1272_v1, %v1268_v56  ;;  %v3810_v53 = vld [vmem:[#allocation7 + $0x1b0] ss:$8 sps:$4 sm:$0xff]   ;;  %v3812_v56 = vld [vmem:[#allocation7 + $0x1b4] ss:$8 sps:$4 sm:$0xff]  }
 0x171   :  { %v488_v18 = vadd.f32 %v487_v8, %v4232_v21  ;;  %v489_v20 = vpop.f32.mrb[25].mxu0  ;;  %2252 = vmatprep.subr.bf16.mxu0 %v3809_v45  ;;  %v648_v24 = vadd.f32 %v647_v10, %v4232_v21  ;;  %v649_v58 = vpop.f32.mrb[25].mxu1 }
 0x172   :  { %v490_v27 = vadd.f32 %v489_v20, %v4237_v33  ;;  %v491_v44 = vpop.f32.mrb[26].mxu0  ;;  %1961 = vmatprep.mubr.bf16.mxu0 %v1376_v4  ;;  %v650_v30 = vadd.f32 %v649_v58, %v4237_v33  ;;  %v651_v31 = vpop.f32.mrb[26].mxu1 }
 0x173   :  { %v492_v38 = vadd.f32 %v491_v44, %v4232_v21  ;;  %v493_v32 = vpop.f32.mrb[27].mxu0  ;;  %1962 = vmatmul.mubr.bf16.gmra.mrb[84].mxu0 %v1375_v2  ;;  %v1275_v41 = vmax.f32 %v648_v24, 0.0  ;;  %v652_v42 = vadd.f32 %v651_v31, %v4232_v21  ;;  %v653_v25 = vpop.f32.mrb[27].mxu1  ;;  %v1147_v11 = vmax.f32 %v488_v18, 0.0 }
 0x174   :  { %v494_v43 = vadd.f32 %v493_v32, %v4237_v33  ;;  %2253 = vmatpush1.bf16.msra.mxu0 %v3807_v5  ;;  %v1276_v48 = vmax.f32 %v650_v30, 0.0  ;;  %v654_v52 = vadd.f32 %v653_v25, %v4237_v33  ;;  %v1148_v62 = vmax.f32 %v490_v27, 0.0 }
 0x175   :  { %v1151_v57 = vmax.f32 %v492_v38, 0.0  ;;  %v1279_v23 = vmax.f32 %v652_v42, 0.0  ;;  %949 = vmatmul.mubr.bf16.gmra.mrb[132].mxu1 %v4085_v37  ;;  %2254 = vmatprep.subr.bf16.mxu0 %v3812_v56 }
 0x176   :  { %v1152_v45 = vmax.f32 %v494_v43, 0.0  ;;  %v1280_v54 = vmax.f32 %v654_v52, 0.0  ;;  %958 = vmatprep.mubr.bf16.mxu1 %v3970_v0 }
 0x177   :  { %v1379_v60 = vpack.c.bf16 %v1151_v57, %v1147_v11  ;;  %v4334_v1 = vpack.c.bf16 %v1279_v23, %v1275_v41 }
 0x178   :  { %v1380_v2 = vpack.c.bf16 %v1152_v45, %v1148_v62  ;;  %v497_v4 = vpop.f32.mrb[28].mxu0  ;;  %v657_v8 = vpop.f32.mrb[28].mxu1  ;;  %v4336_v5 = vpack.c.bf16 %v1280_v54, %v1276_v48  ;;  %2255 = vmatpush1.bf16.msra.mxu0 %v3810_v53 }
 0x179   :  { %v498_v10 = vadd.f32 %v497_v4, %v4232_v21  ;;  %v499_v18 = vpop.f32.mrb[29].mxu0  ;;  %v658_v37 = vadd.f32 %v657_v8, %v4232_v21  ;;  %v659_v20 = vpop.f32.mrb[29].mxu1 }
 0x17a   :  { %v500_v24 = vadd.f32 %v499_v18, %v4237_v33  ;;  %v501_v58 = vpop.f32.mrb[30].mxu0  ;;  %1971 = vmatprep.mubr.bf16.mxu0 %v1380_v2  ;;  %v660_v27 = vadd.f32 %v659_v20, %v4237_v33  ;;  %v661_v44 = vpop.f32.mrb[30].mxu1 }
 0x17b   :  { %v502_v30 = vadd.f32 %v501_v58, %v4232_v21  ;;  %v503_v31 = vpop.f32.mrb[31].mxu0  ;;  %1972 = vmatmul.mubr.bf16.gmra.mrb[88].mxu0 %v1379_v60  ;;  %v1283_v38 = vmax.f32 %v658_v37, 0.0  ;;  %v662_v32 = vadd.f32 %v661_v44, %v4232_v21  ;;  %v663_v41 = vpop.f32.mrb[31].mxu1  ;;  %v1155_v48 = vmax.f32 %v498_v10, 0.0 }
 0x17c   :  { %v504_v42 = vadd.f32 %v503_v31, %v4237_v33  ;;  %v1284_v25 = vmax.f32 %v660_v27, 0.0  ;;  %v664_v43 = vadd.f32 %v663_v41, %v4237_v33  ;;  %v1156_v56 = vmax.f32 %v500_v24, 0.0 }
 0x17d   :  { %v1159_v52 = vmax.f32 %v502_v30, 0.0  ;;  %v1287_v53 = vmax.f32 %v662_v32, 0.0  ;;  %959 = vmatmul.mubr.bf16.gmra.mrb[136].mxu1 %v4093_v50 }
 0x17e   :  { %v1160_v11 = vmax.f32 %v504_v42, 0.0  ;;  %v1288_v57 = vmax.f32 %v664_v43, 0.0  ;;  %968 = vmatprep.mubr.bf16.mxu1 %v3970_v0  ;;  %v3813_v42 = vld [vmem:[#allocation7 + $0x1c0] ss:$8 sps:$4 sm:$0xff]  }
 0x17f   :  { %v1383_v23 = vpack.c.bf16 %v1159_v52, %v1155_v48  ;;  %v4348_v62 = vpack.c.bf16 %v1287_v53, %v1283_v38 }
 0x180   :  { %v1384_v45 = vpack.c.bf16 %v1160_v11, %v1156_v56  ;;  %v507_v54 = vpop.f32.mrb[32].mxu0  ;;  %v667_v60 = vpop.f32.mrb[32].mxu1  ;;  %v4350_v2 = vpack.c.bf16 %v1288_v57, %v1284_v25  ;;  %v3815_v25 = vld [vmem:[#allocation7 + $0x1c4] ss:$8 sps:$4 sm:$0xff]  }
 0x181   :  { %v508_v4 = vadd.f32 %v507_v54, %v4232_v21  ;;  %v509_v8 = vpop.f32.mrb[33].mxu0  ;;  %v668_v10 = vadd.f32 %v667_v60, %v4232_v21  ;;  %v669_v18 = vpop.f32.mrb[33].mxu1  ;;  %2256 = vmatprep.subr.bf16.mxu0 %v3815_v25 }
 0x182   :  { %v510_v50 = vadd.f32 %v509_v8, %v4237_v33  ;;  %v511_v37 = vpop.f32.mrb[34].mxu0  ;;  %1981 = vmatprep.mubr.bf16.mxu0 %v1384_v45  ;;  %v670_v20 = vadd.f32 %v669_v18, %v4237_v33  ;;  %v671_v24 = vpop.f32.mrb[34].mxu1  ;;  %2257 = vmatpush1.bf16.msra.mxu0 %v3813_v42 }
 0x183   :  { %v512_v58 = vadd.f32 %v511_v37, %v4232_v21  ;;  %v513_v27 = vpop.f32.mrb[35].mxu0  ;;  %1982 = vmatmul.mubr.bf16.gmra.mrb[92].mxu0 %v1383_v23  ;;  %v1291_v44 = vmax.f32 %v668_v10, 0.0  ;;  %v672_v30 = vadd.f32 %v671_v24, %v4232_v21  ;;  %v673_v31 = vpop.f32.mrb[35].mxu1  ;;  %v1163_v43 = vmax.f32 %v508_v4, 0.0 }
 0x184   :  { %v514_v38 = vadd.f32 %v513_v27, %v4237_v33  ;;  %v1292_v32 = vmax.f32 %v670_v20, 0.0  ;;  %v674_v41 = vadd.f32 %v673_v31, %v4237_v33  ;;  %v1164_v53 = vmax.f32 %v510_v50, 0.0 }
 0x185   :  { %v1167_v48 = vmax.f32 %v512_v58, 0.0  ;;  %v1295_v52 = vmax.f32 %v672_v30, 0.0  ;;  %969 = vmatmul.mubr.bf16.gmra.mrb[140].mxu1 %v4101_v63 }
 0x186   :  { %v1168_v56 = vmax.f32 %v514_v38, 0.0  ;;  %v1296_v11 = vmax.f32 %v674_v41, 0.0  ;;  %978 = vmatprep.mubr.bf16.mxu1 %v3970_v0 }
 0x187   :  { %v1387_v57 = vpack.c.bf16 %v1167_v48, %v1163_v43  ;;  %v4362_v23 = vpack.c.bf16 %v1295_v52, %v1291_v44 }
 0x188   :  { %v1388_v45 = vpack.c.bf16 %v1168_v56, %v1164_v53  ;;  %v517_v54 = vpop.f32.mrb[36].mxu0  ;;  %v677_v60 = vpop.f32.mrb[36].mxu1  ;;  %v4364_v8 = vpack.c.bf16 %v1296_v11, %v1292_v32 }
 0x189   :  { %v518_v4 = vadd.f32 %v517_v54, %v4232_v21  ;;  %v519_v10 = vpop.f32.mrb[37].mxu0  ;;  %v678_v63 = vadd.f32 %v677_v60, %v4232_v21  ;;  %v679_v18 = vpop.f32.mrb[37].mxu1 }
 0x18a   :  { %v520_v50 = vadd.f32 %v519_v10, %v4237_v33  ;;  %v521_v37 = vpop.f32.mrb[38].mxu0  ;;  %1991 = vmatprep.mubr.bf16.mxu0 %v1388_v45  ;;  %v680_v20 = vadd.f32 %v679_v18, %v4237_v33  ;;  %v681_v24 = vpop.f32.mrb[38].mxu1 }
 0x18b   :  { %v522_v58 = vadd.f32 %v521_v37, %v4232_v21  ;;  %v523_v27 = vpop.f32.mrb[39].mxu0  ;;  %1992 = vmatmul.mubr.bf16.gmra.mrb[96].mxu0 %v1387_v57  ;;  %v1299_v44 = vmax.f32 %v678_v63, 0.0  ;;  %v682_v30 = vadd.f32 %v681_v24, %v4232_v21  ;;  %v683_v31 = vpop.f32.mrb[39].mxu1  ;;  %v1171_v42 = vmax.f32 %v518_v4, 0.0 }
 0x18c   :  { %v524_v38 = vadd.f32 %v523_v27, %v4237_v33  ;;  %v1300_v32 = vmax.f32 %v680_v20, 0.0  ;;  %v684_v41 = vadd.f32 %v683_v31, %v4237_v33  ;;  %v1172_v48 = vmax.f32 %v520_v50, 0.0 }
 0x18d   :  { %v1175_v25 = vmax.f32 %v522_v58, 0.0  ;;  %v1303_v43 = vmax.f32 %v682_v30, 0.0  ;;  %979 = vmatmul.mubr.bf16.gmra.mrb[144].mxu1 %v4109_v13 }
 0x18e   :  { %v1176_v52 = vmax.f32 %v524_v38, 0.0  ;;  %v1304_v53 = vmax.f32 %v684_v41, 0.0  ;;  %988 = vmatprep.mubr.bf16.mxu1 %v3970_v0  ;;  %v3816_v41 = vld [vmem:[#allocation7 + $0x1d0] ss:$8 sps:$4 sm:$0xff]  }
 0x18f   :  { %v1391_v56 = vpack.c.bf16 %v1175_v25, %v1171_v42  ;;  %v4376_v11 = vpack.c.bf16 %v1303_v43, %v1299_v44  ;;  %v3818_v42 = vld [vmem:[#allocation7 + $0x1d4] ss:$8 sps:$4 sm:$0xff]  }
 0x190   :  { %v1392_v57 = vpack.c.bf16 %v1176_v52, %v1172_v48  ;;  %v527_v45 = vpop.f32.mrb[40].mxu0  ;;  %v687_v54 = vpop.f32.mrb[40].mxu1  ;;  %v4378_v60 = vpack.c.bf16 %v1304_v53, %v1300_v32  ;;  %2258 = vmatprep.subr.bf16.mxu0 %v3818_v42 }
 0x191   :  { %v528_v10 = vadd.f32 %v527_v45, %v4232_v21  ;;  %v529_v4 = vpop.f32.mrb[41].mxu0  ;;  %v688_v63 = vadd.f32 %v687_v54, %v4232_v21  ;;  %v689_v18 = vpop.f32.mrb[41].mxu1  ;;  %2259 = vmatpush1.bf16.msra.mxu0 %v3816_v41 }
 0x192   :  { %v530_v13 = vadd.f32 %v529_v4, %v4237_v33  ;;  %v531_v50 = vpop.f32.mrb[42].mxu0  ;;  %2001 = vmatprep.mubr.bf16.mxu0 %v1392_v57  ;;  %v690_v37 = vadd.f32 %v689_v18, %v4237_v33  ;;  %v691_v20 = vpop.f32.mrb[42].mxu1 }
 0x193   :  { %v532_v24 = vadd.f32 %v531_v50, %v4232_v21  ;;  %v533_v58 = vpop.f32.mrb[43].mxu0  ;;  %2002 = vmatmul.mubr.bf16.gmra.mrb[100].mxu0 %v1391_v56  ;;  %v1307_v27 = vmax.f32 %v688_v63, 0.0  ;;  %v692_v44 = vadd.f32 %v691_v20, %v4232_v21  ;;  %v693_v30 = vpop.f32.mrb[43].mxu1  ;;  %v1179_v25 = vmax.f32 %v528_v10, 0.0 }
 0x194   :  { %v534_v31 = vadd.f32 %v533_v58, %v4237_v33  ;;  %v1308_v38 = vmax.f32 %v690_v37, 0.0  ;;  %v694_v32 = vadd.f32 %v693_v30, %v4237_v33  ;;  %v1180_v52 = vmax.f32 %v530_v13, 0.0 }
 0x195   :  { %v1183_v43 = vmax.f32 %v532_v24, 0.0  ;;  %v1311_v48 = vmax.f32 %v692_v44, 0.0  ;;  %989 = vmatmul.mubr.bf16.gmra.mrb[148].mxu1 %v4117_v22 }
 0x196   :  { %v1184_v53 = vmax.f32 %v534_v31, 0.0  ;;  %v1312_v57 = vmax.f32 %v694_v32, 0.0  ;;  %998 = vmatprep.mubr.bf16.mxu1 %v3970_v0 }
 0x197   :  { %v1395_v56 = vpack.c.bf16 %v1183_v43, %v1179_v25  ;;  %v4390_v45 = vpack.c.bf16 %v1311_v48, %v1307_v27 }
 0x198   :  { %v1396_v54 = vpack.c.bf16 %v1184_v53, %v1180_v52  ;;  %v537_v4 = vpop.f32.mrb[44].mxu0  ;;  %v697_v63 = vpop.f32.mrb[44].mxu1  ;;  %v4392_v18 = vpack.c.bf16 %v1312_v57, %v1308_v38 }
 0x199   :  { %v538_v10 = vadd.f32 %v537_v4, %v4232_v21  ;;  %v539_v50 = vpop.f32.mrb[45].mxu0  ;;  %v698_v22 = vadd.f32 %v697_v63, %v4232_v21  ;;  %v699_v13 = vpop.f32.mrb[45].mxu1 }
 0x19a   :  { %v540_v37 = vadd.f32 %v539_v50, %v4237_v33  ;;  %v541_v20 = vpop.f32.mrb[46].mxu0  ;;  %2011 = vmatprep.mubr.bf16.mxu0 %v1396_v54  ;;  %v700_v24 = vadd.f32 %v699_v13, %v4237_v33  ;;  %v701_v58 = vpop.f32.mrb[46].mxu1 }
 0x19b   :  { %v542_v27 = vadd.f32 %v541_v20, %v4232_v21  ;;  %v543_v44 = vpop.f32.mrb[47].mxu0  ;;  %2012 = vmatmul.mubr.bf16.gmra.mrb[104].mxu0 %v1395_v56  ;;  %v1315_v30 = vmax.f32 %v698_v22, 0.0  ;;  %v702_v31 = vadd.f32 %v701_v58, %v4232_v21  ;;  %v703_v38 = vpop.f32.mrb[47].mxu1  ;;  %v1187_v25 = vmax.f32 %v538_v10, 0.0 }
 0x19c   :  { %v544_v32 = vadd.f32 %v543_v44, %v4237_v33  ;;  %v1316_v41 = vmax.f32 %v700_v24, 0.0  ;;  %v704_v42 = vadd.f32 %v703_v38, %v4237_v33  ;;  %v1188_v52 = vmax.f32 %v540_v37, 0.0 }
 0x19d   :  { %v1191_v43 = vmax.f32 %v542_v27, 0.0  ;;  %v1319_v48 = vmax.f32 %v702_v31, 0.0  ;;  %999 = vmatmul.mubr.bf16.gmra.mrb[152].mxu1 %v4125_v34 }
 0x19e   :  { %v1192_v53 = vmax.f32 %v544_v32, 0.0  ;;  %v1320_v57 = vmax.f32 %v704_v42, 0.0  ;;  %1008 = vmatprep.mubr.bf16.mxu1 %v3970_v0 }
 0x19f   :  { %v1399_v56 = vpack.c.bf16 %v1191_v43, %v1187_v25  ;;  %v4404_v54 = vpack.c.bf16 %v1319_v48, %v1315_v30  ;;  %v3819_v43 = vld [vmem:[#allocation8] sm:$0xff]  }
 0x1a0   :  { %v1400_v4 = vpack.c.bf16 %v1192_v53, %v1188_v52  ;;  %v547_v63 = vpop.f32.mrb[48].mxu0  ;;  %v707_v50 = vpop.f32.mrb[48].mxu1  ;;  %v4406_v22 = vpack.c.bf16 %v1320_v57, %v1316_v41  ;;  %v3820_v48 = vld [vmem:[#allocation7 + $0x1e0] ss:$8 sps:$4 sm:$0xff]   ;;  %2913 = vmatpush1.bf16.msra.mxu1 %v3819_v43 }
 0x1a1   :  { %v548_v13 = vadd.f32 %v547_v63, %v4232_v21  ;;  %v549_v10 = vpop.f32.mrb[49].mxu0  ;;  %v708_v20 = vadd.f32 %v707_v50, %v4232_v21  ;;  %v709_v24 = vpop.f32.mrb[49].mxu1  ;;  %2914 = vmatprep.subr.bf16.mxu1 %v3970_v0 }
 0x1a2   :  { %v550_v34 = vadd.f32 %v549_v10, %v4237_v33  ;;  %v551_v37 = vpop.f32.mrb[50].mxu0  ;;  %2021 = vmatprep.mubr.bf16.mxu0 %v1400_v4  ;;  %v710_v58 = vadd.f32 %v709_v24, %v4237_v33  ;;  %v711_v27 = vpop.f32.mrb[50].mxu1  ;;  %v3822_v4 = vld [vmem:[#allocation7 + $0x1e4] ss:$8 sps:$4 sm:$0xff]  }
 0x1a3   :  { %v552_v44 = vadd.f32 %v551_v37, %v4232_v21  ;;  %v553_v30 = vpop.f32.mrb[51].mxu0  ;;  %2022 = vmatmul.mubr.bf16.gmra.mrb[108].mxu0 %v1399_v56  ;;  %v1323_v31 = vmax.f32 %v708_v20, 0.0  ;;  %v712_v38 = vadd.f32 %v711_v27, %v4232_v21  ;;  %v713_v32 = vpop.f32.mrb[51].mxu1  ;;  %v1195_v52 = vmax.f32 %v548_v13, 0.0  ;;  %2260 = vmatprep.subr.bf16.mxu0 %v3822_v4 }
 0x1a4   :  { %v554_v41 = vadd.f32 %v553_v30, %v4237_v33  ;;  %v1324_v42 = vmax.f32 %v710_v58, 0.0  ;;  %v714_v25 = vadd.f32 %v713_v32, %v4237_v33  ;;  %v1196_v63 = vmax.f32 %v550_v34, 0.0  ;;  %2261 = vmatpush1.bf16.msra.mxu0 %v3820_v48 }
 0x1a5   :  { %v1199_v53 = vmax.f32 %v552_v44, 0.0  ;;  %v1327_v57 = vmax.f32 %v712_v38, 0.0  ;;  %1009 = vmatmul.mubr.bf16.gmra.mrb[156].mxu1 %v4133_v46 }
 0x1a6   :  { %v1200_v50 = vmax.f32 %v554_v41, 0.0  ;;  %v1328_v56 = vmax.f32 %v714_v25, 0.0  ;;  %1018 = vmatprep.mubr.bf16.mxu1 %v3970_v0 }
 0x1a7   :  { %v1403_v10 = vpack.c.bf16 %v1199_v53, %v1195_v52  ;;  %v4418_v20 = vpack.c.bf16 %v1327_v57, %v1323_v31 }
 0x1a8   :  { %v1404_v24 = vpack.c.bf16 %v1200_v50, %v1196_v63  ;;  %v557_v37 = vpop.f32.mrb[52].mxu0  ;;  %v717_v13 = vpop.f32.mrb[52].mxu1  ;;  %v4421_v58 = vpack.c.bf16 %v1328_v56, %v1324_v42 }
 0x1a9   :  { %v558_v46 = vadd.f32 %v557_v37, %v4232_v21  ;;  %v559_v34 = vpop.f32.mrb[53].mxu0  ;;  %v718_v27 = vadd.f32 %v717_v13, %v4232_v21  ;;  %v719_v44 = vpop.f32.mrb[53].mxu1 }
 0x1aa   :  { %v560_v30 = vadd.f32 %v559_v34, %v4237_v33  ;;  %v561_v38 = vpop.f32.mrb[54].mxu0  ;;  %2031 = vmatprep.mubr.bf16.mxu0 %v1404_v24  ;;  %v720_v31 = vadd.f32 %v719_v44, %v4237_v33  ;;  %v721_v32 = vpop.f32.mrb[54].mxu1 }
 0x1ab   :  { %v562_v41 = vadd.f32 %v561_v38, %v4232_v21  ;;  %v563_v25 = vpop.f32.mrb[55].mxu0  ;;  %2032 = vmatmul.mubr.bf16.gmra.mrb[112].mxu0 %v1403_v10  ;;  %v1331_v42 = vmax.f32 %v718_v27, 0.0  ;;  %v722_v43 = vadd.f32 %v721_v32, %v4232_v21  ;;  %v723_v48 = vpop.f32.mrb[55].mxu1  ;;  %v1203_v4 = vmax.f32 %v558_v46, 0.0 }
 0x1ac   :  { %v564_v52 = vadd.f32 %v563_v25, %v4237_v33  ;;  %v1332_v53 = vmax.f32 %v720_v31, 0.0  ;;  %v724_v57 = vadd.f32 %v723_v48, %v4237_v33  ;;  %v1204_v56 = vmax.f32 %v560_v30, 0.0 }
 0x1ad   :  { %v1207_v63 = vmax.f32 %v562_v41, 0.0  ;;  %v1335_v50 = vmax.f32 %v722_v43, 0.0  ;;  %1019 = vmatmul.mubr.bf16.gmra.mrb[160].mxu1 %v4141_v55 }
 0x1ae   :  { %v1208_v24 = vmax.f32 %v564_v52, 0.0  ;;  %v1336_v37 = vmax.f32 %v724_v57, 0.0  ;;  %1028 = vmatprep.mubr.bf16.mxu1 %v3970_v0 }
 0x1af   :  { %v1407_v10 = vpack.c.bf16 %v1207_v63, %v1203_v4  ;;  %v4433_v13 = vpack.c.bf16 %v1335_v50, %v1331_v42 }
 0x1b0   :  { %v1408_v34 = vpack.c.bf16 %v1208_v24, %v1204_v56  ;;  %v567_v27 = vpop.f32.mrb[56].mxu0  ;;  %v727_v44 = vpop.f32.mrb[56].mxu1  ;;  %v4435_v38 = vpack.c.bf16 %v1336_v37, %v1332_v53  ;;  %v3823_v56 = vld [vmem:[#allocation8 + $0x8] sm:$0xff]   ;;  %v3824_v24 = vld [vmem:[#allocation7 + $0x1f0] ss:$8 sps:$4 sm:$0xff]  }
 0x1b1   :  { %v568_v31 = vadd.f32 %v567_v27, %v4232_v21  ;;  %v569_v46 = vpop.f32.mrb[57].mxu0  ;;  %v728_v32 = vadd.f32 %v727_v44, %v4232_v21  ;;  %v729_v41 = vpop.f32.mrb[57].mxu1  ;;  %v3826_v44 = vld [vmem:[#allocation7 + $0x1f4] ss:$8 sps:$4 sm:$0xff]   ;;  %2915 = vmatpush1.bf16.msra.mxu1 %v3823_v56 }
 0x1b2   :  { %v570_v55 = vadd.f32 %v569_v46, %v4237_v33  ;;  %v571_v30 = vpop.f32.mrb[58].mxu0  ;;  %2041 = vmatprep.mubr.bf16.mxu0 %v1408_v34  ;;  %v730_v25 = vadd.f32 %v729_v41, %v4237_v33  ;;  %v731_v43 = vpop.f32.mrb[58].mxu1  ;;  %2262 = vmatprep.subr.bf16.mxu0 %v3826_v44 }
 0x1b3   :  { %v572_v42 = vadd.f32 %v571_v30, %v4232_v21  ;;  %v573_v48 = vpop.f32.mrb[59].mxu0  ;;  %2042 = vmatmul.mubr.bf16.gmra.mrb[116].mxu0 %v1407_v10  ;;  %v1339_v52 = vmax.f32 %v728_v32, 0.0  ;;  %v732_v53 = vadd.f32 %v731_v43, %v4232_v21  ;;  %v733_v57 = vpop.f32.mrb[59].mxu1  ;;  %v1211_v37 = vmax.f32 %v568_v31, 0.0  ;;  %2916 = vmatprep.subr.bf16.mxu1 %v3970_v0 }
 0x1b4   :  { %v574_v4 = vadd.f32 %v573_v48, %v4237_v33  ;;  %v1340_v63 = vmax.f32 %v730_v25, 0.0  ;;  %v734_v50 = vadd.f32 %v733_v57, %v4237_v33  ;;  %v1212_v46 = vmax.f32 %v570_v55, 0.0  ;;  %2263 = vmatpush1.bf16.msra.mxu0 %v3824_v24 }
 0x1b5   :  { %v1215_v34 = vmax.f32 %v572_v42, 0.0  ;;  %v1343_v27 = vmax.f32 %v732_v53, 0.0  ;;  %1029 = vmatmul.mubr.bf16.gmra.mrb[164].mxu1 %v4149_v61 }
 0x1b6   :  { %v1216_v41 = vmax.f32 %v574_v4, 0.0  ;;  %v1344_v10 = vmax.f32 %v734_v50, 0.0  ;;  %1038 = vmatprep.mubr.bf16.mxu1 %v3970_v0 }
 0x1b7   :  { %v1411_v32 = vpack.c.bf16 %v1215_v34, %v1211_v37  ;;  %v4447_v30 = vpack.c.bf16 %v1343_v27, %v1339_v52 }
 0x1b8   :  { %v1412_v25 = vpack.c.bf16 %v1216_v41, %v1212_v46  ;;  %v577_v43 = vpop.f32.mrb[60].mxu0  ;;  %v737_v31 = vpop.f32.mrb[60].mxu1  ;;  %v4450_v42 = vpack.c.bf16 %v1344_v10, %v1340_v63 }
 0x1b9   :  { %v578_v61 = vadd.f32 %v577_v43, %v4232_v21  ;;  %v579_v55 = vpop.f32.mrb[61].mxu0  ;;  %v738_v48 = vadd.f32 %v737_v31, %v4232_v21  ;;  %v739_v53 = vpop.f32.mrb[61].mxu1  ;;  %v227_v31 = vsub.s32 3, %v4221_v36 }
 0x1ba   :  { %v580_v57 = vadd.f32 %v579_v55, %v4237_v33  ;;  %v581_v4 = vpop.f32.mrb[62].mxu0  ;;  %2051 = vmatprep.mubr.bf16.mxu0 %v1412_v25  ;;  %v740_v52 = vadd.f32 %v739_v53, %v4237_v33  ;;  %v741_v50 = vpop.f32.mrb[62].mxu1  ;;  %v223_v25 = vsub.s32 2, %v4221_v36 }
 0x1bb   :  { %v582_v56 = vadd.f32 %v581_v4, %v4232_v21  ;;  %v583_v37 = vpop.f32.mrb[63].mxu0  ;;  %2052 = vmatmul.mubr.bf16.gmra.mrb[120].mxu0 %v1411_v32  ;;  %v1347_v63 = vmax.f32 %v738_v48, 0.0  ;;  %v742_v24 = vadd.f32 %v741_v50, %v4232_v21  ;;  %v743_v34 = vpop.f32.mrb[63].mxu1  ;;  %v1219_v27 = vmax.f32 %v578_v61, 0.0  ;;  %v3841_v61 = vld [vmem:[%s5074_s2] sm:$0xf] }
 0x1bc   :  { %v584_v44 = vadd.f32 %v583_v37, %v4237_v33  ;;  %v1348_v46 = vmax.f32 %v740_v52, 0.0  ;;  %v744_v41 = vadd.f32 %v743_v34, %v4237_v33  ;;  %v1220_v55 = vmax.f32 %v580_v57, 0.0 }
 0x1bd   :  { %v1223_v10 = vmax.f32 %v582_v56, 0.0  ;;  %v1351_v43 = vmax.f32 %v742_v24, 0.0  ;;  %1039 = vmatmul.mubr.bf16.gmra.mrb[168].mxu1 %v4157_v6  ;;  %v4467_v53 = vrot.slane %v3841_v61, %v223_v25  ;;  %v4469_v33 = vrot.slane %v3841_v61, %v227_v31 }
 0x1be   :  { %v1224_v32 = vmax.f32 %v584_v44, 0.0  ;;  %v1352_v48 = vmax.f32 %v744_v41, 0.0  ;;  %1048 = vmatprep.mubr.bf16.mxu1 %v3970_v0 }
 0x1bf   :  { %v1415_v21 = vpack.c.bf16 %v1223_v10, %v1219_v27  ;;  %v4471_v4 = vpack.c.bf16 %v1351_v43, %v1347_v63  ;;  %v3827_v10 = vld [vmem:[#allocation8 + $0x10] sm:$0xff]  }
 0x1c0   :  { %v1416_v6 = vpack.c.bf16 %v1224_v32, %v1220_v55  ;;  %v780_v52 = vpop.f32.mrb[64].mxu1  ;;  %v4473_v50 = vpack.c.bf16 %v1352_v48, %v1348_v46  ;;  %2917 = vmatpush1.bf16.msra.mxu1 %v3827_v10 }
 0x1c1   :  { %v781_v57 = vadd.f32 %v780_v52, %v4467_v53  ;;  %v782_v56 = vpop.f32.mrb[65].mxu1  ;;  %2918 = vmatprep.subr.bf16.mxu1 %v3970_v0 }
 0x1c2   :  { %2061 = vmatprep.mubr.bf16.mxu0 %v1416_v6  ;;  %v783_v37 = vadd.f32 %v782_v56, %v4469_v33  ;;  %v784_v24 = vpop.f32.mrb[66].mxu1 }
 0x1c3   :  { %2062 = vmatmul.mubr.bf16.gmra.mrb[124].mxu0 %v1415_v21  ;;  %v1101_v34 = vmax.f32 %v781_v57, 0.0  ;;  %v785_v27 = vadd.f32 %v784_v24, %v4467_v53  ;;  %v786_v44 = vpop.f32.mrb[67].mxu1 }
 0x1c4   :  { %2071 = vmatprep.mubr.bf16.mxu0 %v4252_v51  ;;  %v1102_v63 = vmax.f32 %v783_v37, 0.0  ;;  %v787_v41 = vadd.f32 %v786_v44, %v4469_v33 }
 0x1c5   :  { %v1105_v46 = vmax.f32 %v785_v27, 0.0  ;;  %1049 = vmatmul.mubr.bf16.gmra.mrb[172].mxu1 %v4165_v14 }
 0x1c6   :  { %v1106_v43 = vmax.f32 %v787_v41, 0.0  ;;  %1058 = vmatprep.mubr.bf16.mxu1 %v3970_v0 }
 0x1c7   :  { %v4482_v25 = vpack.c.bf16 %v1105_v46, %v1101_v34 }
 0x1c8   :  { %v4485_v31 = vpack.c.bf16 %v1106_v43, %v1102_v63  ;;  %v790_v55 = vpop.f32.mrb[68].mxu1 }
 0x1c9   :  { %v791_v51 = vadd.f32 %v790_v55, %v4467_v53  ;;  %v792_v32 = vpop.f32.mrb[69].mxu1  ;;  %v3828_v55 = vld [vmem:[#allocation8 + $0x18] sm:$0xff]  }
 0x1ca   :  { %v793_v48 = vadd.f32 %v792_v32, %v4469_v33  ;;  %v794_v21 = vpop.f32.mrb[70].mxu1  ;;  %2919 = vmatpush1.bf16.msra.mxu1 %v3828_v55 }
 0x1cb   :  { %2072 = vmatmul.mubr.bf16.gmra.mrb[128].mxu0 %v4250_v40  ;;  %v1109_v14 = vmax.f32 %v791_v51, 0.0  ;;  %v795_v61 = vadd.f32 %v794_v21, %v4467_v53  ;;  %v796_v6 = vpop.f32.mrb[71].mxu1  ;;  %2920 = vmatprep.subr.bf16.mxu1 %v3970_v0 }
 0x1cc   :  { %2081 = vmatprep.mubr.bf16.mxu0 %v4266_v35  ;;  %v1110_v52 = vmax.f32 %v793_v48, 0.0  ;;  %v797_v57 = vadd.f32 %v796_v6, %v4469_v33 }
 0x1cd   :  { %v1113_v56 = vmax.f32 %v795_v61, 0.0  ;;  %1059 = vmatmul.mubr.bf16.gmra.mrb[176].mxu1 %v4173_v26 }
 0x1ce   :  { %v1114_v37 = vmax.f32 %v797_v57, 0.0  ;;  %1068 = vmatprep.mubr.bf16.mxu1 %v3970_v0 }
 0x1cf   :  { %v4495_v24 = vpack.c.bf16 %v1113_v56, %v1109_v14 }
 0x1d0   :  { %v4497_v34 = vpack.c.bf16 %v1114_v37, %v1110_v52  ;;  %v800_v40 = vpop.f32.mrb[72].mxu1 }
 0x1d1   :  { %v801_v27 = vadd.f32 %v800_v40, %v4467_v53  ;;  %v802_v44 = vpop.f32.mrb[73].mxu1 }
 0x1d2   :  { %v803_v63 = vadd.f32 %v802_v44, %v4469_v33  ;;  %v804_v35 = vpop.f32.mrb[74].mxu1 }
 0x1d3   :  { %2082 = vmatmul.mubr.bf16.gmra.mrb[132].mxu0 %v4264_v28  ;;  %v1117_v41 = vmax.f32 %v801_v27, 0.0  ;;  %v805_v10 = vadd.f32 %v804_v35, %v4467_v53  ;;  %v806_v26 = vpop.f32.mrb[75].mxu1 }
 0x1d4   :  { %2091 = vmatprep.mubr.bf16.mxu0 %v4280_v29  ;;  %v1118_v46 = vmax.f32 %v803_v63, 0.0  ;;  %v807_v43 = vadd.f32 %v806_v26, %v4469_v33 }
 0x1d5   :  { %v1121_v51 = vmax.f32 %v805_v10, 0.0  ;;  %1069 = vmatmul.mubr.bf16.gmra.mrb[180].mxu1 %v4181_v39 }
 0x1d6   :  { %v1122_v32 = vmax.f32 %v807_v43, 0.0  ;;  %1078 = vmatprep.mubr.bf16.mxu1 %v3970_v0 }
 0x1d7   :  { %v4507_v48 = vpack.c.bf16 %v1121_v51, %v1117_v41  ;;  %v3829_v51 = vld [vmem:[#allocation8 + $0x20] sm:$0xff]  }
 0x1d8   :  { %v4510_v28 = vpack.c.bf16 %v1122_v32, %v1118_v46  ;;  %v810_v21 = vpop.f32.mrb[76].mxu1  ;;  %2921 = vmatpush1.bf16.msra.mxu1 %v3829_v51  ;;  %v3830_v51 = vld [vmem:[#allocation8 + $0x28] sm:$0xff]  }
 0x1d9   :  { %v811_v29 = vadd.f32 %v810_v21, %v4467_v53  ;;  %v812_v14 = vpop.f32.mrb[77].mxu1  ;;  %2922 = vmatprep.subr.bf16.mxu1 %v3970_v0 }
 0x1da   :  { %v813_v61 = vadd.f32 %v812_v14, %v4469_v33  ;;  %v814_v6 = vpop.f32.mrb[78].mxu1 }
 0x1db   :  { %2092 = vmatmul.mubr.bf16.gmra.mrb[136].mxu0 %v4278_v17  ;;  %v1125_v39 = vmax.f32 %v811_v29, 0.0  ;;  %v815_v52 = vadd.f32 %v814_v6, %v4467_v53  ;;  %v816_v57 = vpop.f32.mrb[79].mxu1 }
 0x1dc   :  { %2101 = vmatprep.mubr.bf16.mxu0 %v4294_v19  ;;  %v1126_v56 = vmax.f32 %v813_v61, 0.0  ;;  %v817_v37 = vadd.f32 %v816_v57, %v4469_v33  ;;  %2923 = vmatpush1.bf16.msra.mxu1 %v3830_v51  ;;  %v3831_v51 = vld [vmem:[#allocation8 + $0x30] sm:$0xff]  }
 0x1dd   :  { %v1129_v40 = vmax.f32 %v815_v52, 0.0  ;;  %1079 = vmatmul.mubr.bf16.gmra.mrb[184].mxu1 %v4189_v47  ;;  %2924 = vmatprep.subr.bf16.mxu1 %v3970_v0 }
 0x1de   :  { %v1130_v27 = vmax.f32 %v817_v37, 0.0  ;;  %1088 = vmatprep.mubr.bf16.mxu1 %v3970_v0 }
 0x1df   :  { %v4520_v44 = vpack.c.bf16 %v1129_v40, %v1125_v39 }
 0x1e0   :  { %v4522_v63 = vpack.c.bf16 %v1130_v27, %v1126_v56  ;;  %v820_v17 = vpop.f32.mrb[80].mxu1  ;;  %2925 = vmatpush1.bf16.msra.mxu1 %v3831_v51  ;;  %v3832_v51 = vld [vmem:[#allocation8 + $0x38] sm:$0xff]  }
 0x1e1   :  { %v821_v35 = vadd.f32 %v820_v17, %v4467_v53  ;;  %v822_v41 = vpop.f32.mrb[81].mxu1  ;;  %2926 = vmatprep.subr.bf16.mxu1 %v3970_v0 }
 0x1e2   :  { %v823_v10 = vadd.f32 %v822_v41, %v4469_v33  ;;  %v824_v19 = vpop.f32.mrb[82].mxu1 }
 0x1e3   :  { %2102 = vmatmul.mubr.bf16.gmra.mrb[140].mxu0 %v4292_v9  ;;  %v1133_v26 = vmax.f32 %v821_v35, 0.0  ;;  %v825_v46 = vadd.f32 %v824_v19, %v4467_v53  ;;  %v826_v47 = vpop.f32.mrb[83].mxu1 }
 0x1e4   :  { %2111 = vmatprep.mubr.bf16.mxu0 %v4308_v16  ;;  %v1134_v43 = vmax.f32 %v823_v10, 0.0  ;;  %v827_v55 = vadd.f32 %v826_v47, %v4469_v33  ;;  %2927 = vmatpush1.bf16.msra.mxu1 %v3832_v51  ;;  %v3833_v51 = vld [vmem:[#allocation8 + $0x40] sm:$0xff]  }
 0x1e5   :  { %v1137_v32 = vmax.f32 %v825_v46, 0.0  ;;  %1089 = vmatmul.mubr.bf16.gmra.mrb[188].mxu1 %v4197_v59  ;;  %2928 = vmatprep.subr.bf16.mxu1 %v3970_v0 }
 0x1e6   :  { %v1138_v21 = vmax.f32 %v827_v55, 0.0 }
 0x1e7   :  { %v4531_v29 = vpack.c.bf16 %v1137_v32, %v1133_v26 }
 0x1e8   :  { %v4534_v9 = vpack.c.bf16 %v1138_v21, %v1134_v43  ;;  %v830_v14 = vpop.f32.mrb[84].mxu1  ;;  %2929 = vmatpush1.bf16.msra.mxu1 %v3833_v51  ;;  %v3834_v51 = vld [vmem:[#allocation8 + $0x48] sm:$0xff]  }
 0x1e9   :  { %v831_v61 = vadd.f32 %v830_v14, %v4467_v53  ;;  %v832_v6 = vpop.f32.mrb[85].mxu1  ;;  %2930 = vmatprep.subr.bf16.mxu1 %v3970_v0 }
 0x1ea   :  { %v833_v16 = vadd.f32 %v832_v6, %v4469_v33  ;;  %v834_v39 = vpop.f32.mrb[86].mxu1 }
 0x1eb   :  { %2112 = vmatmul.mubr.bf16.gmra.mrb[144].mxu0 %v4306_v7  ;;  %v1141_v52 = vmax.f32 %v831_v61, 0.0  ;;  %v835_v59 = vadd.f32 %v834_v39, %v4467_v53  ;;  %v836_v57 = vpop.f32.mrb[87].mxu1 }
 0x1ec   :  { %2121 = vmatprep.mubr.bf16.mxu0 %v4322_v15  ;;  %v1142_v56 = vmax.f32 %v833_v16, 0.0  ;;  %v837_v37 = vadd.f32 %v836_v57, %v4469_v33  ;;  %2931 = vmatpush1.bf16.msra.mxu1 %v3834_v51  ;;  %v3835_v51 = vld [vmem:[#allocation8 + $0x50] sm:$0xff]  }
 0x1ed   :  { %v1145_v40 = vmax.f32 %v835_v59, 0.0  ;;  %2932 = vmatprep.subr.bf16.mxu1 %v3970_v0 }
 0x1ee   :  { %v1146_v27 = vmax.f32 %v837_v37, 0.0 }
 0x1ef   :  { %v4542_v17 = vpack.c.bf16 %v1145_v40, %v1141_v52 }
 0x1f0   :  { %v4544_v35 = vpack.c.bf16 %v1146_v27, %v1142_v56  ;;  %v840_v41 = vpop.f32.mrb[88].mxu1  ;;  %2933 = vmatpush1.bf16.msra.mxu1 %v3835_v51  ;;  %v3836_v51 = vld [vmem:[#allocation8 + $0x58] sm:$0xff]  }
 0x1f1   :  { %v841_v10 = vadd.f32 %v840_v41, %v4467_v53  ;;  %v842_v19 = vpop.f32.mrb[89].mxu1  ;;  %2934 = vmatprep.subr.bf16.mxu1 %v3970_v0 }
 0x1f2   :  { %v843_v7 = vadd.f32 %v842_v19, %v4469_v33  ;;  %v844_v26 = vpop.f32.mrb[90].mxu1 }
 0x1f3   :  { %2122 = vmatmul.mubr.bf16.gmra.mrb[148].mxu0 %v4320_v3  ;;  %v1149_v46 = vmax.f32 %v841_v10, 0.0  ;;  %v845_v15 = vadd.f32 %v844_v26, %v4467_v53  ;;  %v846_v47 = vpop.f32.mrb[91].mxu1 }
 0x1f4   :  { %2131 = vmatprep.mubr.bf16.mxu0 %v4336_v5  ;;  %v1150_v43 = vmax.f32 %v843_v7, 0.0  ;;  %v847_v55 = vadd.f32 %v846_v47, %v4469_v33  ;;  %2935 = vmatpush1.bf16.msra.mxu1 %v3836_v51  ;;  %v3837_v51 = vld [vmem:[#allocation8 + $0x60] sm:$0xff]  }
 0x1f5   :  { %v1153_v32 = vmax.f32 %v845_v15, 0.0  ;;  %2936 = vmatprep.subr.bf16.mxu1 %v3970_v0 }
 0x1f6   :  { %v1154_v21 = vmax.f32 %v847_v55, 0.0 }
 0x1f7   :  { %v4552_v14 = vpack.c.bf16 %v1153_v32, %v1149_v46 }
 0x1f8   :  { %v4555_v61 = vpack.c.bf16 %v1154_v21, %v1150_v43  ;;  %v850_v3 = vpop.f32.mrb[92].mxu1  ;;  %2937 = vmatpush1.bf16.msra.mxu1 %v3837_v51  ;;  %v3838_v51 = vld [vmem:[#allocation8 + $0x68] sm:$0xff]  }
 0x1f9   :  { %v851_v6 = vadd.f32 %v850_v3, %v4467_v53  ;;  %v852_v16 = vpop.f32.mrb[93].mxu1  ;;  %2938 = vmatprep.subr.bf16.mxu1 %v3970_v0 }
 0x1fa   :  { %v853_v39 = vadd.f32 %v852_v16, %v4469_v33  ;;  %v854_v5 = vpop.f32.mrb[94].mxu1 }
 0x1fb   :  { %2132 = vmatmul.mubr.bf16.gmra.mrb[152].mxu0 %v4334_v1  ;;  %v1157_v52 = vmax.f32 %v851_v6, 0.0  ;;  %v855_v59 = vadd.f32 %v854_v5, %v4467_v53  ;;  %v856_v57 = vpop.f32.mrb[95].mxu1 }
 0x1fc   :  { %2141 = vmatprep.mubr.bf16.mxu0 %v4350_v2  ;;  %v1158_v56 = vmax.f32 %v853_v39, 0.0  ;;  %v857_v37 = vadd.f32 %v856_v57, %v4469_v33  ;;  %2939 = vmatpush1.bf16.msra.mxu1 %v3838_v51  ;;  %v3839_v51 = vld [vmem:[#allocation8 + $0x70] sm:$0xff]  }
 0x1fd   :  { %v1161_v40 = vmax.f32 %v855_v59, 0.0  ;;  %2940 = vmatprep.subr.bf16.mxu1 %v3970_v0 }
 0x1fe   :  { %v1162_v27 = vmax.f32 %v857_v37, 0.0 }
 0x1ff   :  { %v4563_v41 = vpack.c.bf16 %v1161_v40, %v1157_v52 }
 0x200   :  { %v4565_v10 = vpack.c.bf16 %v1162_v27, %v1158_v56  ;;  %v860_v19 = vpop.f32.mrb[96].mxu1  ;;  %2941 = vmatpush1.bf16.msra.mxu1 %v3839_v51 }
 0x201   :  { %v861_v7 = vadd.f32 %v860_v19, %v4467_v53  ;;  %v862_v26 = vpop.f32.mrb[97].mxu1  ;;  %2942 = vmatprep.subr.bf16.mxu1 %v3970_v0 }
 0x202   :  { %v863_v1 = vadd.f32 %v862_v26, %v4469_v33  ;;  %v864_v46 = vpop.f32.mrb[98].mxu1 }
 0x203   :  { %2142 = vmatmul.mubr.bf16.gmra.mrb[156].mxu0 %v4348_v62  ;;  %v1165_v15 = vmax.f32 %v861_v7, 0.0  ;;  %v865_v2 = vadd.f32 %v864_v46, %v4467_v53  ;;  %v866_v47 = vpop.f32.mrb[99].mxu1 }
 0x204   :  { %2151 = vmatprep.mubr.bf16.mxu0 %v4364_v8  ;;  %v1166_v43 = vmax.f32 %v863_v1, 0.0  ;;  %v867_v55 = vadd.f32 %v866_v47, %v4469_v33 }
 0x205   :  { %v1169_v32 = vmax.f32 %v865_v2, 0.0 }
 0x206   :  { %v1170_v21 = vmax.f32 %v867_v55, 0.0 }
 0x207   :  { %v4573_v3 = vpack.c.bf16 %v1169_v32, %v1165_v15 }
 0x208   :  { %v4576_v6 = vpack.c.bf16 %v1170_v21, %v1166_v43  ;;  %v870_v62 = vpop.f32.mrb[100].mxu1 }
 0x209   :  { %v871_v16 = vadd.f32 %v870_v62, %v4467_v53  ;;  %v872_v39 = vpop.f32.mrb[101].mxu1 }
 0x20a   :  { %v873_v5 = vadd.f32 %v872_v39, %v4469_v33  ;;  %v874_v8 = vpop.f32.mrb[102].mxu1 }
 0x20b   :  { %2152 = vmatmul.mubr.bf16.gmra.mrb[160].mxu0 %v4362_v23  ;;  %v1173_v52 = vmax.f32 %v871_v16, 0.0  ;;  %v875_v59 = vadd.f32 %v874_v8, %v4467_v53  ;;  %v876_v57 = vpop.f32.mrb[103].mxu1 }
 0x20c   :  { %2161 = vmatprep.mubr.bf16.mxu0 %v4378_v60  ;;  %v1174_v56 = vmax.f32 %v873_v5, 0.0  ;;  %v877_v37 = vadd.f32 %v876_v57, %v4469_v33 }
 0x20d   :  { %v1177_v40 = vmax.f32 %v875_v59, 0.0 }
 0x20e   :  { %v1178_v27 = vmax.f32 %v877_v37, 0.0 }
 0x20f   :  { %v4584_v19 = vpack.c.bf16 %v1177_v40, %v1173_v52 }
 0x210   :  { %v4586_v7 = vpack.c.bf16 %v1178_v27, %v1174_v56  ;;  %v880_v26 = vpop.f32.mrb[104].mxu1 }
 0x211   :  { %v881_v1 = vadd.f32 %v880_v26, %v4467_v53  ;;  %v882_v46 = vpop.f32.mrb[105].mxu1 }
 0x212   :  { %v883_v23 = vadd.f32 %v882_v46, %v4469_v33  ;;  %v884_v15 = vpop.f32.mrb[106].mxu1 }
 0x213   :  { %2162 = vmatmul.mubr.bf16.gmra.mrb[164].mxu0 %v4376_v11  ;;  %v1181_v2 = vmax.f32 %v881_v1, 0.0  ;;  %v885_v60 = vadd.f32 %v884_v15, %v4467_v53  ;;  %v886_v47 = vpop.f32.mrb[107].mxu1 }
 0x214   :  { %2171 = vmatprep.mubr.bf16.mxu0 %v4392_v18  ;;  %v1182_v43 = vmax.f32 %v883_v23, 0.0  ;;  %v887_v55 = vadd.f32 %v886_v47, %v4469_v33 }
 0x215   :  { %v1185_v32 = vmax.f32 %v885_v60, 0.0 }
 0x216   :  { %v1186_v21 = vmax.f32 %v887_v55, 0.0 }
 0x217   :  { %v4594_v62 = vpack.c.bf16 %v1185_v32, %v1181_v2 }
 0x218   :  { %v4597_v16 = vpack.c.bf16 %v1186_v21, %v1182_v43  ;;  %v890_v11 = vpop.f32.mrb[108].mxu1 }
 0x219   :  { %v891_v39 = vadd.f32 %v890_v11, %v4467_v53  ;;  %v892_v5 = vpop.f32.mrb[109].mxu1 }
 0x21a   :  { %v893_v8 = vadd.f32 %v892_v5, %v4469_v33  ;;  %v894_v18 = vpop.f32.mrb[110].mxu1 }
 0x21b   :  { %2172 = vmatmul.mubr.bf16.gmra.mrb[168].mxu0 %v4390_v45  ;;  %v1189_v52 = vmax.f32 %v891_v39, 0.0  ;;  %v895_v59 = vadd.f32 %v894_v18, %v4467_v53  ;;  %v896_v57 = vpop.f32.mrb[111].mxu1 }
 0x21c   :  { %2181 = vmatprep.mubr.bf16.mxu0 %v4406_v22  ;;  %v1190_v56 = vmax.f32 %v893_v8, 0.0  ;;  %v897_v37 = vadd.f32 %v896_v57, %v4469_v33 }
 0x21d   :  { %v1193_v40 = vmax.f32 %v895_v59, 0.0 }
 0x21e   :  { %v1194_v27 = vmax.f32 %v897_v37, 0.0 }
 0x21f   :  { %v4605_v26 = vpack.c.bf16 %v1193_v40, %v1189_v52 }
 0x220   :  { %v4607_v1 = vpack.c.bf16 %v1194_v27, %v1190_v56  ;;  %v900_v46 = vpop.f32.mrb[112].mxu1 }
 0x221   :  { %v901_v23 = vadd.f32 %v900_v46, %v4467_v53  ;;  %v902_v15 = vpop.f32.mrb[113].mxu1 }
 0x222   :  { %v903_v45 = vadd.f32 %v902_v15, %v4469_v33  ;;  %v904_v2 = vpop.f32.mrb[114].mxu1 }
 0x223   :  { %2182 = vmatmul.mubr.bf16.gmra.mrb[172].mxu0 %v4404_v54  ;;  %v1197_v60 = vmax.f32 %v901_v23, 0.0  ;;  %v905_v22 = vadd.f32 %v904_v2, %v4467_v53  ;;  %v906_v47 = vpop.f32.mrb[115].mxu1 }
 0x224   :  { %2191 = vmatprep.mubr.bf16.mxu0 %v4421_v58  ;;  %v1198_v43 = vmax.f32 %v903_v45, 0.0  ;;  %v907_v55 = vadd.f32 %v906_v47, %v4469_v33 }
 0x225   :  { %v1201_v32 = vmax.f32 %v905_v22, 0.0 }
 0x226   :  { %v1202_v21 = vmax.f32 %v907_v55, 0.0 }
 0x227   :  { %v4615_v11 = vpack.c.bf16 %v1201_v32, %v1197_v60 }
 0x228   :  { %v4618_v39 = vpack.c.bf16 %v1202_v21, %v1198_v43  ;;  %v910_v54 = vpop.f32.mrb[116].mxu1 }
 0x229   :  { %v911_v5 = vadd.f32 %v910_v54, %v4467_v53  ;;  %v912_v8 = vpop.f32.mrb[117].mxu1 }
 0x22a   :  { %v913_v18 = vadd.f32 %v912_v8, %v4469_v33  ;;  %v914_v58 = vpop.f32.mrb[118].mxu1 }
 0x22b   :  { %2192 = vmatmul.mubr.bf16.gmra.mrb[176].mxu0 %v4418_v20  ;;  %v1205_v52 = vmax.f32 %v911_v5, 0.0  ;;  %v915_v59 = vadd.f32 %v914_v58, %v4467_v53  ;;  %v916_v57 = vpop.f32.mrb[119].mxu1 }
 0x22c   :  { %2201 = vmatprep.mubr.bf16.mxu0 %v4435_v38  ;;  %v1206_v56 = vmax.f32 %v913_v18, 0.0  ;;  %v917_v37 = vadd.f32 %v916_v57, %v4469_v33 }
 0x22d   :  { %v1209_v40 = vmax.f32 %v915_v59, 0.0 }
 0x22e   :  { %v1210_v27 = vmax.f32 %v917_v37, 0.0 }
 0x22f   :  { %v4626_v46 = vpack.c.bf16 %v1209_v40, %v1205_v52 }
 0x230   :  { %v4628_v23 = vpack.c.bf16 %v1210_v27, %v1206_v56  ;;  %v920_v15 = vpop.f32.mrb[120].mxu1 }
 0x231   :  { %v921_v45 = vadd.f32 %v920_v15, %v4467_v53  ;;  %v922_v2 = vpop.f32.mrb[121].mxu1 }
 0x232   :  { %v923_v20 = vadd.f32 %v922_v2, %v4469_v33  ;;  %v924_v60 = vpop.f32.mrb[122].mxu1 }
 0x233   :  { %2202 = vmatmul.mubr.bf16.gmra.mrb[180].mxu0 %v4433_v13  ;;  %v1213_v22 = vmax.f32 %v921_v45, 0.0  ;;  %v925_v38 = vadd.f32 %v924_v60, %v4467_v53  ;;  %v926_v47 = vpop.f32.mrb[123].mxu1 }
 0x234   :  { %2211 = vmatprep.mubr.bf16.mxu0 %v4450_v42  ;;  %v1214_v43 = vmax.f32 %v923_v20, 0.0  ;;  %v927_v55 = vadd.f32 %v926_v47, %v4469_v33 }
 0x235   :  { %v1217_v32 = vmax.f32 %v925_v38, 0.0 }
 0x236   :  { %v1218_v21 = vmax.f32 %v927_v55, 0.0 }
 0x237   :  { %v4636_v54 = vpack.c.bf16 %v1217_v32, %v1213_v22 }
 0x238   :  { %v4639_v5 = vpack.c.bf16 %v1218_v21, %v1214_v43  ;;  %v930_v13 = vpop.f32.mrb[124].mxu1 }
 0x239   :  { %v931_v8 = vadd.f32 %v930_v13, %v4467_v53  ;;  %v932_v18 = vpop.f32.mrb[125].mxu1 }
 0x23a   :  { %v933_v58 = vadd.f32 %v932_v18, %v4469_v33  ;;  %v934_v42 = vpop.f32.mrb[126].mxu1 }
 0x23b   :  { %2212 = vmatmul.mubr.bf16.gmra.mrb[184].mxu0 %v4447_v30  ;;  %v1221_v52 = vmax.f32 %v931_v8, 0.0  ;;  %v935_v59 = vadd.f32 %v934_v42, %v4467_v53  ;;  %v936_v57 = vpop.f32.mrb[127].mxu1 }
 0x23c   :  { %2221 = vmatprep.mubr.bf16.mxu0 %v4473_v50  ;;  %v1222_v56 = vmax.f32 %v933_v58, 0.0  ;;  %v937_v37 = vadd.f32 %v936_v57, %v4469_v33 }
 0x23d   :  { %v1225_v40 = vmax.f32 %v935_v59, 0.0 }
 0x23e   :  { %v1226_v27 = vmax.f32 %v937_v37, 0.0 }
 0x23f   :  { %v4647_v15 = vpack.c.bf16 %v1225_v40, %v1221_v52 }
 0x240   :  { %v4649_v45 = vpack.c.bf16 %v1226_v27, %v1222_v56  ;;  %v940_v2 = vpop.f32.mrb[128].mxu1 }
 0x241   :  { %v941_v20 = vadd.f32 %v940_v2, %v4467_v53  ;;  %v942_v60 = vpop.f32.mrb[129].mxu1 }
 0x242   :  { %v943_v30 = vadd.f32 %v942_v60, %v4469_v33  ;;  %v944_v22 = vpop.f32.mrb[130].mxu1 }
 0x243   :  { %2222 = vmatmul.mubr.bf16.gmra.mrb[188].mxu0 %v4471_v4  ;;  %v1229_v38 = vmax.f32 %v941_v20, 0.0  ;;  %v945_v50 = vadd.f32 %v944_v22, %v4467_v53  ;;  %v946_v47 = vpop.f32.mrb[131].mxu1 }
 0x244   :  { %2264 = vmatprep.mubr.bf16.mxu0 %v4485_v31  ;;  %v1230_v43 = vmax.f32 %v943_v30, 0.0  ;;  %v947_v55 = vadd.f32 %v946_v47, %v4469_v33 }
 0x245   :  { %v1233_v32 = vmax.f32 %v945_v50, 0.0 }
 0x246   :  { %v1234_v21 = vmax.f32 %v947_v55, 0.0 }
 0x247   :  { %v4657_v13 = vpack.c.bf16 %v1233_v32, %v1229_v38 }
 0x248   :  { %v4660_v8 = vpack.c.bf16 %v1234_v21, %v1230_v43  ;;  %v950_v4 = vpop.f32.mrb[132].mxu1 }
 0x249   :  { %v951_v18 = vadd.f32 %v950_v4, %v4467_v53  ;;  %v952_v58 = vpop.f32.mrb[133].mxu1 }
 0x24a   :  { %v953_v42 = vadd.f32 %v952_v58, %v4469_v33  ;;  %v954_v31 = vpop.f32.mrb[134].mxu1 }
 0x24b   :  { %2265 = vmatmul.mubr.bf16.vlgmr.msra.gmra.mrb[64].mxu0 %v4482_v25  ;;  %v1237_v52 = vmax.f32 %v951_v18, 0.0  ;;  %v955_v59 = vadd.f32 %v954_v31, %v4467_v53  ;;  %v956_v57 = vpop.f32.mrb[135].mxu1 }
 0x24c   :  { %2274 = vmatprep.mubr.bf16.mxu0 %v4497_v34  ;;  %v1238_v56 = vmax.f32 %v953_v42, 0.0  ;;  %v957_v37 = vadd.f32 %v956_v57, %v4469_v33 }
 0x24d   :  { %v1241_v40 = vmax.f32 %v955_v59, 0.0 }
 0x24e   :  { %v1242_v27 = vmax.f32 %v957_v37, 0.0 }
 0x24f   :  { %v4668_v2 = vpack.c.bf16 %v1241_v40, %v1237_v52 }
 0x250   :  { %v4670_v20 = vpack.c.bf16 %v1242_v27, %v1238_v56  ;;  %v960_v60 = vpop.f32.mrb[136].mxu1 }
 0x251   :  { %v961_v30 = vadd.f32 %v960_v60, %v4467_v53  ;;  %v962_v22 = vpop.f32.mrb[137].mxu1 }
 0x252   :  { %v963_v25 = vadd.f32 %v962_v22, %v4469_v33  ;;  %v964_v38 = vpop.f32.mrb[138].mxu1 }
 0x253   :  { %2275 = vmatmul.mubr.bf16.gmra.mrb[68].mxu0 %v4495_v24  ;;  %v1245_v50 = vmax.f32 %v961_v30, 0.0  ;;  %v965_v34 = vadd.f32 %v964_v38, %v4467_v53  ;;  %v966_v47 = vpop.f32.mrb[139].mxu1 }
 0x254   :  { %2284 = vmatprep.mubr.bf16.mxu0 %v4510_v28  ;;  %v1246_v43 = vmax.f32 %v963_v25, 0.0  ;;  %v967_v55 = vadd.f32 %v966_v47, %v4469_v33 }
 0x255   :  { %v1249_v32 = vmax.f32 %v965_v34, 0.0 }
 0x256   :  { %v1250_v21 = vmax.f32 %v967_v55, 0.0 }
 0x257   :  { %v4678_v4 = vpack.c.bf16 %v1249_v32, %v1245_v50 }
 0x258   :  { %v4681_v18 = vpack.c.bf16 %v1250_v21, %v1246_v43  ;;  %v970_v24 = vpop.f32.mrb[140].mxu1 }
 0x259   :  { %v971_v58 = vadd.f32 %v970_v24, %v4467_v53  ;;  %v972_v42 = vpop.f32.mrb[141].mxu1 }
 0x25a   :  { %v973_v31 = vadd.f32 %v972_v42, %v4469_v33  ;;  %v974_v28 = vpop.f32.mrb[142].mxu1 }
 0x25b   :  { %2285 = vmatmul.mubr.bf16.gmra.mrb[72].mxu0 %v4507_v48  ;;  %v1253_v52 = vmax.f32 %v971_v58, 0.0  ;;  %v975_v59 = vadd.f32 %v974_v28, %v4467_v53  ;;  %v976_v57 = vpop.f32.mrb[143].mxu1 }
 0x25c   :  { %2294 = vmatprep.mubr.bf16.mxu0 %v4522_v63  ;;  %v1254_v56 = vmax.f32 %v973_v31, 0.0  ;;  %v977_v37 = vadd.f32 %v976_v57, %v4469_v33 }
 0x25d   :  { %v1257_v40 = vmax.f32 %v975_v59, 0.0 }
 0x25e   :  { %v1258_v27 = vmax.f32 %v977_v37, 0.0 }
 0x25f   :  { %v4689_v60 = vpack.c.bf16 %v1257_v40, %v1253_v52 }
 0x260   :  { %v4691_v30 = vpack.c.bf16 %v1258_v27, %v1254_v56  ;;  %v980_v22 = vpop.f32.mrb[144].mxu1 }
 0x261   :  { %v981_v25 = vadd.f32 %v980_v22, %v4467_v53  ;;  %v982_v38 = vpop.f32.mrb[145].mxu1 }
 0x262   :  { %v983_v48 = vadd.f32 %v982_v38, %v4469_v33  ;;  %v984_v50 = vpop.f32.mrb[146].mxu1 }
 0x263   :  { %2295 = vmatmul.mubr.bf16.gmra.mrb[76].mxu0 %v4520_v44  ;;  %v1261_v34 = vmax.f32 %v981_v25, 0.0  ;;  %v985_v63 = vadd.f32 %v984_v50, %v4467_v53  ;;  %v986_v47 = vpop.f32.mrb[147].mxu1 }
 0x264   :  { %2304 = vmatprep.mubr.bf16.mxu0 %v4534_v9  ;;  %v1262_v43 = vmax.f32 %v983_v48, 0.0  ;;  %v987_v55 = vadd.f32 %v986_v47, %v4469_v33 }
 0x265   :  { %v1265_v32 = vmax.f32 %v985_v63, 0.0 }
 0x266   :  { %v1266_v21 = vmax.f32 %v987_v55, 0.0 }
 0x267   :  { %v4699_v24 = vpack.c.bf16 %v1265_v32, %v1261_v34 }
 0x268   :  { %v4702_v58 = vpack.c.bf16 %v1266_v21, %v1262_v43  ;;  %v990_v44 = vpop.f32.mrb[148].mxu1 }
 0x269   :  { %v991_v42 = vadd.f32 %v990_v44, %v4467_v53  ;;  %v992_v31 = vpop.f32.mrb[149].mxu1 }
 0x26a   :  { %v993_v28 = vadd.f32 %v992_v31, %v4469_v33  ;;  %v994_v9 = vpop.f32.mrb[150].mxu1 }
 0x26b   :  { %2305 = vmatmul.mubr.bf16.gmra.mrb[80].mxu0 %v4531_v29  ;;  %v1269_v52 = vmax.f32 %v991_v42, 0.0  ;;  %v995_v59 = vadd.f32 %v994_v9, %v4467_v53  ;;  %v996_v57 = vpop.f32.mrb[151].mxu1 }
 0x26c   :  { %2314 = vmatprep.mubr.bf16.mxu0 %v4544_v35  ;;  %v1270_v56 = vmax.f32 %v993_v28, 0.0  ;;  %v997_v37 = vadd.f32 %v996_v57, %v4469_v33 }
 0x26d   :  { %v1273_v40 = vmax.f32 %v995_v59, 0.0 }
 0x26e   :  { %v1274_v27 = vmax.f32 %v997_v37, 0.0 }
 0x26f   :  { %v4710_v22 = vpack.c.bf16 %v1273_v40, %v1269_v52 }
 0x270   :  { %v4712_v25 = vpack.c.bf16 %v1274_v27, %v1270_v56  ;;  %v1000_v38 = vpop.f32.mrb[152].mxu1 }
 0x271   :  { %v1001_v48 = vadd.f32 %v1000_v38, %v4467_v53  ;;  %v1002_v50 = vpop.f32.mrb[153].mxu1 }
 0x272   :  { %v1003_v29 = vadd.f32 %v1002_v50, %v4469_v33  ;;  %v1004_v34 = vpop.f32.mrb[154].mxu1 }
 0x273   :  { %2315 = vmatmul.mubr.bf16.gmra.mrb[84].mxu0 %v4542_v17  ;;  %v1277_v63 = vmax.f32 %v1001_v48, 0.0  ;;  %v1005_v35 = vadd.f32 %v1004_v34, %v4467_v53  ;;  %v1006_v47 = vpop.f32.mrb[155].mxu1 }
 0x274   :  { %2324 = vmatprep.mubr.bf16.mxu0 %v4555_v61  ;;  %v1278_v43 = vmax.f32 %v1003_v29, 0.0  ;;  %v1007_v55 = vadd.f32 %v1006_v47, %v4469_v33 }
 0x275   :  { %v1281_v32 = vmax.f32 %v1005_v35, 0.0 }
 0x276   :  { %v1282_v21 = vmax.f32 %v1007_v55, 0.0 }
 0x277   :  { %v4720_v44 = vpack.c.bf16 %v1281_v32, %v1277_v63 }
 0x278   :  { %v4723_v42 = vpack.c.bf16 %v1282_v21, %v1278_v43  ;;  %v1010_v17 = vpop.f32.mrb[156].mxu1 }
 0x279   :  { %v1011_v31 = vadd.f32 %v1010_v17, %v4467_v53  ;;  %v1012_v28 = vpop.f32.mrb[157].mxu1 }
 0x27a   :  { %v1013_v9 = vadd.f32 %v1012_v28, %v4469_v33  ;;  %v1014_v61 = vpop.f32.mrb[158].mxu1 }
 0x27b   :  { %2325 = vmatmul.mubr.bf16.gmra.mrb[88].mxu0 %v4552_v14  ;;  %v1285_v52 = vmax.f32 %v1011_v31, 0.0  ;;  %v1015_v59 = vadd.f32 %v1014_v61, %v4467_v53  ;;  %v1016_v57 = vpop.f32.mrb[159].mxu1 }
 0x27c   :  { %2334 = vmatprep.mubr.bf16.mxu0 %v4565_v10  ;;  %v1286_v56 = vmax.f32 %v1013_v9, 0.0  ;;  %v1017_v37 = vadd.f32 %v1016_v57, %v4469_v33 }
 0x27d   :  { %v1289_v40 = vmax.f32 %v1015_v59, 0.0 }
 0x27e   :  { %v1290_v27 = vmax.f32 %v1017_v37, 0.0 }
 0x27f   :  { %v4731_v38 = vpack.c.bf16 %v1289_v40, %v1285_v52 }
 0x280   :  { %v4733_v48 = vpack.c.bf16 %v1290_v27, %v1286_v56  ;;  %v1020_v50 = vpop.f32.mrb[160].mxu1 }
 0x281   :  { %v1021_v29 = vadd.f32 %v1020_v50, %v4467_v53  ;;  %v1022_v34 = vpop.f32.mrb[161].mxu1 }
 0x282   :  { %v1023_v14 = vadd.f32 %v1022_v34, %v4469_v33  ;;  %v1024_v63 = vpop.f32.mrb[162].mxu1 }
 0x283   :  { %2335 = vmatmul.mubr.bf16.gmra.mrb[92].mxu0 %v4563_v41  ;;  %v1293_v35 = vmax.f32 %v1021_v29, 0.0  ;;  %v1025_v10 = vadd.f32 %v1024_v63, %v4467_v53  ;;  %v1026_v47 = vpop.f32.mrb[163].mxu1 }
 0x284   :  { %2344 = vmatprep.mubr.bf16.mxu0 %v4576_v6  ;;  %v1294_v43 = vmax.f32 %v1023_v14, 0.0  ;;  %v1027_v55 = vadd.f32 %v1026_v47, %v4469_v33 }
 0x285   :  { %v1297_v32 = vmax.f32 %v1025_v10, 0.0 }
 0x286   :  { %v1298_v21 = vmax.f32 %v1027_v55, 0.0  ;;  %v3840_v55 = vld [vmem:[#allocation8 + $0x78] sm:$0xff]  }
 0x287   :  { %v4741_v17 = vpack.c.bf16 %v1297_v32, %v1293_v35  ;;  %2943 = vmatpush1.bf16.msra.mxu1 %v3840_v55 }
 0x288   :  { %v4744_v31 = vpack.c.bf16 %v1298_v21, %v1294_v43  ;;  %v1030_v41 = vpop.f32.mrb[164].mxu1 }
 0x289   :  { %v1031_v28 = vadd.f32 %v1030_v41, %v4467_v53  ;;  %v1032_v9 = vpop.f32.mrb[165].mxu1 }
 0x28a   :  { %v1033_v61 = vadd.f32 %v1032_v9, %v4469_v33  ;;  %v1034_v6 = vpop.f32.mrb[166].mxu1 }
 0x28b   :  { %2345 = vmatmul.mubr.bf16.gmra.mrb[96].mxu0 %v4573_v3  ;;  %v1301_v52 = vmax.f32 %v1031_v28, 0.0  ;;  %v1035_v59 = vadd.f32 %v1034_v6, %v4467_v53  ;;  %v1036_v57 = vpop.f32.mrb[167].mxu1 }
 0x28c   :  { %2354 = vmatprep.mubr.bf16.mxu0 %v4586_v7  ;;  %v1302_v56 = vmax.f32 %v1033_v61, 0.0  ;;  %v1037_v0 = vadd.f32 %v1036_v57, %v4469_v33 }
 0x28d   :  { %v1305_v37 = vmax.f32 %v1035_v59, 0.0 }
 0x28e   :  { %v1306_v40 = vmax.f32 %v1037_v0, 0.0 }
 0x28f   :  { %v4752_v27 = vpack.c.bf16 %v1305_v37, %v1301_v52 }
 0x290   :  { %v4754_v50 = vpack.c.bf16 %v1306_v40, %v1302_v56  ;;  %v1040_v29 = vpop.f32.mrb[168].mxu1 }
 0x291   :  { %v1041_v34 = vadd.f32 %v1040_v29, %v4467_v53  ;;  %v1042_v14 = vpop.f32.mrb[169].mxu1 }
 0x292   :  { %v1043_v3 = vadd.f32 %v1042_v14, %v4469_v33  ;;  %v1044_v63 = vpop.f32.mrb[170].mxu1 }
 0x293   :  { %2355 = vmatmul.mubr.bf16.gmra.mrb[100].mxu0 %v4584_v19  ;;  %v1309_v35 = vmax.f32 %v1041_v34, 0.0  ;;  %v1045_v7 = vadd.f32 %v1044_v63, %v4467_v53  ;;  %v1046_v10 = vpop.f32.mrb[171].mxu1 }
 0x294   :  { %2364 = vmatprep.mubr.bf16.mxu0 %v4597_v16  ;;  %v1310_v47 = vmax.f32 %v1043_v3, 0.0  ;;  %v1047_v43 = vadd.f32 %v1046_v10, %v4469_v33 }
 0x295   :  { %v1313_v51 = vmax.f32 %v1045_v7, 0.0 }
 0x296   :  { %v1314_v32 = vmax.f32 %v1047_v43, 0.0 }
 0x297   :  { %v4762_v21 = vpack.c.bf16 %v1313_v51, %v1309_v35 }
 0x298   :  { %v4764_v41 = vpack.c.bf16 %v1314_v32, %v1310_v47  ;;  %v1050_v28 = vpop.f32.mrb[172].mxu1 }
 0x299   :  { %v1051_v19 = vadd.f32 %v1050_v28, %v4467_v53  ;;  %v1052_v9 = vpop.f32.mrb[173].mxu1 }
 0x29a   :  { %v1053_v61 = vadd.f32 %v1052_v9, %v4469_v33  ;;  %v1054_v6 = vpop.f32.mrb[174].mxu1 }
 0x29b   :  { %2365 = vmatmul.mubr.bf16.gmra.mrb[104].mxu0 %v4594_v62  ;;  %v1317_v16 = vmax.f32 %v1051_v19, 0.0  ;;  %v1055_v52 = vadd.f32 %v1054_v6, %v4467_v53  ;;  %v1056_v59 = vpop.f32.mrb[175].mxu1 }
 0x29c   :  { %2374 = vmatprep.mubr.bf16.mxu0 %v4607_v1  ;;  %v1318_v57 = vmax.f32 %v1053_v61, 0.0  ;;  %v1057_v56 = vadd.f32 %v1056_v59, %v4469_v33 }
 0x29d   :  { %v1321_v0 = vmax.f32 %v1055_v52, 0.0 }
 0x29e   :  { %v1322_v37 = vmax.f32 %v1057_v56, 0.0 }
 0x29f   :  { %v4772_v40 = vpack.c.bf16 %v1321_v0, %v1317_v16 }
 0x2a0   :  { %v4774_v29 = vpack.c.bf16 %v1322_v37, %v1318_v57  ;;  %v1060_v34 = vpop.f32.mrb[176].mxu1 }
 0x2a1   :  { %v1061_v14 = vadd.f32 %v1060_v34, %v4467_v53  ;;  %v1062_v3 = vpop.f32.mrb[177].mxu1 }
 0x2a2   :  { %v1063_v62 = vadd.f32 %v1062_v3, %v4469_v33  ;;  %v1064_v63 = vpop.f32.mrb[178].mxu1 }
 0x2a3   :  { %2375 = vmatmul.mubr.bf16.gmra.mrb[108].mxu0 %v4605_v26  ;;  %v1325_v35 = vmax.f32 %v1061_v14, 0.0  ;;  %v1065_v1 = vadd.f32 %v1064_v63, %v4467_v53  ;;  %v1066_v7 = vpop.f32.mrb[179].mxu1 }
 0x2a4   :  { %2384 = vmatprep.mubr.bf16.mxu0 %v4618_v39  ;;  %v1326_v10 = vmax.f32 %v1063_v62, 0.0  ;;  %v1067_v47 = vadd.f32 %v1066_v7, %v4469_v33 }
 0x2a5   :  { %v1329_v43 = vmax.f32 %v1065_v1, 0.0 }
 0x2a6   :  { %v1330_v55 = vmax.f32 %v1067_v47, 0.0 }
 0x2a7   :  { %v4782_v51 = vpack.c.bf16 %v1329_v43, %v1325_v35 }
 0x2a8   :  { %v4784_v32 = vpack.c.bf16 %v1330_v55, %v1326_v10  ;;  %v1070_v28 = vpop.f32.mrb[180].mxu1 }
 0x2a9   :  { %v1071_v19 = vadd.f32 %v1070_v28, %v4467_v53  ;;  %v1072_v9 = vpop.f32.mrb[181].mxu1 }
 0x2aa   :  { %v1073_v26 = vadd.f32 %v1072_v9, %v4469_v33  ;;  %v1074_v61 = vpop.f32.mrb[182].mxu1 }
 0x2ab   :  { %2385 = vmatmul.mubr.bf16.gmra.mrb[112].mxu0 %v4615_v11  ;;  %v1333_v6 = vmax.f32 %v1071_v19, 0.0  ;;  %v1075_v39 = vadd.f32 %v1074_v61, %v4467_v53  ;;  %v1076_v16 = vpop.f32.mrb[183].mxu1 }
 0x2ac   :  { %2394 = vmatprep.mubr.bf16.mxu0 %v4628_v23  ;;  %v1334_v52 = vmax.f32 %v1073_v26, 0.0  ;;  %v1077_v59 = vadd.f32 %v1076_v16, %v4469_v33 }
 0x2ad   :  { %v1337_v57 = vmax.f32 %v1075_v39, 0.0 }
 0x2ae   :  { %v1338_v56 = vmax.f32 %v1077_v59, 0.0 }
 0x2af   :  { %v4792_v0 = vpack.c.bf16 %v1337_v57, %v1333_v6 }
 0x2b0   :  { %v4794_v37 = vpack.c.bf16 %v1338_v56, %v1334_v52  ;;  %v1080_v34 = vpop.f32.mrb[184].mxu1 }
 0x2b1   :  { %v1081_v14 = vadd.f32 %v1080_v34, %v4467_v53  ;;  %v1082_v3 = vpop.f32.mrb[185].mxu1 }
 0x2b2   :  { %v1083_v11 = vadd.f32 %v1082_v3, %v4469_v33  ;;  %v1084_v62 = vpop.f32.mrb[186].mxu1 }
 0x2b3   :  { %2395 = vmatmul.mubr.bf16.gmra.mrb[116].mxu0 %v4626_v46  ;;  %v1341_v63 = vmax.f32 %v1081_v14, 0.0  ;;  %v1085_v23 = vadd.f32 %v1084_v62, %v4467_v53  ;;  %v1086_v35 = vpop.f32.mrb[187].mxu1 }
 0x2b4   :  { %2404 = vmatprep.mubr.bf16.mxu0 %v4639_v5  ;;  %v1342_v1 = vmax.f32 %v1083_v11, 0.0  ;;  %v1087_v7 = vadd.f32 %v1086_v35, %v4469_v33 }
 0x2b5   :  { %v1345_v10 = vmax.f32 %v1085_v23, 0.0 }
 0x2b6   :  { %v1346_v47 = vmax.f32 %v1087_v7, 0.0 }
 0x2b7   :  { %v4802_v43 = vpack.c.bf16 %v1345_v10, %v1341_v63 }
 0x2b8   :  { %v4804_v55 = vpack.c.bf16 %v1346_v47, %v1342_v1  ;;  %v1090_v28 = vpop.f32.mrb[188].mxu1 }
 0x2b9   :  { %v1091_v19 = vadd.f32 %v1090_v28, %v4467_v53  ;;  %v1092_v9 = vpop.f32.mrb[189].mxu1 }
 0x2ba   :  { %v1093_v46 = vadd.f32 %v1092_v9, %v4469_v33  ;;  %v1094_v26 = vpop.f32.mrb[190].mxu1 }
 0x2bb   :  { %2405 = vmatmul.mubr.bf16.gmra.mrb[120].mxu0 %v4636_v54  ;;  %v1349_v61 = vmax.f32 %v1091_v19, 0.0  ;;  %v1095_v5 = vadd.f32 %v1094_v26, %v4467_v53  ;;  %v1096_v6 = vpop.f32.mrb[191].mxu1  ;;  %v1547_v53 = vld [vmem:[%s5076_s4] sm:$0x3] }
 0x2bc   :  { %2414 = vmatprep.mubr.bf16.mxu0 %v4649_v45  ;;  %v1350_v39 = vmax.f32 %v1093_v46, 0.0  ;;  %v1097_v16 = vadd.f32 %v1096_v6, %v4469_v33  ;;  %v4844_v33 = vrot.slane %v1547_v53, %v215_v49  ;;  %v4848_v54 = vrot.slane %v1547_v53, %v219_v12 }
 0x2bd   :  { %v1353_v52 = vmax.f32 %v1095_v5, 0.0 }
 0x2be   :  { %v1354_v59 = vmax.f32 %v1097_v16, 0.0 }
 0x2bf   :  { %v4812_v57 = vpack.c.bf16 %v1353_v52, %v1349_v61 }
 0x2c0   :  { %v4814_v56 = vpack.c.bf16 %v1354_v59, %v1350_v39 }
 0x2c3   :  { %2415 = vmatmul.mubr.bf16.gmra.mrb[124].mxu0 %v4647_v15 }
 0x2c4   :  { %2424 = vmatprep.mubr.bf16.mxu0 %v4660_v8 }
 0x2cb   :  { %2425 = vmatmul.mubr.bf16.gmra.mrb[128].mxu0 %v4657_v13 }
 0x2cc   :  { %2434 = vmatprep.mubr.bf16.mxu0 %v4670_v20 }
 0x2d3   :  { %2435 = vmatmul.mubr.bf16.gmra.mrb[132].mxu0 %v4668_v2 }
 0x2d4   :  { %2444 = vmatprep.mubr.bf16.mxu0 %v4681_v18 }
 0x2db   :  { %2445 = vmatmul.mubr.bf16.gmra.mrb[136].mxu0 %v4678_v4 }
 0x2dc   :  { %2454 = vmatprep.mubr.bf16.mxu0 %v4691_v30 }
 0x2e3   :  { %2455 = vmatmul.mubr.bf16.gmra.mrb[140].mxu0 %v4689_v60 }
 0x2e4   :  { %2464 = vmatprep.mubr.bf16.mxu0 %v4702_v58 }
 0x2eb   :  { %2465 = vmatmul.mubr.bf16.gmra.mrb[144].mxu0 %v4699_v24 }
 0x2ec   :  { %2474 = vmatprep.mubr.bf16.mxu0 %v4712_v25 }
 0x2f3   :  { %2475 = vmatmul.mubr.bf16.gmra.mrb[148].mxu0 %v4710_v22 }
 0x2f4   :  { %2484 = vmatprep.mubr.bf16.mxu0 %v4723_v42 }
 0x2fb   :  { %2485 = vmatmul.mubr.bf16.gmra.mrb[152].mxu0 %v4720_v44 }
 0x2fc   :  { %2494 = vmatprep.mubr.bf16.mxu0 %v4733_v48 }
 0x303   :  { %2495 = vmatmul.mubr.bf16.gmra.mrb[156].mxu0 %v4731_v38 }
 0x304   :  { %2504 = vmatprep.mubr.bf16.mxu0 %v4744_v31 }
 0x30b   :  { %2505 = vmatmul.mubr.bf16.gmra.mrb[160].mxu0 %v4741_v17 }
 0x30c   :  { %2514 = vmatprep.mubr.bf16.mxu0 %v4754_v50 }
 0x313   :  { %2515 = vmatmul.mubr.bf16.gmra.mrb[164].mxu0 %v4752_v27 }
 0x314   :  { %2524 = vmatprep.mubr.bf16.mxu0 %v4764_v41 }
 0x31b   :  { %2525 = vmatmul.mubr.bf16.gmra.mrb[168].mxu0 %v4762_v21 }
 0x31c   :  { %2534 = vmatprep.mubr.bf16.mxu0 %v4774_v29 }
 0x31e   :  { %v2266_v15 = vpop.f32.mrb[64].mxu0 }
 0x31f   :  { %v3413_v45 = vadd.f32 %v2266_v15, %v4844_v33  ;;  %v2268_v13 = vpop.f32.mrb[65].mxu0 }
 0x320   :  { %v3414_v8 = vadd.f32 %v2268_v13, %v4848_v54  ;;  %v2270_v2 = vpop.f32.mrb[66].mxu0 }
 0x321   :  { %v3415_v20 = vadd.f32 %v2270_v2, %v4844_v33  ;;  %v2272_v4 = vpop.f32.mrb[67].mxu0  ;;  %v2585_v49 = vmax.f32 %v3413_v45, 0.0 }
 0x322   :  { %v3416_v18 = vadd.f32 %v2272_v4, %v4848_v54  ;;  %v2586_v36 = vmax.f32 %v3414_v8, 0.0 }
 0x323   :  { %v2587_v60 = vmax.f32 %v3415_v20, 0.0  ;;  %2535 = vmatmul.mubr.bf16.gmra.mrb[172].mxu0 %v4772_v40 }
 0x324   :  { %v2588_v12 = vmax.f32 %v3416_v18, 0.0  ;;  %2544 = vmatprep.mubr.bf16.mxu0 %v4784_v32 }
 0x325   :  { %v2713_v30 = vpack.c.bf16 %v2587_v60, %v2585_v49 }
 0x326   :  { %v2714_v24 = vpack.c.bf16 %v2588_v12, %v2586_v36  ;;  %v2276_v58 = vpop.f32.mrb[68].mxu0 }
 0x327   :  { %v3417_v22 = vadd.f32 %v2276_v58, %v4844_v33  ;;  %v2278_v25 = vpop.f32.mrb[69].mxu0 }
 0x328   :  { %v3418_v44 = vadd.f32 %v2278_v25, %v4848_v54  ;;  %v2280_v42 = vpop.f32.mrb[70].mxu0  ;;  %2944 = vmatprep.mubr.bf16.mxu1 %v2714_v24 }
 0x329   :  { %v3419_v38 = vadd.f32 %v2280_v42, %v4844_v33  ;;  %v2282_v48 = vpop.f32.mrb[71].mxu0  ;;  %2945 = vmatmul.mubr.bf16.vlgmr.msra.gmra.mrb[192].mxu1 %v2713_v30  ;;  %v2589_v31 = vmax.f32 %v3417_v22, 0.0 }
 0x32a   :  { %v3420_v17 = vadd.f32 %v2282_v48, %v4848_v54  ;;  %v2590_v50 = vmax.f32 %v3418_v44, 0.0 }
 0x32b   :  { %v2591_v27 = vmax.f32 %v3419_v38, 0.0  ;;  %2545 = vmatmul.mubr.bf16.gmra.mrb[176].mxu0 %v4782_v51 }
 0x32c   :  { %v2592_v21 = vmax.f32 %v3420_v17, 0.0  ;;  %2554 = vmatprep.mubr.bf16.mxu0 %v4794_v37 }
 0x32d   :  { %v2715_v41 = vpack.c.bf16 %v2591_v27, %v2589_v31 }
 0x32e   :  { %v2716_v40 = vpack.c.bf16 %v2592_v21, %v2590_v50  ;;  %v2286_v29 = vpop.f32.mrb[72].mxu0 }
 0x32f   :  { %v3421_v32 = vadd.f32 %v2286_v29, %v4844_v33  ;;  %v2288_v34 = vpop.f32.mrb[73].mxu0 }
 0x330   :  { %v3422_v14 = vadd.f32 %v2288_v34, %v4848_v54  ;;  %v2290_v3 = vpop.f32.mrb[74].mxu0  ;;  %2952 = vmatprep.mubr.bf16.mxu1 %v2716_v40 }
 0x331   :  { %v3423_v11 = vadd.f32 %v2290_v3, %v4844_v33  ;;  %v2292_v62 = vpop.f32.mrb[75].mxu0  ;;  %2953 = vmatmul.mubr.bf16.gmra.mrb[196].mxu1 %v2715_v41  ;;  %v2593_v63 = vmax.f32 %v3421_v32, 0.0 }
 0x332   :  { %v3424_v51 = vadd.f32 %v2292_v62, %v4848_v54  ;;  %v2594_v37 = vmax.f32 %v3422_v14, 0.0 }
 0x333   :  { %v2595_v23 = vmax.f32 %v3423_v11, 0.0  ;;  %2555 = vmatmul.mubr.bf16.gmra.mrb[180].mxu0 %v4792_v0 }
 0x334   :  { %v2596_v35 = vmax.f32 %v3424_v51, 0.0  ;;  %2564 = vmatprep.mubr.bf16.mxu0 %v4804_v55 }
 0x335   :  { %v2717_v1 = vpack.c.bf16 %v2595_v23, %v2593_v63 }
 0x336   :  { %v2718_v7 = vpack.c.bf16 %v2596_v35, %v2594_v37  ;;  %v2296_v10 = vpop.f32.mrb[76].mxu0 }
 0x337   :  { %v3425_v47 = vadd.f32 %v2296_v10, %v4844_v33  ;;  %v2298_v28 = vpop.f32.mrb[77].mxu0 }
 0x338   :  { %v3426_v19 = vadd.f32 %v2298_v28, %v4848_v54  ;;  %v2300_v9 = vpop.f32.mrb[78].mxu0  ;;  %2960 = vmatprep.mubr.bf16.mxu1 %v2718_v7 }
 0x339   :  { %v3427_v46 = vadd.f32 %v2300_v9, %v4844_v33  ;;  %v2302_v26 = vpop.f32.mrb[79].mxu0  ;;  %2961 = vmatmul.mubr.bf16.gmra.mrb[200].mxu1 %v2717_v1  ;;  %v2597_v61 = vmax.f32 %v3425_v47, 0.0 }
 0x33a   :  { %v3428_v0 = vadd.f32 %v2302_v26, %v4848_v54  ;;  %v2598_v55 = vmax.f32 %v3426_v19, 0.0 }
 0x33b   :  { %v2599_v5 = vmax.f32 %v3427_v46, 0.0  ;;  %2565 = vmatmul.mubr.bf16.gmra.mrb[184].mxu0 %v4802_v43 }
 0x33c   :  { %v2600_v6 = vmax.f32 %v3428_v0, 0.0  ;;  %2574 = vmatprep.mubr.bf16.mxu0 %v4814_v56 }
 0x33d   :  { %v2719_v39 = vpack.c.bf16 %v2599_v5, %v2597_v61 }
 0x33e   :  { %v2720_v16 = vpack.c.bf16 %v2600_v6, %v2598_v55  ;;  %v2306_v52 = vpop.f32.mrb[80].mxu0 }
 0x33f   :  { %v3429_v59 = vadd.f32 %v2306_v52, %v4844_v33  ;;  %v2308_v53 = vpop.f32.mrb[81].mxu0 }
 0x340   :  { %v3430_v15 = vadd.f32 %v2308_v53, %v4848_v54  ;;  %v2310_v45 = vpop.f32.mrb[82].mxu0  ;;  %2968 = vmatprep.mubr.bf16.mxu1 %v2720_v16 }
 0x341   :  { %v3431_v13 = vadd.f32 %v2310_v45, %v4844_v33  ;;  %v2312_v8 = vpop.f32.mrb[83].mxu0  ;;  %2969 = vmatmul.mubr.bf16.gmra.mrb[204].mxu1 %v2719_v39  ;;  %v2601_v2 = vmax.f32 %v3429_v59, 0.0 }
 0x342   :  { %v3432_v43 = vadd.f32 %v2312_v8, %v4848_v54  ;;  %v2602_v56 = vmax.f32 %v3430_v15, 0.0 }
 0x343   :  { %v2603_v20 = vmax.f32 %v3431_v13, 0.0  ;;  %2575 = vmatmul.mubr.bf16.gmra.mrb[188].mxu0 %v4812_v57 }
 0x344   :  { %v2604_v4 = vmax.f32 %v3432_v43, 0.0 }
 0x345   :  { %v2721_v18 = vpack.c.bf16 %v2603_v20, %v2601_v2 }
 0x346   :  { %v2722_v49 = vpack.c.bf16 %v2604_v4, %v2602_v56  ;;  %v2316_v60 = vpop.f32.mrb[84].mxu0 }
 0x347   :  { %v3433_v36 = vadd.f32 %v2316_v60, %v4844_v33  ;;  %v2318_v12 = vpop.f32.mrb[85].mxu0 }
 0x348   :  { %v3434_v30 = vadd.f32 %v2318_v12, %v4848_v54  ;;  %v2320_v24 = vpop.f32.mrb[86].mxu0  ;;  %2976 = vmatprep.mubr.bf16.mxu1 %v2722_v49 }
 0x349   :  { %v3435_v58 = vadd.f32 %v2320_v24, %v4844_v33  ;;  %v2322_v22 = vpop.f32.mrb[87].mxu0  ;;  %2977 = vmatmul.mubr.bf16.gmra.mrb[208].mxu1 %v2721_v18  ;;  %v2605_v44 = vmax.f32 %v3433_v36, 0.0 }
 0x34a   :  { %v3436_v25 = vadd.f32 %v2322_v22, %v4848_v54  ;;  %v2606_v42 = vmax.f32 %v3434_v30, 0.0 }
 0x34b   :  { %v2607_v57 = vmax.f32 %v3435_v58, 0.0 }
 0x34c   :  { %v2608_v38 = vmax.f32 %v3436_v25, 0.0 }
 0x34d   :  { %v2723_v48 = vpack.c.bf16 %v2607_v57, %v2605_v44 }
 0x34e   :  { %v2724_v17 = vpack.c.bf16 %v2608_v38, %v2606_v42  ;;  %v2326_v31 = vpop.f32.mrb[88].mxu0 }
 0x34f   :  { %v3437_v27 = vadd.f32 %v2326_v31, %v4844_v33  ;;  %v2328_v50 = vpop.f32.mrb[89].mxu0 }
 0x350   :  { %v3438_v21 = vadd.f32 %v2328_v50, %v4848_v54  ;;  %v2330_v41 = vpop.f32.mrb[90].mxu0  ;;  %2984 = vmatprep.mubr.bf16.mxu1 %v2724_v17 }
 0x351   :  { %v3439_v40 = vadd.f32 %v2330_v41, %v4844_v33  ;;  %v2332_v29 = vpop.f32.mrb[91].mxu0  ;;  %2985 = vmatmul.mubr.bf16.gmra.mrb[212].mxu1 %v2723_v48  ;;  %v2609_v34 = vmax.f32 %v3437_v27, 0.0 }
 0x352   :  { %v3440_v32 = vadd.f32 %v2332_v29, %v4848_v54  ;;  %v2610_v3 = vmax.f32 %v3438_v21, 0.0 }
 0x353   :  { %v2611_v14 = vmax.f32 %v3439_v40, 0.0 }
 0x354   :  { %v2612_v11 = vmax.f32 %v3440_v32, 0.0 }
 0x355   :  { %v2725_v62 = vpack.c.bf16 %v2611_v14, %v2609_v34 }
 0x356   :  { %v2726_v51 = vpack.c.bf16 %v2612_v11, %v2610_v3  ;;  %v2336_v63 = vpop.f32.mrb[92].mxu0 }
 0x357   :  { %v3441_v23 = vadd.f32 %v2336_v63, %v4844_v33  ;;  %v2338_v37 = vpop.f32.mrb[93].mxu0 }
 0x358   :  { %v3442_v35 = vadd.f32 %v2338_v37, %v4848_v54  ;;  %v2340_v1 = vpop.f32.mrb[94].mxu0  ;;  %2992 = vmatprep.mubr.bf16.mxu1 %v2726_v51 }
 0x359   :  { %v3443_v7 = vadd.f32 %v2340_v1, %v4844_v33  ;;  %v2342_v10 = vpop.f32.mrb[95].mxu0  ;;  %2993 = vmatmul.mubr.bf16.gmra.mrb[216].mxu1 %v2725_v62  ;;  %v2613_v28 = vmax.f32 %v3441_v23, 0.0 }
 0x35a   :  { %v3444_v47 = vadd.f32 %v2342_v10, %v4848_v54  ;;  %v2614_v9 = vmax.f32 %v3442_v35, 0.0 }
 0x35b   :  { %v2615_v19 = vmax.f32 %v3443_v7, 0.0 }
 0x35c   :  { %v2616_v46 = vmax.f32 %v3444_v47, 0.0 }
 0x35d   :  { %v2727_v26 = vpack.c.bf16 %v2615_v19, %v2613_v28 }
 0x35e   :  { %v2728_v0 = vpack.c.bf16 %v2616_v46, %v2614_v9  ;;  %v2346_v61 = vpop.f32.mrb[96].mxu0 }
 0x35f   :  { %v3445_v5 = vadd.f32 %v2346_v61, %v4844_v33  ;;  %v2348_v55 = vpop.f32.mrb[97].mxu0 }
 0x360   :  { %v3446_v6 = vadd.f32 %v2348_v55, %v4848_v54  ;;  %v2350_v39 = vpop.f32.mrb[98].mxu0  ;;  %3000 = vmatprep.mubr.bf16.mxu1 %v2728_v0 }
 0x361   :  { %v3447_v16 = vadd.f32 %v2350_v39, %v4844_v33  ;;  %v2352_v52 = vpop.f32.mrb[99].mxu0  ;;  %3001 = vmatmul.mubr.bf16.gmra.mrb[220].mxu1 %v2727_v26  ;;  %v2617_v53 = vmax.f32 %v3445_v5, 0.0 }
 0x362   :  { %v3448_v59 = vadd.f32 %v2352_v52, %v4848_v54  ;;  %v2618_v45 = vmax.f32 %v3446_v6, 0.0 }
 0x363   :  { %v2619_v15 = vmax.f32 %v3447_v16, 0.0 }
 0x364   :  { %v2620_v13 = vmax.f32 %v3448_v59, 0.0 }
 0x365   :  { %v2729_v8 = vpack.c.bf16 %v2619_v15, %v2617_v53 }
 0x366   :  { %v2730_v43 = vpack.c.bf16 %v2620_v13, %v2618_v45  ;;  %v2356_v2 = vpop.f32.mrb[100].mxu0 }
 0x367   :  { %v3449_v20 = vadd.f32 %v2356_v2, %v4844_v33  ;;  %v2358_v56 = vpop.f32.mrb[101].mxu0 }
 0x368   :  { %v3450_v4 = vadd.f32 %v2358_v56, %v4848_v54  ;;  %v2360_v18 = vpop.f32.mrb[102].mxu0  ;;  %3008 = vmatprep.mubr.bf16.mxu1 %v2730_v43 }
 0x369   :  { %v3451_v49 = vadd.f32 %v2360_v18, %v4844_v33  ;;  %v2362_v60 = vpop.f32.mrb[103].mxu0  ;;  %3009 = vmatmul.mubr.bf16.gmra.mrb[224].mxu1 %v2729_v8  ;;  %v2621_v12 = vmax.f32 %v3449_v20, 0.0 }
 0x36a   :  { %v3452_v36 = vadd.f32 %v2362_v60, %v4848_v54  ;;  %v2622_v24 = vmax.f32 %v3450_v4, 0.0 }
 0x36b   :  { %v2623_v30 = vmax.f32 %v3451_v49, 0.0 }
 0x36c   :  { %v2624_v58 = vmax.f32 %v3452_v36, 0.0 }
 0x36d   :  { %v2731_v22 = vpack.c.bf16 %v2623_v30, %v2621_v12 }
 0x36e   :  { %v2732_v25 = vpack.c.bf16 %v2624_v58, %v2622_v24  ;;  %v2366_v44 = vpop.f32.mrb[104].mxu0 }
 0x36f   :  { %v3453_v57 = vadd.f32 %v2366_v44, %v4844_v33  ;;  %v2368_v42 = vpop.f32.mrb[105].mxu0 }
 0x370   :  { %v3454_v38 = vadd.f32 %v2368_v42, %v4848_v54  ;;  %v2370_v48 = vpop.f32.mrb[106].mxu0  ;;  %3016 = vmatprep.mubr.bf16.mxu1 %v2732_v25 }
 0x371   :  { %v3455_v17 = vadd.f32 %v2370_v48, %v4844_v33  ;;  %v2372_v31 = vpop.f32.mrb[107].mxu0  ;;  %3017 = vmatmul.mubr.bf16.gmra.mrb[228].mxu1 %v2731_v22  ;;  %v2625_v50 = vmax.f32 %v3453_v57, 0.0 }
 0x372   :  { %v3456_v27 = vadd.f32 %v2372_v31, %v4848_v54  ;;  %v2626_v41 = vmax.f32 %v3454_v38, 0.0 }
 0x373   :  { %v2627_v21 = vmax.f32 %v3455_v17, 0.0 }
 0x374   :  { %v2628_v40 = vmax.f32 %v3456_v27, 0.0 }
 0x375   :  { %v2733_v29 = vpack.c.bf16 %v2627_v21, %v2625_v50 }
 0x376   :  { %v2734_v32 = vpack.c.bf16 %v2628_v40, %v2626_v41  ;;  %v2376_v34 = vpop.f32.mrb[108].mxu0 }
 0x377   :  { %v3457_v14 = vadd.f32 %v2376_v34, %v4844_v33  ;;  %v2378_v3 = vpop.f32.mrb[109].mxu0 }
 0x378   :  { %v3458_v11 = vadd.f32 %v2378_v3, %v4848_v54  ;;  %v2380_v62 = vpop.f32.mrb[110].mxu0  ;;  %3024 = vmatprep.mubr.bf16.mxu1 %v2734_v32 }
 0x379   :  { %v3459_v51 = vadd.f32 %v2380_v62, %v4844_v33  ;;  %v2382_v63 = vpop.f32.mrb[111].mxu0  ;;  %3025 = vmatmul.mubr.bf16.gmra.mrb[232].mxu1 %v2733_v29  ;;  %v2629_v37 = vmax.f32 %v3457_v14, 0.0 }
 0x37a   :  { %v3460_v23 = vadd.f32 %v2382_v63, %v4848_v54  ;;  %v2630_v1 = vmax.f32 %v3458_v11, 0.0 }
 0x37b   :  { %v2631_v35 = vmax.f32 %v3459_v51, 0.0 }
 0x37c   :  { %v2632_v7 = vmax.f32 %v3460_v23, 0.0 }
 0x37d   :  { %v2735_v10 = vpack.c.bf16 %v2631_v35, %v2629_v37 }
 0x37e   :  { %v2736_v47 = vpack.c.bf16 %v2632_v7, %v2630_v1  ;;  %v2386_v28 = vpop.f32.mrb[112].mxu0 }
 0x37f   :  { %v3461_v19 = vadd.f32 %v2386_v28, %v4844_v33  ;;  %v2388_v9 = vpop.f32.mrb[113].mxu0 }
 0x380   :  { %v3462_v46 = vadd.f32 %v2388_v9, %v4848_v54  ;;  %v2390_v26 = vpop.f32.mrb[114].mxu0  ;;  %3032 = vmatprep.mubr.bf16.mxu1 %v2736_v47 }
 0x381   :  { %v3463_v0 = vadd.f32 %v2390_v26, %v4844_v33  ;;  %v2392_v61 = vpop.f32.mrb[115].mxu0  ;;  %3033 = vmatmul.mubr.bf16.gmra.mrb[236].mxu1 %v2735_v10  ;;  %v2633_v55 = vmax.f32 %v3461_v19, 0.0 }
 0x382   :  { %v3464_v5 = vadd.f32 %v2392_v61, %v4848_v54  ;;  %v2634_v39 = vmax.f32 %v3462_v46, 0.0 }
 0x383   :  { %v2635_v6 = vmax.f32 %v3463_v0, 0.0 }
 0x384   :  { %v2636_v16 = vmax.f32 %v3464_v5, 0.0 }
 0x385   :  { %v2737_v52 = vpack.c.bf16 %v2635_v6, %v2633_v55 }
 0x386   :  { %v2738_v59 = vpack.c.bf16 %v2636_v16, %v2634_v39  ;;  %v2396_v53 = vpop.f32.mrb[116].mxu0 }
 0x387   :  { %v3465_v15 = vadd.f32 %v2396_v53, %v4844_v33  ;;  %v2398_v45 = vpop.f32.mrb[117].mxu0 }
 0x388   :  { %v3466_v13 = vadd.f32 %v2398_v45, %v4848_v54  ;;  %v2400_v8 = vpop.f32.mrb[118].mxu0  ;;  %3040 = vmatprep.mubr.bf16.mxu1 %v2738_v59 }
 0x389   :  { %v3467_v43 = vadd.f32 %v2400_v8, %v4844_v33  ;;  %v2402_v2 = vpop.f32.mrb[119].mxu0  ;;  %3041 = vmatmul.mubr.bf16.gmra.mrb[240].mxu1 %v2737_v52  ;;  %v2637_v56 = vmax.f32 %v3465_v15, 0.0 }
 0x38a   :  { %v3468_v20 = vadd.f32 %v2402_v2, %v4848_v54  ;;  %v2638_v18 = vmax.f32 %v3466_v13, 0.0 }
 0x38b   :  { %v2639_v4 = vmax.f32 %v3467_v43, 0.0 }
 0x38c   :  { %v2640_v49 = vmax.f32 %v3468_v20, 0.0 }
 0x38d   :  { %v2739_v60 = vpack.c.bf16 %v2639_v4, %v2637_v56 }
 0x38e   :  { %v2740_v36 = vpack.c.bf16 %v2640_v49, %v2638_v18  ;;  %v2406_v12 = vpop.f32.mrb[120].mxu0 }
 0x38f   :  { %v3469_v30 = vadd.f32 %v2406_v12, %v4844_v33  ;;  %v2408_v24 = vpop.f32.mrb[121].mxu0 }
 0x390   :  { %v3470_v58 = vadd.f32 %v2408_v24, %v4848_v54  ;;  %v2410_v22 = vpop.f32.mrb[122].mxu0  ;;  %3048 = vmatprep.mubr.bf16.mxu1 %v2740_v36 }
 0x391   :  { %v3471_v25 = vadd.f32 %v2410_v22, %v4844_v33  ;;  %v2412_v44 = vpop.f32.mrb[123].mxu0  ;;  %3049 = vmatmul.mubr.bf16.gmra.mrb[244].mxu1 %v2739_v60  ;;  %v2641_v42 = vmax.f32 %v3469_v30, 0.0 }
 0x392   :  { %v3472_v57 = vadd.f32 %v2412_v44, %v4848_v54  ;;  %v2642_v48 = vmax.f32 %v3470_v58, 0.0 }
 0x393   :  { %v2643_v38 = vmax.f32 %v3471_v25, 0.0 }
 0x394   :  { %v2644_v17 = vmax.f32 %v3472_v57, 0.0 }
 0x395   :  { %v2741_v31 = vpack.c.bf16 %v2643_v38, %v2641_v42 }
 0x396   :  { %v2742_v27 = vpack.c.bf16 %v2644_v17, %v2642_v48  ;;  %v2416_v50 = vpop.f32.mrb[124].mxu0 }
 0x397   :  { %v3473_v21 = vadd.f32 %v2416_v50, %v4844_v33  ;;  %v2418_v41 = vpop.f32.mrb[125].mxu0 }
 0x398   :  { %v3474_v40 = vadd.f32 %v2418_v41, %v4848_v54  ;;  %v2420_v29 = vpop.f32.mrb[126].mxu0  ;;  %3056 = vmatprep.mubr.bf16.mxu1 %v2742_v27 }
 0x399   :  { %v3475_v32 = vadd.f32 %v2420_v29, %v4844_v33  ;;  %v2422_v34 = vpop.f32.mrb[127].mxu0  ;;  %3057 = vmatmul.mubr.bf16.gmra.mrb[248].mxu1 %v2741_v31  ;;  %v2645_v3 = vmax.f32 %v3473_v21, 0.0 }
 0x39a   :  { %v3476_v14 = vadd.f32 %v2422_v34, %v4848_v54  ;;  %v2646_v62 = vmax.f32 %v3474_v40, 0.0 }
 0x39b   :  { %v2647_v11 = vmax.f32 %v3475_v32, 0.0 }
 0x39c   :  { %v2648_v51 = vmax.f32 %v3476_v14, 0.0 }
 0x39d   :  { %v2743_v63 = vpack.c.bf16 %v2647_v11, %v2645_v3 }
 0x39e   :  { %v2744_v23 = vpack.c.bf16 %v2648_v51, %v2646_v62  ;;  %v2426_v37 = vpop.f32.mrb[128].mxu0 }
 0x39f   :  { %v3477_v35 = vadd.f32 %v2426_v37, %v4844_v33  ;;  %v2428_v1 = vpop.f32.mrb[129].mxu0 }
 0x3a0   :  { %v3478_v7 = vadd.f32 %v2428_v1, %v4848_v54  ;;  %v2430_v10 = vpop.f32.mrb[130].mxu0  ;;  %3064 = vmatprep.mubr.bf16.mxu1 %v2744_v23 }
 0x3a1   :  { %v3479_v47 = vadd.f32 %v2430_v10, %v4844_v33  ;;  %v2432_v28 = vpop.f32.mrb[131].mxu0  ;;  %3065 = vmatmul.mubr.bf16.gmra.mrb[252].mxu1 %v2743_v63  ;;  %v2649_v9 = vmax.f32 %v3477_v35, 0.0 }
 0x3a2   :  { %v3480_v19 = vadd.f32 %v2432_v28, %v4848_v54  ;;  %v2650_v26 = vmax.f32 %v3478_v7, 0.0 }
 0x3a3   :  { %v2651_v46 = vmax.f32 %v3479_v47, 0.0 }
 0x3a4   :  { %v2652_v0 = vmax.f32 %v3480_v19, 0.0 }
 0x3a5   :  { %v2745_v61 = vpack.c.bf16 %v2651_v46, %v2649_v9 }
 0x3a6   :  { %v2746_v5 = vpack.c.bf16 %v2652_v0, %v2650_v26  ;;  %v2436_v55 = vpop.f32.mrb[132].mxu0 }
 0x3a7   :  { %v3481_v6 = vadd.f32 %v2436_v55, %v4844_v33  ;;  %v2438_v39 = vpop.f32.mrb[133].mxu0 }
 0x3a8   :  { %v3482_v16 = vadd.f32 %v2438_v39, %v4848_v54  ;;  %v2440_v52 = vpop.f32.mrb[134].mxu0  ;;  %3072 = vmatprep.mubr.bf16.mxu1 %v2746_v5 }
 0x3a9   :  { %v3483_v59 = vadd.f32 %v2440_v52, %v4844_v33  ;;  %v2442_v53 = vpop.f32.mrb[135].mxu0  ;;  %3073 = vmatmul.mubr.bf16.gmra.mrb[0].mxu1 %v2745_v61  ;;  %v2653_v45 = vmax.f32 %v3481_v6, 0.0 }
 0x3aa   :  { %v3484_v15 = vadd.f32 %v2442_v53, %v4848_v54  ;;  %v2654_v8 = vmax.f32 %v3482_v16, 0.0 }
 0x3ab   :  { %v2655_v13 = vmax.f32 %v3483_v59, 0.0 }
 0x3ac   :  { %v2656_v43 = vmax.f32 %v3484_v15, 0.0 }
 0x3ad   :  { %v2747_v2 = vpack.c.bf16 %v2655_v13, %v2653_v45 }
 0x3ae   :  { %v2748_v20 = vpack.c.bf16 %v2656_v43, %v2654_v8  ;;  %v2446_v56 = vpop.f32.mrb[136].mxu0 }
 0x3af   :  { %v3485_v4 = vadd.f32 %v2446_v56, %v4844_v33  ;;  %v2448_v18 = vpop.f32.mrb[137].mxu0 }
 0x3b0   :  { %v3486_v49 = vadd.f32 %v2448_v18, %v4848_v54  ;;  %v2450_v60 = vpop.f32.mrb[138].mxu0  ;;  %3080 = vmatprep.mubr.bf16.mxu1 %v2748_v20 }
 0x3b1   :  { %v3487_v36 = vadd.f32 %v2450_v60, %v4844_v33  ;;  %v2452_v12 = vpop.f32.mrb[139].mxu0  ;;  %3081 = vmatmul.mubr.bf16.gmra.mrb[4].mxu1 %v2747_v2  ;;  %v2657_v24 = vmax.f32 %v3485_v4, 0.0 }
 0x3b2   :  { %v3488_v30 = vadd.f32 %v2452_v12, %v4848_v54  ;;  %v2658_v22 = vmax.f32 %v3486_v49, 0.0 }
 0x3b3   :  { %v2659_v58 = vmax.f32 %v3487_v36, 0.0 }
 0x3b4   :  { %v2660_v25 = vmax.f32 %v3488_v30, 0.0 }
 0x3b5   :  { %v2749_v44 = vpack.c.bf16 %v2659_v58, %v2657_v24 }
 0x3b6   :  { %v2750_v57 = vpack.c.bf16 %v2660_v25, %v2658_v22  ;;  %v2456_v42 = vpop.f32.mrb[140].mxu0 }
 0x3b7   :  { %v3489_v38 = vadd.f32 %v2456_v42, %v4844_v33  ;;  %v2458_v48 = vpop.f32.mrb[141].mxu0 }
 0x3b8   :  { %v3490_v17 = vadd.f32 %v2458_v48, %v4848_v54  ;;  %v2460_v31 = vpop.f32.mrb[142].mxu0  ;;  %3088 = vmatprep.mubr.bf16.mxu1 %v2750_v57 }
 0x3b9   :  { %v3491_v27 = vadd.f32 %v2460_v31, %v4844_v33  ;;  %v2462_v50 = vpop.f32.mrb[143].mxu0  ;;  %3089 = vmatmul.mubr.bf16.gmra.mrb[8].mxu1 %v2749_v44  ;;  %v2661_v41 = vmax.f32 %v3489_v38, 0.0 }
 0x3ba   :  { %v3492_v21 = vadd.f32 %v2462_v50, %v4848_v54  ;;  %v2662_v29 = vmax.f32 %v3490_v17, 0.0 }
 0x3bb   :  { %v2663_v40 = vmax.f32 %v3491_v27, 0.0 }
 0x3bc   :  { %v2664_v32 = vmax.f32 %v3492_v21, 0.0 }
 0x3bd   :  { %v2751_v34 = vpack.c.bf16 %v2663_v40, %v2661_v41 }
 0x3be   :  { %v2752_v14 = vpack.c.bf16 %v2664_v32, %v2662_v29  ;;  %v2466_v3 = vpop.f32.mrb[144].mxu0 }
 0x3bf   :  { %v3493_v11 = vadd.f32 %v2466_v3, %v4844_v33  ;;  %v2468_v62 = vpop.f32.mrb[145].mxu0 }
 0x3c0   :  { %v3494_v51 = vadd.f32 %v2468_v62, %v4848_v54  ;;  %v2470_v63 = vpop.f32.mrb[146].mxu0  ;;  %3096 = vmatprep.mubr.bf16.mxu1 %v2752_v14 }
 0x3c1   :  { %v3495_v23 = vadd.f32 %v2470_v63, %v4844_v33  ;;  %v2472_v37 = vpop.f32.mrb[147].mxu0  ;;  %3097 = vmatmul.mubr.bf16.gmra.mrb[12].mxu1 %v2751_v34  ;;  %v2665_v1 = vmax.f32 %v3493_v11, 0.0 }
 0x3c2   :  { %v3496_v35 = vadd.f32 %v2472_v37, %v4848_v54  ;;  %v2666_v10 = vmax.f32 %v3494_v51, 0.0 }
 0x3c3   :  { %v2667_v7 = vmax.f32 %v3495_v23, 0.0 }
 0x3c4   :  { %v2668_v47 = vmax.f32 %v3496_v35, 0.0 }
 0x3c5   :  { %v2753_v28 = vpack.c.bf16 %v2667_v7, %v2665_v1 }
 0x3c6   :  { %v2754_v19 = vpack.c.bf16 %v2668_v47, %v2666_v10  ;;  %v2476_v9 = vpop.f32.mrb[148].mxu0 }
 0x3c7   :  { %v3497_v46 = vadd.f32 %v2476_v9, %v4844_v33  ;;  %v2478_v26 = vpop.f32.mrb[149].mxu0 }
 0x3c8   :  { %v3498_v0 = vadd.f32 %v2478_v26, %v4848_v54  ;;  %v2480_v61 = vpop.f32.mrb[150].mxu0  ;;  %3104 = vmatprep.mubr.bf16.mxu1 %v2754_v19 }
 0x3c9   :  { %v3499_v5 = vadd.f32 %v2480_v61, %v4844_v33  ;;  %v2482_v55 = vpop.f32.mrb[151].mxu0  ;;  %3105 = vmatmul.mubr.bf16.gmra.mrb[16].mxu1 %v2753_v28  ;;  %v2669_v39 = vmax.f32 %v3497_v46, 0.0 }
 0x3ca   :  { %v3500_v6 = vadd.f32 %v2482_v55, %v4848_v54  ;;  %v2670_v52 = vmax.f32 %v3498_v0, 0.0 }
 0x3cb   :  { %v2671_v16 = vmax.f32 %v3499_v5, 0.0 }
 0x3cc   :  { %v2672_v59 = vmax.f32 %v3500_v6, 0.0 }
 0x3cd   :  { %v2755_v53 = vpack.c.bf16 %v2671_v16, %v2669_v39 }
 0x3ce   :  { %v2756_v15 = vpack.c.bf16 %v2672_v59, %v2670_v52  ;;  %v2486_v45 = vpop.f32.mrb[152].mxu0 }
 0x3cf   :  { %v3501_v13 = vadd.f32 %v2486_v45, %v4844_v33  ;;  %v2488_v8 = vpop.f32.mrb[153].mxu0 }
 0x3d0   :  { %v3502_v43 = vadd.f32 %v2488_v8, %v4848_v54  ;;  %v2490_v2 = vpop.f32.mrb[154].mxu0  ;;  %3112 = vmatprep.mubr.bf16.mxu1 %v2756_v15 }
 0x3d1   :  { %v3503_v20 = vadd.f32 %v2490_v2, %v4844_v33  ;;  %v2492_v56 = vpop.f32.mrb[155].mxu0  ;;  %3113 = vmatmul.mubr.bf16.gmra.mrb[20].mxu1 %v2755_v53  ;;  %v2673_v18 = vmax.f32 %v3501_v13, 0.0 }
 0x3d2   :  { %v3504_v4 = vadd.f32 %v2492_v56, %v4848_v54  ;;  %v2674_v60 = vmax.f32 %v3502_v43, 0.0 }
 0x3d3   :  { %v2675_v49 = vmax.f32 %v3503_v20, 0.0 }
 0x3d4   :  { %v2676_v36 = vmax.f32 %v3504_v4, 0.0 }
 0x3d5   :  { %v2757_v12 = vpack.c.bf16 %v2675_v49, %v2673_v18 }
 0x3d6   :  { %v2758_v30 = vpack.c.bf16 %v2676_v36, %v2674_v60  ;;  %v2496_v24 = vpop.f32.mrb[156].mxu0 }
 0x3d7   :  { %v3505_v58 = vadd.f32 %v2496_v24, %v4844_v33  ;;  %v2498_v22 = vpop.f32.mrb[157].mxu0 }
 0x3d8   :  { %v3506_v25 = vadd.f32 %v2498_v22, %v4848_v54  ;;  %v2500_v44 = vpop.f32.mrb[158].mxu0  ;;  %3120 = vmatprep.mubr.bf16.mxu1 %v2758_v30  ;;  %v4975_v22 = vld [vmem:[%s5078_s6] ss:$0 sm:$0xff]  ;;  %s3971_s6 = smov [#allocation10]  }
 0x3d9   :  { %v3507_v57 = vadd.f32 %v2500_v44, %v4844_v33  ;;  %v2502_v42 = vpop.f32.mrb[159].mxu0  ;;  %3121 = vmatmul.mubr.bf16.gmra.mrb[24].mxu1 %v2757_v12  ;;  %v2677_v48 = vmax.f32 %v3505_v58, 0.0  ;;  %s3270_s12 = sshll.u32 %s3971_s6, 4  ;;  %s3271_s12 = int_to_ptr.vmem [resolvable:$true] %s3270_s12 }
 0x3da   :  { %v3508_v38 = vadd.f32 %v2502_v42, %v4848_v54  ;;  %v2678_v31 = vmax.f32 %v3506_v25, 0.0  ;;  %s3930_s13 = scalar_lea.vmem %s3271_s12, 8192  ;;  %p3935_p5 = scmp.lt.s32.totalorder %s3271_s12, %s3271_s12 }
 0x3db   :  { %v2679_v17 = vmax.f32 %v3507_v57, 0.0  ;;  %p3931_p4 = scmp.ne.s32.totalorder %s3271_s12, %s3930_s13  ;;  %p3936_p6 = scmp.lt.s32.totalorder %s3930_s13, %s3930_s13 }
 0x3dc   :  { %v2680_v27 = vmax.f32 %v3508_v38, 0.0 }
 0x3dd   :  { %v2759_v50 = vpack.c.bf16 %v2679_v17, %v2677_v48  ;;  %p3937_p7 = por %p3936_p6, %p3935_p5 }
 0x3de   :  { %v2760_v21 = vpack.c.bf16 %v2680_v27, %v2678_v31  ;;  %v2506_v41 = vpop.f32.mrb[160].mxu0 }
 0x3df   :  { %v3509_v40 = vadd.f32 %v2506_v41, %v4844_v33  ;;  %v2508_v29 = vpop.f32.mrb[161].mxu0  ;;  %p3938_p8 = pnand %p3937_p7, %p3931_p4 }
 0x3e0   :  { %v3510_v32 = vadd.f32 %v2508_v29, %v4848_v54  ;;  %v2510_v34 = vpop.f32.mrb[162].mxu0  ;;  %3128 = vmatprep.mubr.bf16.mxu1 %v2760_v21 }
 0x3e1   :  { %v3511_v14 = vadd.f32 %v2510_v34, %v4844_v33  ;;  %v2512_v3 = vpop.f32.mrb[163].mxu0  ;;  %3129 = vmatmul.mubr.bf16.gmra.mrb[28].mxu1 %v2759_v50  ;;  %v2681_v62 = vmax.f32 %v3509_v40, 0.0 }
 0x3e2   :  { %v3512_v11 = vadd.f32 %v2512_v3, %v4848_v54  ;;  %v2682_v63 = vmax.f32 %v3510_v32, 0.0 }
 0x3e3   :  { %v2683_v51 = vmax.f32 %v3511_v14, 0.0 }
 0x3e4   :  { %v2684_v23 = vmax.f32 %v3512_v11, 0.0 }
 0x3e5   :  { %v2761_v37 = vpack.c.bf16 %v2683_v51, %v2681_v62 }
 0x3e6   :  { %v2762_v35 = vpack.c.bf16 %v2684_v23, %v2682_v63  ;;  %v2516_v1 = vpop.f32.mrb[164].mxu0 }
 0x3e7   :  { %v3513_v7 = vadd.f32 %v2516_v1, %v4844_v33  ;;  %v2518_v10 = vpop.f32.mrb[165].mxu0 }
 0x3e8   :  { %v3514_v47 = vadd.f32 %v2518_v10, %v4848_v54  ;;  %v2520_v28 = vpop.f32.mrb[166].mxu0  ;;  %3136 = vmatprep.mubr.bf16.mxu1 %v2762_v35 }
 0x3e9   :  { %v3515_v19 = vadd.f32 %v2520_v28, %v4844_v33  ;;  %v2522_v9 = vpop.f32.mrb[167].mxu0  ;;  %3137 = vmatmul.mubr.bf16.gmra.mrb[32].mxu1 %v2761_v37  ;;  %v2685_v26 = vmax.f32 %v3513_v7, 0.0 }
 0x3ea   :  { %v3516_v46 = vadd.f32 %v2522_v9, %v4848_v54  ;;  %v2686_v61 = vmax.f32 %v3514_v47, 0.0 }
 0x3eb   :  { %v2687_v0 = vmax.f32 %v3515_v19, 0.0 }
 0x3ec   :  { %v2688_v5 = vmax.f32 %v3516_v46, 0.0 }
 0x3ed   :  { %v2763_v55 = vpack.c.bf16 %v2687_v0, %v2685_v26 }
 0x3ee   :  { %v2764_v6 = vpack.c.bf16 %v2688_v5, %v2686_v61  ;;  %v2526_v39 = vpop.f32.mrb[168].mxu0 }
 0x3ef   :  { %v3517_v16 = vadd.f32 %v2526_v39, %v4844_v33  ;;  %v2528_v52 = vpop.f32.mrb[169].mxu0 }
 0x3f0   :  { %v3518_v59 = vadd.f32 %v2528_v52, %v4848_v54  ;;  %v2530_v53 = vpop.f32.mrb[170].mxu0  ;;  %3144 = vmatprep.mubr.bf16.mxu1 %v2764_v6 }
 0x3f1   :  { %v3519_v15 = vadd.f32 %v2530_v53, %v4844_v33  ;;  %v2532_v45 = vpop.f32.mrb[171].mxu0  ;;  %3145 = vmatmul.mubr.bf16.gmra.mrb[36].mxu1 %v2763_v55  ;;  %v2689_v8 = vmax.f32 %v3517_v16, 0.0 }
 0x3f2   :  { %v3520_v13 = vadd.f32 %v2532_v45, %v4848_v54  ;;  %v2690_v2 = vmax.f32 %v3518_v59, 0.0 }
 0x3f3   :  { %v2691_v43 = vmax.f32 %v3519_v15, 0.0 }
 0x3f4   :  { %v2692_v20 = vmax.f32 %v3520_v13, 0.0 }
 0x3f5   :  { %v2765_v56 = vpack.c.bf16 %v2691_v43, %v2689_v8 }
 0x3f6   :  { %v2766_v4 = vpack.c.bf16 %v2692_v20, %v2690_v2  ;;  %v2536_v18 = vpop.f32.mrb[172].mxu0 }
 0x3f7   :  { %v3521_v49 = vadd.f32 %v2536_v18, %v4844_v33  ;;  %v2538_v60 = vpop.f32.mrb[173].mxu0 }
 0x3f8   :  { %v3522_v36 = vadd.f32 %v2538_v60, %v4848_v54  ;;  %v2540_v12 = vpop.f32.mrb[174].mxu0  ;;  %3152 = vmatprep.mubr.bf16.mxu1 %v2766_v4 }
 0x3f9   :  { %v3523_v30 = vadd.f32 %v2540_v12, %v4844_v33  ;;  %v2542_v24 = vpop.f32.mrb[175].mxu0  ;;  %3153 = vmatmul.mubr.bf16.gmra.mrb[40].mxu1 %v2765_v56  ;;  %v2693_v25 = vmax.f32 %v3521_v49, 0.0 }
 0x3fa   :  { %v3524_v58 = vadd.f32 %v2542_v24, %v4848_v54  ;;  %v2694_v57 = vmax.f32 %v3522_v36, 0.0 }
 0x3fb   :  { %v2695_v44 = vmax.f32 %v3523_v30, 0.0 }
 0x3fc   :  { %v2696_v42 = vmax.f32 %v3524_v58, 0.0  ;;  %v2946_v38 = vpop.f32.mrb[192].mxu1 }
 0x3fd   :  { %v2767_v48 = vpack.c.bf16 %v2695_v44, %v2693_v25  ;;  %v2947_v17 = vadd.f32 %v4975_v22, %v2946_v38  ;;  %v2948_v31 = vpop.f32.mrb[193].mxu1 }
 0x3fe   :  { %v2768_v27 = vpack.c.bf16 %v2696_v42, %v2694_v57  ;;  %v2546_v50 = vpop.f32.mrb[176].mxu0  ;;  %v2949_v21 = vpop.f32.mrb[194].mxu1 }
 0x3ff   :  { %3201 = vst [vmem:[#allocation10] sm:$0xff] %v2947_v17  ;;  %v3525_v41 = vadd.f32 %v2546_v50, %v4844_v33  ;;  %v2950_v40 = vadd.f32 %v4975_v22, %v2949_v21  ;;  %v2548_v29 = vpop.f32.mrb[177].mxu0  ;;  %v2951_v32 = vpop.f32.mrb[195].mxu1 }
 0x400   :  { %v3526_v34 = vadd.f32 %v2548_v29, %v4848_v54  ;;  %v2550_v14 = vpop.f32.mrb[178].mxu0  ;;  %3160 = vmatprep.mubr.bf16.mxu1 %v2768_v27 }
 0x401   :  { %3202 = vst [vmem:[#allocation10 + $0x8] sm:$0xff] %v2950_v40  ;;  %v3527_v3 = vadd.f32 %v2550_v14, %v4844_v33  ;;  %v2552_v11 = vpop.f32.mrb[179].mxu0  ;;  %3161 = vmatmul.mubr.bf16.gmra.mrb[44].mxu1 %v2767_v48  ;;  %v2697_v51 = vmax.f32 %v3525_v41, 0.0 }
 0x402   :  { %v3528_v62 = vadd.f32 %v2552_v11, %v4848_v54  ;;  %v2698_v23 = vmax.f32 %v3526_v34, 0.0 }
 0x403   :  { %v2699_v63 = vmax.f32 %v3527_v3, 0.0 }
 0x404   :  { %v2700_v37 = vmax.f32 %v3528_v62, 0.0  ;;  %v2954_v35 = vpop.f32.mrb[196].mxu1 }
 0x405   :  { %v2769_v1 = vpack.c.bf16 %v2699_v63, %v2697_v51  ;;  %v2955_v7 = vadd.f32 %v4975_v22, %v2954_v35  ;;  %v2956_v10 = vpop.f32.mrb[197].mxu1 }
 0x406   :  { %v2770_v47 = vpack.c.bf16 %v2700_v37, %v2698_v23  ;;  %v2556_v28 = vpop.f32.mrb[180].mxu0  ;;  %v2957_v19 = vpop.f32.mrb[198].mxu1 }
 0x407   :  { %3203 = vst [vmem:[#allocation10 + $0x10] sm:$0xff] %v2955_v7  ;;  %v3529_v9 = vadd.f32 %v2556_v28, %v4844_v33  ;;  %v2958_v46 = vadd.f32 %v4975_v22, %v2957_v19  ;;  %v2558_v26 = vpop.f32.mrb[181].mxu0  ;;  %v2959_v0 = vpop.f32.mrb[199].mxu1 }
 0x408   :  { %v3530_v61 = vadd.f32 %v2558_v26, %v4848_v54  ;;  %v2560_v5 = vpop.f32.mrb[182].mxu0  ;;  %3168 = vmatprep.mubr.bf16.mxu1 %v2770_v47 }
 0x409   :  { %3204 = vst [vmem:[#allocation10 + $0x18] sm:$0xff] %v2958_v46  ;;  %v3531_v55 = vadd.f32 %v2560_v5, %v4844_v33  ;;  %v2562_v6 = vpop.f32.mrb[183].mxu0  ;;  %3169 = vmatmul.mubr.bf16.gmra.mrb[48].mxu1 %v2769_v1  ;;  %v2701_v16 = vmax.f32 %v3529_v9, 0.0 }
 0x40a   :  { %v3532_v39 = vadd.f32 %v2562_v6, %v4848_v54  ;;  %v2702_v59 = vmax.f32 %v3530_v61, 0.0 }
 0x40b   :  { %v2703_v52 = vmax.f32 %v3531_v55, 0.0 }
 0x40c   :  { %v2704_v53 = vmax.f32 %v3532_v39, 0.0  ;;  %v2962_v15 = vpop.f32.mrb[200].mxu1 }
 0x40d   :  { %v2771_v45 = vpack.c.bf16 %v2703_v52, %v2701_v16  ;;  %v2963_v13 = vadd.f32 %v4975_v22, %v2962_v15  ;;  %v2964_v8 = vpop.f32.mrb[201].mxu1 }
 0x40e   :  { %v2772_v43 = vpack.c.bf16 %v2704_v53, %v2702_v59  ;;  %v2566_v2 = vpop.f32.mrb[184].mxu0  ;;  %v2965_v20 = vpop.f32.mrb[202].mxu1 }
 0x40f   :  { %3205 = vst [vmem:[#allocation10 + $0x20] sm:$0xff] %v2963_v13  ;;  %v3533_v56 = vadd.f32 %v2566_v2, %v4844_v33  ;;  %v2966_v4 = vadd.f32 %v4975_v22, %v2965_v20  ;;  %v2568_v18 = vpop.f32.mrb[185].mxu0  ;;  %v2967_v49 = vpop.f32.mrb[203].mxu1 }
 0x410   :  { %v3534_v60 = vadd.f32 %v2568_v18, %v4848_v54  ;;  %v2570_v36 = vpop.f32.mrb[186].mxu0  ;;  %3176 = vmatprep.mubr.bf16.mxu1 %v2772_v43 }
 0x411   :  { %3206 = vst [vmem:[#allocation10 + $0x28] sm:$0xff] %v2966_v4  ;;  %v3535_v12 = vadd.f32 %v2570_v36, %v4844_v33  ;;  %v2572_v30 = vpop.f32.mrb[187].mxu0  ;;  %3177 = vmatmul.mubr.bf16.gmra.mrb[52].mxu1 %v2771_v45  ;;  %v2705_v58 = vmax.f32 %v3533_v56, 0.0 }
 0x412   :  { %v3536_v24 = vadd.f32 %v2572_v30, %v4848_v54  ;;  %v2706_v44 = vmax.f32 %v3534_v60, 0.0 }
 0x413   :  { %v2707_v25 = vmax.f32 %v3535_v12, 0.0 }
 0x414   :  { %v2708_v57 = vmax.f32 %v3536_v24, 0.0  ;;  %v2970_v42 = vpop.f32.mrb[204].mxu1 }
 0x415   :  { %v2773_v38 = vpack.c.bf16 %v2707_v25, %v2705_v58  ;;  %v2971_v48 = vadd.f32 %v4975_v22, %v2970_v42  ;;  %v2972_v17 = vpop.f32.mrb[205].mxu1 }
 0x416   :  { %v2774_v31 = vpack.c.bf16 %v2708_v57, %v2706_v44  ;;  %v2576_v27 = vpop.f32.mrb[188].mxu0  ;;  %v2973_v50 = vpop.f32.mrb[206].mxu1 }
 0x417   :  { %3207 = vst [vmem:[#allocation10 + $0x30] sm:$0xff] %v2971_v48  ;;  %v3537_v21 = vadd.f32 %v2576_v27, %v4844_v33  ;;  %v2974_v41 = vadd.f32 %v4975_v22, %v2973_v50  ;;  %v2578_v40 = vpop.f32.mrb[189].mxu0  ;;  %v2975_v29 = vpop.f32.mrb[207].mxu1 }
 0x418   :  { %v3538_v32 = vadd.f32 %v2578_v40, %v4848_v54  ;;  %v2580_v34 = vpop.f32.mrb[190].mxu0  ;;  %3184 = vmatprep.mubr.bf16.mxu1 %v2774_v31 }
 0x419   :  { %3208 = vst [vmem:[#allocation10 + $0x38] sm:$0xff] %v2974_v41  ;;  %v3539_v14 = vadd.f32 %v2580_v34, %v4844_v33  ;;  %v2582_v3 = vpop.f32.mrb[191].mxu0  ;;  %3185 = vmatmul.mubr.bf16.gmra.mrb[56].mxu1 %v2773_v38  ;;  %v2709_v62 = vmax.f32 %v3537_v21, 0.0 }
 0x41a   :  { %v3540_v11 = vadd.f32 %v2582_v3, %v4848_v54  ;;  %v2710_v63 = vmax.f32 %v3538_v32, 0.0 }
 0x41b   :  { %v2711_v51 = vmax.f32 %v3539_v14, 0.0 }
 0x41c   :  { %v2712_v23 = vmax.f32 %v3540_v11, 0.0  ;;  %v2978_v37 = vpop.f32.mrb[208].mxu1 }
 0x41d   :  { %v2775_v35 = vpack.c.bf16 %v2711_v51, %v2709_v62  ;;  %v2979_v1 = vadd.f32 %v4975_v22, %v2978_v37  ;;  %v2980_v7 = vpop.f32.mrb[209].mxu1 }
 0x41e   :  { %v2776_v10 = vpack.c.bf16 %v2712_v23, %v2710_v63  ;;  %v2981_v47 = vpop.f32.mrb[210].mxu1 }
 0x41f   :  { %3209 = vst [vmem:[#allocation10 + $0x40] sm:$0xff] %v2979_v1  ;;  %v2982_v28 = vadd.f32 %v4975_v22, %v2981_v47  ;;  %v2983_v19 = vpop.f32.mrb[211].mxu1 }
 0x420   :  { %3192 = vmatprep.mubr.bf16.mxu1 %v2776_v10 }
 0x421   :  { %3210 = vst [vmem:[#allocation10 + $0x48] sm:$0xff] %v2982_v28  ;;  %3193 = vmatmul.mubr.bf16.gmra.mrb[60].mxu1 %v2775_v35 }
 0x424   :  { %v2986_v33 = vpop.f32.mrb[212].mxu1 }
 0x425   :  { %v2987_v54 = vadd.f32 %v4975_v22, %v2986_v33  ;;  %v2988_v9 = vpop.f32.mrb[213].mxu1 }
 0x426   :  { %v2989_v46 = vpop.f32.mrb[214].mxu1 }
 0x427   :  { %3211 = vst [vmem:[#allocation10 + $0x50] sm:$0xff] %v2987_v54  ;;  %v2990_v26 = vadd.f32 %v4975_v22, %v2989_v46  ;;  %v2991_v0 = vpop.f32.mrb[215].mxu1 }
 0x429   :  { %3212 = vst [vmem:[#allocation10 + $0x58] sm:$0xff] %v2990_v26 }
 0x42c   :  { %v2994_v61 = vpop.f32.mrb[216].mxu1 }
 0x42d   :  { %v2995_v5 = vadd.f32 %v4975_v22, %v2994_v61  ;;  %v2996_v55 = vpop.f32.mrb[217].mxu1 }
 0x42e   :  { %v2997_v6 = vpop.f32.mrb[218].mxu1 }
 0x42f   :  { %3213 = vst [vmem:[#allocation10 + $0x60] sm:$0xff] %v2995_v5  ;;  %v2998_v39 = vadd.f32 %v4975_v22, %v2997_v6  ;;  %v2999_v16 = vpop.f32.mrb[219].mxu1 }
 0x431   :  { %3214 = vst [vmem:[#allocation10 + $0x68] sm:$0xff] %v2998_v39 }
 0x434   :  { %v3002_v52 = vpop.f32.mrb[220].mxu1 }
 0x435   :  { %v3003_v59 = vadd.f32 %v4975_v22, %v3002_v52  ;;  %v3004_v53 = vpop.f32.mrb[221].mxu1 }
 0x436   :  { %v3005_v15 = vpop.f32.mrb[222].mxu1 }
 0x437   :  { %3215 = vst [vmem:[#allocation10 + $0x70] sm:$0xff] %v3003_v59  ;;  %v3006_v45 = vadd.f32 %v4975_v22, %v3005_v15  ;;  %v3007_v13 = vpop.f32.mrb[223].mxu1 }
 0x439   :  { %3216 = vst [vmem:[#allocation10 + $0x78] sm:$0xff] %v3006_v45 }
 0x43c   :  { %v3010_v8 = vpop.f32.mrb[224].mxu1 }
 0x43d   :  { %v3011_v43 = vadd.f32 %v4975_v22, %v3010_v8  ;;  %v3012_v2 = vpop.f32.mrb[225].mxu1 }
 0x43e   :  { %v3013_v20 = vpop.f32.mrb[226].mxu1 }
 0x43f   :  { %3217 = vst [vmem:[#allocation10 + $0x80] sm:$0xff] %v3011_v43  ;;  %v3014_v56 = vadd.f32 %v4975_v22, %v3013_v20  ;;  %v3015_v4 = vpop.f32.mrb[227].mxu1 }
 0x441   :  { %3218 = vst [vmem:[#allocation10 + $0x88] sm:$0xff] %v3014_v56 }
 0x444   :  { %v3018_v18 = vpop.f32.mrb[228].mxu1 }
 0x445   :  { %v3019_v49 = vadd.f32 %v4975_v22, %v3018_v18  ;;  %v3020_v60 = vpop.f32.mrb[229].mxu1 }
 0x446   :  { %v3021_v36 = vpop.f32.mrb[230].mxu1 }
 0x447   :  { %3219 = vst [vmem:[#allocation10 + $0x90] sm:$0xff] %v3019_v49  ;;  %v3022_v12 = vadd.f32 %v4975_v22, %v3021_v36  ;;  %v3023_v30 = vpop.f32.mrb[231].mxu1 }
 0x449   :  { %3220 = vst [vmem:[#allocation10 + $0x98] sm:$0xff] %v3022_v12 }
 0x44c   :  { %v3026_v24 = vpop.f32.mrb[232].mxu1 }
 0x44d   :  { %v3027_v58 = vadd.f32 %v4975_v22, %v3026_v24  ;;  %v3028_v25 = vpop.f32.mrb[233].mxu1 }
 0x44e   :  { %v3029_v44 = vpop.f32.mrb[234].mxu1 }
 0x44f   :  { %3221 = vst [vmem:[#allocation10 + $0xa0] sm:$0xff] %v3027_v58  ;;  %v3030_v57 = vadd.f32 %v4975_v22, %v3029_v44  ;;  %v3031_v42 = vpop.f32.mrb[235].mxu1 }
 0x451   :  { %3222 = vst [vmem:[#allocation10 + $0xa8] sm:$0xff] %v3030_v57 }
 0x454   :  { %v3034_v38 = vpop.f32.mrb[236].mxu1 }
 0x455   :  { %v3035_v48 = vadd.f32 %v4975_v22, %v3034_v38  ;;  %v3036_v17 = vpop.f32.mrb[237].mxu1 }
 0x456   :  { %v3037_v31 = vpop.f32.mrb[238].mxu1 }
 0x457   :  { %3223 = vst [vmem:[#allocation10 + $0xb0] sm:$0xff] %v3035_v48  ;;  %v3038_v27 = vadd.f32 %v4975_v22, %v3037_v31  ;;  %v3039_v50 = vpop.f32.mrb[239].mxu1 }
 0x459   :  { %3224 = vst [vmem:[#allocation10 + $0xb8] sm:$0xff] %v3038_v27 }
 0x45c   :  { %v3042_v21 = vpop.f32.mrb[240].mxu1 }
 0x45d   :  { %v3043_v41 = vadd.f32 %v4975_v22, %v3042_v21  ;;  %v3044_v40 = vpop.f32.mrb[241].mxu1 }
 0x45e   :  { %v3045_v29 = vpop.f32.mrb[242].mxu1 }
 0x45f   :  { %3225 = vst [vmem:[#allocation10 + $0xc0] sm:$0xff] %v3043_v41  ;;  %v3046_v32 = vadd.f32 %v4975_v22, %v3045_v29  ;;  %v3047_v34 = vpop.f32.mrb[243].mxu1 }
 0x461   :  { %3226 = vst [vmem:[#allocation10 + $0xc8] sm:$0xff] %v3046_v32 }
 0x464   :  { %v3050_v14 = vpop.f32.mrb[244].mxu1 }
 0x465   :  { %v3051_v3 = vadd.f32 %v4975_v22, %v3050_v14  ;;  %v3052_v11 = vpop.f32.mrb[245].mxu1 }
 0x466   :  { %v3053_v62 = vpop.f32.mrb[246].mxu1 }
 0x467   :  { %3227 = vst [vmem:[#allocation10 + $0xd0] sm:$0xff] %v3051_v3  ;;  %v3054_v51 = vadd.f32 %v4975_v22, %v3053_v62  ;;  %v3055_v63 = vpop.f32.mrb[247].mxu1 }
 0x469   :  { %3228 = vst [vmem:[#allocation10 + $0xd8] sm:$0xff] %v3054_v51 }
 0x46c   :  { %v3058_v23 = vpop.f32.mrb[248].mxu1 }
 0x46d   :  { %v3059_v37 = vadd.f32 %v4975_v22, %v3058_v23  ;;  %v3060_v35 = vpop.f32.mrb[249].mxu1 }
 0x46e   :  { %v3061_v1 = vpop.f32.mrb[250].mxu1 }
 0x46f   :  { %3229 = vst [vmem:[#allocation10 + $0xe0] sm:$0xff] %v3059_v37  ;;  %v3062_v7 = vadd.f32 %v4975_v22, %v3061_v1  ;;  %v3063_v10 = vpop.f32.mrb[251].mxu1 }
 0x471   :  { %3230 = vst [vmem:[#allocation10 + $0xe8] sm:$0xff] %v3062_v7 }
 0x474   :  { %v3066_v47 = vpop.f32.mrb[252].mxu1 }
 0x475   :  { %v3067_v28 = vadd.f32 %v4975_v22, %v3066_v47  ;;  %v3068_v19 = vpop.f32.mrb[253].mxu1 }
 0x476   :  { %v3069_v33 = vpop.f32.mrb[254].mxu1 }
 0x477   :  { %3231 = vst [vmem:[#allocation10 + $0xf0] sm:$0xff] %v3067_v28  ;;  %v3070_v54 = vadd.f32 %v4975_v22, %v3069_v33  ;;  %v3071_v9 = vpop.f32.mrb[255].mxu1 }
 0x479   :  { %3232 = vst [vmem:[#allocation10 + $0xf8] sm:$0xff] %v3070_v54 }
 0x47c   :  { %v3074_v46 = vpop.f32.mrb[0].mxu1 }
 0x47d   :  { %v3075_v26 = vadd.f32 %v4975_v22, %v3074_v46  ;;  %v3076_v0 = vpop.f32.mrb[1].mxu1 }
 0x47e   :  { %v3077_v61 = vpop.f32.mrb[2].mxu1 }
 0x47f   :  { %3233 = vst [vmem:[#allocation10 + $0x100] sm:$0xff] %v3075_v26  ;;  %v3078_v5 = vadd.f32 %v4975_v22, %v3077_v61  ;;  %v3079_v55 = vpop.f32.mrb[3].mxu1 }
 0x481   :  { %3234 = vst [vmem:[#allocation10 + $0x108] sm:$0xff] %v3078_v5 }
 0x484   :  { %v3082_v6 = vpop.f32.mrb[4].mxu1 }
 0x485   :  { %v3083_v39 = vadd.f32 %v4975_v22, %v3082_v6  ;;  %v3084_v16 = vpop.f32.mrb[5].mxu1 }
 0x486   :  { %v3085_v52 = vpop.f32.mrb[6].mxu1 }
 0x487   :  { %3235 = vst [vmem:[#allocation10 + $0x110] sm:$0xff] %v3083_v39  ;;  %v3086_v59 = vadd.f32 %v4975_v22, %v3085_v52  ;;  %v3087_v53 = vpop.f32.mrb[7].mxu1 }
 0x489   :  { %3236 = vst [vmem:[#allocation10 + $0x118] sm:$0xff] %v3086_v59 }
 0x48c   :  { %v3090_v15 = vpop.f32.mrb[8].mxu1 }
 0x48d   :  { %v3091_v45 = vadd.f32 %v4975_v22, %v3090_v15  ;;  %v3092_v13 = vpop.f32.mrb[9].mxu1 }
 0x48e   :  { %v3093_v8 = vpop.f32.mrb[10].mxu1 }
 0x48f   :  { %3237 = vst [vmem:[#allocation10 + $0x120] sm:$0xff] %v3091_v45  ;;  %v3094_v43 = vadd.f32 %v4975_v22, %v3093_v8  ;;  %v3095_v2 = vpop.f32.mrb[11].mxu1 }
 0x491   :  { %3238 = vst [vmem:[#allocation10 + $0x128] sm:$0xff] %v3094_v43 }
 0x494   :  { %v3098_v20 = vpop.f32.mrb[12].mxu1 }
 0x495   :  { %v3099_v56 = vadd.f32 %v4975_v22, %v3098_v20  ;;  %v3100_v4 = vpop.f32.mrb[13].mxu1 }
 0x496   :  { %v3101_v18 = vpop.f32.mrb[14].mxu1 }
 0x497   :  { %3239 = vst [vmem:[#allocation10 + $0x130] sm:$0xff] %v3099_v56  ;;  %v3102_v49 = vadd.f32 %v4975_v22, %v3101_v18  ;;  %v3103_v60 = vpop.f32.mrb[15].mxu1 }
 0x499   :  { %3240 = vst [vmem:[#allocation10 + $0x138] sm:$0xff] %v3102_v49 }
 0x49c   :  { %v3106_v36 = vpop.f32.mrb[16].mxu1 }
 0x49d   :  { %v3107_v12 = vadd.f32 %v4975_v22, %v3106_v36  ;;  %v3108_v30 = vpop.f32.mrb[17].mxu1 }
 0x49e   :  { %v3109_v24 = vpop.f32.mrb[18].mxu1 }
 0x49f   :  { %3241 = vst [vmem:[#allocation10 + $0x140] sm:$0xff] %v3107_v12  ;;  %v3110_v58 = vadd.f32 %v4975_v22, %v3109_v24  ;;  %v3111_v25 = vpop.f32.mrb[19].mxu1 }
 0x4a1   :  { %3242 = vst [vmem:[#allocation10 + $0x148] sm:$0xff] %v3110_v58 }
 0x4a4   :  { %v3114_v44 = vpop.f32.mrb[20].mxu1 }
 0x4a5   :  { %v3115_v57 = vadd.f32 %v4975_v22, %v3114_v44  ;;  %v3116_v42 = vpop.f32.mrb[21].mxu1 }
 0x4a6   :  { %v3117_v38 = vpop.f32.mrb[22].mxu1 }
 0x4a7   :  { %3243 = vst [vmem:[#allocation10 + $0x150] sm:$0xff] %v3115_v57  ;;  %v3118_v48 = vadd.f32 %v4975_v22, %v3117_v38  ;;  %v3119_v17 = vpop.f32.mrb[23].mxu1 }
 0x4a9   :  { %3244 = vst [vmem:[#allocation10 + $0x158] sm:$0xff] %v3118_v48 }
 0x4ac   :  { %v3122_v31 = vpop.f32.mrb[24].mxu1 }
 0x4ad   :  { %v3123_v27 = vadd.f32 %v4975_v22, %v3122_v31  ;;  %v3124_v50 = vpop.f32.mrb[25].mxu1 }
 0x4ae   :  { %v3125_v21 = vpop.f32.mrb[26].mxu1 }
 0x4af   :  { %3245 = vst [vmem:[#allocation10 + $0x160] sm:$0xff] %v3123_v27  ;;  %v3126_v41 = vadd.f32 %v4975_v22, %v3125_v21  ;;  %v3127_v40 = vpop.f32.mrb[27].mxu1 }
 0x4b1   :  { %3246 = vst [vmem:[#allocation10 + $0x168] sm:$0xff] %v3126_v41 }
 0x4b4   :  { %v3130_v29 = vpop.f32.mrb[28].mxu1 }
 0x4b5   :  { %v3131_v32 = vadd.f32 %v4975_v22, %v3130_v29  ;;  %v3132_v34 = vpop.f32.mrb[29].mxu1 }
 0x4b6   :  { %v3133_v14 = vpop.f32.mrb[30].mxu1 }
 0x4b7   :  { %3247 = vst [vmem:[#allocation10 + $0x170] sm:$0xff] %v3131_v32  ;;  %v3134_v3 = vadd.f32 %v4975_v22, %v3133_v14  ;;  %v3135_v11 = vpop.f32.mrb[31].mxu1 }
 0x4b9   :  { %3248 = vst [vmem:[#allocation10 + $0x178] sm:$0xff] %v3134_v3 }
 0x4bc   :  { %v3138_v62 = vpop.f32.mrb[32].mxu1 }
 0x4bd   :  { %v3139_v51 = vadd.f32 %v4975_v22, %v3138_v62  ;;  %v3140_v63 = vpop.f32.mrb[33].mxu1 }
 0x4be   :  { %v3141_v23 = vpop.f32.mrb[34].mxu1 }
 0x4bf   :  { %3249 = vst [vmem:[#allocation10 + $0x180] sm:$0xff] %v3139_v51  ;;  %v3142_v37 = vadd.f32 %v4975_v22, %v3141_v23  ;;  %v3143_v35 = vpop.f32.mrb[35].mxu1 }
 0x4c1   :  { %3250 = vst [vmem:[#allocation10 + $0x188] sm:$0xff] %v3142_v37 }
 0x4c4   :  { %v3146_v1 = vpop.f32.mrb[36].mxu1 }
 0x4c5   :  { %v3147_v7 = vadd.f32 %v4975_v22, %v3146_v1  ;;  %v3148_v10 = vpop.f32.mrb[37].mxu1 }
 0x4c6   :  { %v3149_v47 = vpop.f32.mrb[38].mxu1 }
 0x4c7   :  { %3251 = vst [vmem:[#allocation10 + $0x190] sm:$0xff] %v3147_v7  ;;  %v3150_v28 = vadd.f32 %v4975_v22, %v3149_v47  ;;  %v3151_v19 = vpop.f32.mrb[39].mxu1 }
 0x4c9   :  { %3252 = vst [vmem:[#allocation10 + $0x198] sm:$0xff] %v3150_v28 }
 0x4cc   :  { %v3154_v33 = vpop.f32.mrb[40].mxu1 }
 0x4cd   :  { %v3155_v54 = vadd.f32 %v4975_v22, %v3154_v33  ;;  %v3156_v9 = vpop.f32.mrb[41].mxu1 }
 0x4ce   :  { %v3157_v46 = vpop.f32.mrb[42].mxu1 }
 0x4cf   :  { %3253 = vst [vmem:[#allocation10 + $0x1a0] sm:$0xff] %v3155_v54  ;;  %v3158_v26 = vadd.f32 %v4975_v22, %v3157_v46  ;;  %v3159_v0 = vpop.f32.mrb[43].mxu1 }
 0x4d1   :  { %3254 = vst [vmem:[#allocation10 + $0x1a8] sm:$0xff] %v3158_v26 }
 0x4d4   :  { %v3162_v61 = vpop.f32.mrb[44].mxu1 }
 0x4d5   :  { %v3163_v5 = vadd.f32 %v4975_v22, %v3162_v61  ;;  %v3164_v55 = vpop.f32.mrb[45].mxu1 }
 0x4d6   :  { %v3165_v6 = vpop.f32.mrb[46].mxu1 }
 0x4d7   :  { %3255 = vst [vmem:[#allocation10 + $0x1b0] sm:$0xff] %v3163_v5  ;;  %v3166_v39 = vadd.f32 %v4975_v22, %v3165_v6  ;;  %v3167_v16 = vpop.f32.mrb[47].mxu1 }
 0x4d9   :  { %3256 = vst [vmem:[#allocation10 + $0x1b8] sm:$0xff] %v3166_v39 }
 0x4dc   :  { %v3170_v52 = vpop.f32.mrb[48].mxu1 }
 0x4dd   :  { %v3171_v59 = vadd.f32 %v4975_v22, %v3170_v52  ;;  %v3172_v53 = vpop.f32.mrb[49].mxu1 }
 0x4de   :  { %v3173_v15 = vpop.f32.mrb[50].mxu1 }
 0x4df   :  { %3257 = vst [vmem:[#allocation10 + $0x1c0] sm:$0xff] %v3171_v59  ;;  %v3174_v45 = vadd.f32 %v4975_v22, %v3173_v15  ;;  %v3175_v13 = vpop.f32.mrb[51].mxu1 }
 0x4e1   :  { %3258 = vst [vmem:[#allocation10 + $0x1c8] sm:$0xff] %v3174_v45 }
 0x4e4   :  { %v3178_v8 = vpop.f32.mrb[52].mxu1 }
 0x4e5   :  { %v3179_v43 = vadd.f32 %v4975_v22, %v3178_v8  ;;  %v3180_v2 = vpop.f32.mrb[53].mxu1 }
 0x4e6   :  { %v3181_v20 = vpop.f32.mrb[54].mxu1 }
 0x4e7   :  { %3259 = vst [vmem:[#allocation10 + $0x1d0] sm:$0xff] %v3179_v43  ;;  %v3182_v56 = vadd.f32 %v4975_v22, %v3181_v20  ;;  %v3183_v4 = vpop.f32.mrb[55].mxu1 }
 0x4e9   :  { %3260 = vst [vmem:[#allocation10 + $0x1d8] sm:$0xff] %v3182_v56 }
 0x4ec   :  { %v3186_v18 = vpop.f32.mrb[56].mxu1 }
 0x4ed   :  { %v3187_v49 = vadd.f32 %v4975_v22, %v3186_v18  ;;  %v3188_v60 = vpop.f32.mrb[57].mxu1 }
 0x4ee   :  { %v3189_v36 = vpop.f32.mrb[58].mxu1 }
 0x4ef   :  { %3261 = vst [vmem:[#allocation10 + $0x1e0] sm:$0xff] %v3187_v49  ;;  %v3190_v12 = vadd.f32 %v4975_v22, %v3189_v36  ;;  %v3191_v30 = vpop.f32.mrb[59].mxu1 }
 0x4f1   :  { %3262 = vst [vmem:[#allocation10 + $0x1e8] sm:$0xff] %v3190_v12 }
 0x4f4   :  { %v3194_v24 = vpop.f32.mrb[60].mxu1 }
 0x4f5   :  { %v3195_v58 = vadd.f32 %v4975_v22, %v3194_v24  ;;  %v3196_v25 = vpop.f32.mrb[61].mxu1 }
 0x4f6   :  { %v3197_v44 = vpop.f32.mrb[62].mxu1 }
 0x4f7   :  { %3263 = vst [vmem:[#allocation10 + $0x1f0] sm:$0xff] %v3195_v58  ;;  %v3198_v57 = vadd.f32 %v4975_v22, %v3197_v44  ;;  %v3199_v42 = vpop.f32.mrb[63].mxu1 }
 0x4f9   :  { %3264 = vst [vmem:[#allocation10 + $0x1f8] sm:$0xff] %v3198_v57 }
 0x4fa   :  { %3941 = shalt.err (!%p3938_p8)
}
 0x4fb   :  { %s3942_s0 = scalar_lea.hbm %s5079_s7, 8192 }
 0x4fc   :  { %p3943_p9 = scmp.ne.s32.totalorder %s5079_s7, %s3942_s0  ;;  %p3946_p10 = scmp.lt.u32.totalorder %s3942_s0, %s5079_s7 }
 0x4fe   :  { %p3948_p11 = pnand %p3946_p10, %p3943_p9 }
 0x500   :  { %3951 = shalt.err (!%p3948_p11)
}
 0x501   :  { %3276 = dma.vmem_to_hbm [thread:$0]  %s3271_s12, 8192, %s5079_s7, [#allocation4], %s3964_s1, %s3964_s1, %s3965_s25  }
 0x502   :  { %3958 = dma.done.wait [#allocation4], 8192  }
 0x503   :  { %3959 = vsyncadd [#allocation4], 4294959104 }
 0x504   :  { %3280 = vsyncpa [#allocation3], 1 }
 0x505   :  { %3281 = vsyncpa [#allocation6], 1 }
 0x506   :  { %3282 = vsyncpa [#allocation9], 1 }
 0x507   :  { %3283 = vsyncpa [#allocation4], 1 }

</bundles_post_ra>
